<compile_context>
chip_gen: v6e
topology: v6e:2x2x1
jax: 0.10.0
libtpu: 0.0.40
codegen_flags: <defaults>
</compile_context>

<pallas_src>
import functools

import jax
import jax.numpy as jnp
from jax import lax
from jax.experimental import pallas as pl
from jax.experimental.pallas import tpu as pltpu


def _round_up(n, m):
    return ((n + m - 1) // m) * m


def _padded_input_dim(D):
    # Lane-align the feature dim only when it is big enough to matter.
    return _round_up(D, 128) if D > 128 else D


def _num_tensorcores():
    """Best-effort TensorCore-per-device count (1 on v5e/v6e, 2 on v7x)."""
    n = 1
    try:
        dev = jax.devices()[0]
        for attr in ("num_cores", "core_count"):
            v = getattr(dev, attr, None)
            if isinstance(v, int) and v > 0:
                n = v
                break
    except Exception:
        n = 1
    return max(1, min(int(n), 2))


def _default_vmem_limit():
    """~75% of physical VMEM: ~48 MiB on 64 MiB parts, ~96 MiB on 128 MiB parts."""
    try:
        cap = int(pltpu.get_tpu_info().vmem_capacity_bytes)
    except Exception:
        cap = 64 << 20
    return max(32 << 20, min(int(cap * 0.75), 100 << 20))


def _choose_batch_tile(B, num_tc):
    if num_tc > 1 and B > 16:
        # Split the batch so the "parallel" grid axis shards across TensorCores.
        bt = _round_up(-(-B // num_tc), 16)
    else:
        # Single TC: one fat tile so the serial recurrence runs once.
        bt = _round_up(B, 16)
    return max(16, min(bt, 256))


def _pick_time_chunk(T, b_tile, hidden_pad, input_dim, out_dim, vmem_limit_bytes):
    """Largest time chunk whose full VMEM footprint fits under the limit."""
    Hp = hidden_pad
    Dl = _round_up(max(input_dim, 1), 128)   # lane-padded sizes as laid out in VMEM
    Ol = _round_up(max(out_dim, 1), 128)
    resident = 2 * (                          # weights/bias/out (counted double-buffered)
        Dl * 4 * Hp * 2                       # w_ih0 (bf16)
        + 3 * Hp * 4 * Hp * 2                 # w_hh0, w_ih1, w_hh1 (bf16)
        + 2 * 8 * 4 * Hp * 4                  # b0, b1 (f32, sublane padded)
        + Hp * Ol * 2 + 8 * Ol * 4            # w_fc, b_fc
        + b_tile * Ol * 4                     # out block (f32)
    )
    resident += b_tile * Hp * (2 + 4) * 2     # h (bf16) + c (f32), two layers
    headroom = 2 << 20                        # compiler-internal scratch
    budget = max(vmem_limit_bytes - resident - headroom, 1 << 20)
    per_t = b_tile * (2 * Dl * 2              # x chunk (bf16), double-buffered
                      + 4 * Hp * 4)           # precomputed layer-0 gates (f32)
    return int(max(1, min(T, budget // per_t)))


# ---------------------------------------------------------------------------
# Kernel
# ---------------------------------------------------------------------------
def _lstm_kernel(x_ref,       # (Tt, Bt, Dp)  bf16  streamed time-chunk (time-major)
                 w_ih0_ref,   # (Dp, 4Hp)     bf16  layer-0 input weights (resident)
                 w_hh0_ref,   # (Hp, 4Hp)     bf16  layer-0 recurrent weights
                 b0_ref,      # (1,  4Hp)     f32   b_ih0 + b_hh0
                 w_ih1_ref,   # (Hp, 4Hp)     bf16  layer-1 input weights
                 w_hh1_ref,   # (Hp, 4Hp)     bf16  layer-1 recurrent weights
                 b1_ref,      # (1,  4Hp)     f32   b_ih1 + b_hh1
                 w_fc_ref,    # (Hp, O)       bf16
                 b_fc_ref,    # (1,  O)       f32
                 out_ref,     # (Bt, O)       f32
                 gp_ref,      # scratch (Tt, Bt, 4Hp) f32: precomputed layer-0 gates
                 h0_ref, c0_ref, h1_ref, c1_ref,  # scratch: h bf16, c f32
                 *, hidden_pad, t_chunk, b_tile, seq_len, unroll):
    Hp, Tt, Bt = hidden_pad, t_chunk, b_tile
    D = x_ref.shape[-1]
    t_blk = pl.program_id(1)

    # h = c = 0 at the first time-chunk of every batch tile (scratch persists
    # across grid steps, so gate the init with pl.when).
    @pl.when(t_blk == 0)
    def _():
        h0_ref[...] = jnp.zeros_like(h0_ref)
        c0_ref[...] = jnp.zeros_like(c0_ref)
        h1_ref[...] = jnp.zeros_like(h1_ref)
        c1_ref[...] = jnp.zeros_like(c1_ref)

    # ---- Phase 1: layer-0 input projection for the whole chunk -------------
    # One (Tt*Bt, D) @ (D, 4Hp) matmul instead of Tt tiny (Bt, D) matmuls;
    # the bias broadcast is folded in here, off the serial critical path.
    # TODO(synk): overlap this projection with the Phase-2 recurrence.
    x2d = x_ref[...].reshape(Tt * Bt, D)          # tile-aligned merge (Bt % 16 == 0)
    proj = jnp.dot(x2d, w_ih0_ref[...], preferred_element_type=jnp.float32)
    gp_ref[...] = proj.reshape(Tt, Bt, 4 * Hp) + b0_ref[...]

    # ---- Phase 2: recurrence ------------------------------------------------
    w_hh0 = w_hh0_ref[...]
    w_ih1 = w_ih1_ref[...]
    w_hh1 = w_hh1_ref[...]
    b1 = jnp.broadcast_to(b1_ref[...], (Bt, 4 * Hp))     # hoisted: once per chunk

    # Per-gate-column scale (i, f, o -> 0.5 for sigmoid-via-tanh; g -> 1.0).
    col = lax.broadcasted_iota(jnp.int32, (1, 4 * Hp), 1)
    gate_scale = jnp.broadcast_to(
        jnp.where((col >= 2 * Hp) & (col < 3 * Hp),
                  jnp.float32(1.0), jnp.float32(0.5)),
        (Bt, 4 * Hp))

    def cell(gates, c):
        # One dense EUP tanh over the whole (Bt, 4Hp) gate block;
        # sigmoid(v) = 0.5*tanh(0.5 v)+0.5 recovered with a cheap VPU affine.
        t = jnp.tanh(gates * gate_scale)
        i = 0.5 * t[:, 0 * Hp:1 * Hp] + 0.5
        f = 0.5 * t[:, 1 * Hp:2 * Hp] + 0.5
        g = t[:, 2 * Hp:3 * Hp]
        o = 0.5 * t[:, 3 * Hp:4 * Hp] + 0.5
        c_new = f * c + i * g
        return o * jnp.tanh(c_new), c_new

    def step(t, carry):
        h0, c0, h1, c1 = carry                   # h: bf16, c: f32
        # layer 0: only the recurrent matmul remains on the serial path
        g0 = gp_ref[t] + jnp.dot(h0, w_hh0, preferred_element_type=jnp.float32)
        h0f, c0 = cell(g0, c0)
        h0 = h0f.astype(jnp.bfloat16)
        # layer 1: two back-to-back MXU dots (no per-step concat materialization)
        g1 = (jnp.dot(h0, w_ih1, preferred_element_type=jnp.float32)
              + jnp.dot(h1, w_hh1, preferred_element_type=jnp.float32) + b1)
        h1f, c1 = cell(g1, c1)
        return h0, c0, h1f.astype(jnp.bfloat16), c1

    carry = (h0_ref[...], c0_ref[...], h1_ref[...], c1_ref[...])
    if seq_len % Tt == 0:
        h0, c0, h1, c1 = lax.fori_loop(0, Tt, step, carry, unroll=unroll)
    else:
        # Ragged tail: only the valid timesteps of this chunk are consumed;
        # padded timesteps exist in gp_ref but are never read.
        t_len = jnp.minimum(Tt, seq_len - t_blk * Tt)
        h0, c0, h1, c1 = lax.fori_loop(0, t_len, step, carry)

    # persist state for the next time-chunk of this batch tile
    h0_ref[...] = h0
    c0_ref[...] = c0
    h1_ref[...] = h1
    c1_ref[...] = c1

    # out = fc(dropout(h_top[:, -1, :])); dropout is identity at inference.
    # FC is evaluated only on the last chunk (previously computed & discarded
    # on every chunk).
    # TODO(synk): training-mode dropout (inter-layer + pre-fc) not implemented.
    @pl.when(t_blk == pl.num_programs(1) - 1)
    def _():
        out_ref[...] = (jnp.dot(h1, w_fc_ref[...],
                                preferred_element_type=jnp.float32)
                        + b_fc_ref[...])


# ---------------------------------------------------------------------------
# Wrapper
# ---------------------------------------------------------------------------
def lstm_sentiment_forward(x, params, *, time_chunk=None, vmem_limit_bytes=None):
    """x: [B, T, D] (batch_first, like PyTorch). Returns [B, output_dim] f32."""
    B, T, D = x.shape
    w_ih0, w_hh0, b0 = params["w_ih0"], params["w_hh0"], params["b0"]
    w_ih1, w_hh1, b1 = params["w_ih1"], params["w_hh1"], params["b1"]
    w_fc, b_fc = params["w_fc"], params["b_fc"]
    Dp = w_ih0.shape[0]
    Hp = w_hh0.shape[0]
    O = w_fc.shape[1]
    assert Dp >= D

    if vmem_limit_bytes is None:
        vmem_limit_bytes = _default_vmem_limit()

    num_tc = _num_tensorcores()
    Bt = _choose_batch_tile(B, num_tc)
    Bp = _round_up(B, Bt)

    Tt = int(time_chunk or _pick_time_chunk(T, Bt, Hp, Dp, O, vmem_limit_bytes))
    n_chunks = -(-T // Tt)
    Tp = n_chunks * Tt

    # unroll vs vreg pressure: big unroll only for small batch tiles.
    if Bt <= 32:
        unroll = 8
    elif Bt <= 64:
        unroll = 4
    else:
        unroll = 2
    unroll = max(1, min(unroll, Tt))

    # Zero-pad batch / ragged-time tail / feature dim and fold the time-major
    # transpose into the single bf16-cast pass over x (fused by XLA).
    x_p = jnp.pad(x, ((0, Bp - B), (0, Tp - T), (0, Dp - D)))
    x_tm = jnp.transpose(x_p, (1, 0, 2)).astype(jnp.bfloat16)   # (Tp, Bp, Dp)

    grid = (Bp // Bt, n_chunks)
    kernel = functools.partial(_lstm_kernel, hidden_pad=Hp, t_chunk=Tt,
                               b_tile=Bt, seq_len=T, unroll=unroll)

    out = pl.pallas_call(
        kernel,
        out_shape=jax.ShapeDtypeStruct((Bp, O), jnp.float32),
        grid=grid,
        in_specs=[
            pl.BlockSpec((Tt, Bt, Dp), lambda b, t: (t, b, 0)),    # streamed x chunk
            pl.BlockSpec(w_ih0.shape, lambda b, t: (0, 0)),        # resident weights
            pl.BlockSpec(w_hh0.shape, lambda b, t: (0, 0)),
            pl.BlockSpec(b0.shape, lambda b, t: (0, 0)),
            pl.BlockSpec(w_ih1.shape, lambda b, t: (0, 0)),
            pl.BlockSpec(w_hh1.shape, lambda b, t: (0, 0)),
            pl.BlockSpec(b1.shape, lambda b, t: (0, 0)),
            pl.BlockSpec(w_fc.shape, lambda b, t: (0, 0)),
            pl.BlockSpec(b_fc.shape, lambda b, t: (0, 0)),
        ],
        out_specs=pl.BlockSpec((Bt, O), lambda b, t: (b, 0)),
        scratch_shapes=[
            pltpu.VMEM((Tt, Bt, 4 * Hp), jnp.float32),  # precomputed layer-0 gates
            pltpu.VMEM((Bt, Hp), jnp.bfloat16),         # h layer 0 (MXU operand dtype)
            pltpu.VMEM((Bt, Hp), jnp.float32),          # c layer 0
            pltpu.VMEM((Bt, Hp), jnp.bfloat16),         # h layer 1
            pltpu.VMEM((Bt, Hp), jnp.float32),          # c layer 1
        ],
        compiler_params=pltpu.CompilerParams(
            dimension_semantics=("parallel", "arbitrary"),
            vmem_limit_bytes=int(vmem_limit_bytes),
        ),
    )(x_tm, w_ih0, w_hh0, b0, w_ih1, w_hh1, b1, w_fc, b_fc)
    return out[:B]


# ---------------------------------------------------------------------------
# Parameters (PyTorch layout -> padded / transposed kernel layout)
# ---------------------------------------------------------------------------
def init_raw_params(key, input_dim, hidden_dim, output_dim):
    """PyTorch-layout params with U(-1/sqrt(H), 1/sqrt(H)) init."""
    H = hidden_dim
    k = 1.0 / jnp.sqrt(jnp.float32(H))
    keys = jax.random.split(key, 10)
    u = lambda kk, shape: jax.random.uniform(kk, shape, jnp.float32, -k, k)
    return {
        "w_ih_l0": u(keys[0], (4 * H, input_dim)),
        "w_hh_l0": u(keys[1], (4 * H, H)),
        "b_ih_l0": u(keys[2], (4 * H,)),
        "b_hh_l0": u(keys[3], (4 * H,)),
        "w_ih_l1": u(keys[4], (4 * H, H)),
        "w_hh_l1": u(keys[5], (4 * H, H)),
        "b_ih_l1": u(keys[6], (4 * H,)),
        "b_hh_l1": u(keys[7], (4 * H,)),
        "w_fc": u(keys[8], (output_dim, H)),
        "b_fc": u(keys[9], (output_dim,)),
    }


def prepare_params(raw, hidden_dim):
    """Transpose, per-gate pad H->Hp (multiple of 128), optionally lane-pad D, cast bf16.

    Zero padding is exact: padded gate pre-activations are 0 -> padded c stays 0
    and padded h stays 0, and padded weight rows/columns contribute nothing.
    """
    H = hidden_dim
    Hp = _round_up(H, 128)
    D = raw["w_ih_l0"].shape[1]
    Dp = _padded_input_dim(D)

    def pad_gate_cols(w_t):  # (K, 4H) -> (K, 4Hp), padding each i/f/g/o block
        K = w_t.shape[0]
        w4 = w_t.reshape(K, 4, H)
        return jnp.pad(w4, ((0, 0), (0, 0), (0, Hp - H))).reshape(K, 4 * Hp)

    def pad_h_rows(w):       # (H, N) -> (Hp, N)
        return jnp.pad(w, ((0, Hp - H), (0, 0)))

    bf16 = jnp.bfloat16
    w_ih0 = pad_gate_cols(raw["w_ih_l0"].T)                               # (D, 4Hp)
    w_ih0 = jnp.pad(w_ih0, ((0, Dp - D), (0, 0))).astype(bf16)            # (Dp, 4Hp)
    w_hh0 = pad_h_rows(pad_gate_cols(raw["w_hh_l0"].T)).astype(bf16)      # (Hp, 4Hp)
    b0 = pad_gate_cols((raw["b_ih_l0"] + raw["b_hh_l0"])[None, :])        # (1, 4Hp) f32

    w_ih1 = pad_h_rows(pad_gate_cols(raw["w_ih_l1"].T)).astype(bf16)      # (Hp, 4Hp)
    w_hh1 = pad_h_rows(pad_gate_cols(raw["w_hh_l1"].T)).astype(bf16)      # (Hp, 4Hp)
    b1 = pad_gate_cols((raw["b_ih_l1"] + raw["b_hh_l1"])[None, :])        # (1, 4Hp) f32

    w_fc = pad_h_rows(raw["w_fc"].T).astype(bf16)                         # (Hp, O)
    b_fc = raw["b_fc"][None, :].astype(jnp.float32)                       # (1, O)

    return {"w_ih0": w_ih0, "w_hh0": w_hh0, "b0": b0,
            "w_ih1": w_ih1, "w_hh1": w_hh1, "b1": b1,
            "w_fc": w_fc, "b_fc": b_fc}


# ---------------------------------------------------------------------------
# Pure-JAX reference (same arithmetic: bf16 MXU operands, f32 accumulation)
# ---------------------------------------------------------------------------
def reference_forward(x, raw, hidden_dim):
    H = hidden_dim
    B, T, D = x.shape
    bf = lambda a: a.astype(jnp.bfloat16)
    dot = lambda a, b: jnp.dot(bf(a), bf(b), preferred_element_type=jnp.float32)
    sig = lambda v: 0.5 * jnp.tanh(0.5 * v) + 0.5

    w_ih0, w_hh0 = raw["w_ih_l0"].T, raw["w_hh_l0"].T
    b0 = (raw["b_ih_l0"] + raw["b_hh_l0"])[None, :]
    w_ih1, w_hh1 = raw["w_ih_l1"].T, raw["w_hh_l1"].T
    b1 = (raw["b_ih_l1"] + raw["b_hh_l1"])[None, :]
    w_fc, b_fc = raw["w_fc"].T, raw["b_fc"][None, :]

    def cell(g, c):
        i = sig(g[:, 0 * H:1 * H])
        f = sig(g[:, 1 * H:2 * H])
        gg = jnp.tanh(g[:, 2 * H:3 * H])
        o = sig(g[:, 3 * H:4 * H])
        c_new = f * c + i * gg
        return o * jnp.tanh(c_new), c_new

    h0 = c0 = h1 = c1 = jnp.zeros((B, H), jnp.float32)
    for t in range(T):
        xt = x[:, t, :]
        g0 = dot(xt, w_ih0) + dot(h0, w_hh0) + b0
        h0, c0 = cell(g0, c0)
        g1 = dot(h0, w_ih1) + dot(h1, w_hh1) + b1
        h1, c1 = cell(g1, c1)
    return dot(h1, w_fc) + b_fc


if __name__ == "__main__":
    batch, seq_len, input_dim, hidden_dim, output_dim = 4, 8, 8, 32, 1

    key = jax.random.PRNGKey(0)
    kx, kp = jax.random.split(key)
    x = jax.random.normal(kx, (batch, seq_len, input_dim), jnp.float32)

    raw = init_raw_params(kp, input_dim, hidden_dim, output_dim)
    params = prepare_params(raw, hidden_dim)

    ref = reference_forward(x, raw, hidden_dim)

    # Auto-picked time chunk (divides T here -> static unrolled recurrence).
    out = lstm_sentiment_forward(x, params)
    out = jax.block_until_ready(out)
    assert out.shape == (batch, output_dim), out.shape
    err = float(jnp.max(jnp.abs(out - ref)))
    assert err < 2e-3, f"mismatch vs reference: max abs err = {err}"

    # Ragged path: time_chunk that does not divide T (exercises the dynamic
    # trip-count tail and multi-chunk state carry).
    out2 = lstm_sentiment_forward(x, params, time_chunk=3)
    out2 = jax.block_until_ready(out2)
    err2 = float(jnp.max(jnp.abs(out2 - ref)))
    assert err2 < 2e-3, f"ragged-chunk mismatch vs reference: max abs err = {err2}"

    print("KERNEL_OK")
</pallas_src>

<mosaic_0001>
module attributes {stable_mosaic.version = 11 : i64} {
  func.func @_lstm_kernel(%arg0: i32, %arg1: i32, %arg2: memref<8x16x8xbf16, #tpu.memory_space<vmem>>, %arg3: memref<8x512xbf16, #tpu.memory_space<vmem>>, %arg4: memref<128x512xbf16, #tpu.memory_space<vmem>>, %arg5: memref<1x512xf32, #tpu.memory_space<vmem>>, %arg6: memref<128x512xbf16, #tpu.memory_space<vmem>>, %arg7: memref<128x512xbf16, #tpu.memory_space<vmem>>, %arg8: memref<1x512xf32, #tpu.memory_space<vmem>>, %arg9: memref<128x1xbf16, #tpu.memory_space<vmem>>, %arg10: memref<1x1xf32, #tpu.memory_space<vmem>>, %arg11: memref<16x1xf32, #tpu.memory_space<vmem>>, %arg12: memref<8x16x512xf32, #tpu.memory_space<vmem>>, %arg13: memref<16x128xbf16, #tpu.memory_space<vmem>>, %arg14: memref<16x128xf32, #tpu.memory_space<vmem>>, %arg15: memref<16x128xbf16, #tpu.memory_space<vmem>>, %arg16: memref<16x128xf32, #tpu.memory_space<vmem>>) attributes {dimension_semantics = [#tpu.dimension_semantics<parallel>, #tpu.dimension_semantics<arbitrary>], iteration_bounds = array<i64: 1, 1>, scalar_prefetch = 0 : i64, scratch_operands = 5 : i64, tpu.core_type = #tpu.core_type<tc>, window_params = [{transform_indices = @transform_0, window_bounds = array<i64: 8, 16, 8>}, {pipeline_mode = #tpu.pipeline_mode<synchronous>, transform_indices = @transform_1, window_bounds = array<i64: 8, 512>}, {pipeline_mode = #tpu.pipeline_mode<synchronous>, transform_indices = @transform_2, window_bounds = array<i64: 128, 512>}, {pipeline_mode = #tpu.pipeline_mode<synchronous>, transform_indices = @transform_3, window_bounds = array<i64: 1, 512>}, {pipeline_mode = #tpu.pipeline_mode<synchronous>, transform_indices = @transform_4, window_bounds = array<i64: 128, 512>}, {pipeline_mode = #tpu.pipeline_mode<synchronous>, transform_indices = @transform_5, window_bounds = array<i64: 128, 512>}, {pipeline_mode = #tpu.pipeline_mode<synchronous>, transform_indices = @transform_6, window_bounds = array<i64: 1, 512>}, {pipeline_mode = #tpu.pipeline_mode<synchronous>, transform_indices = @transform_7, window_bounds = array<i64: 128, 1>}, {pipeline_mode = #tpu.pipeline_mode<synchronous>, transform_indices = @transform_8, window_bounds = array<i64: 1, 1>}, {transform_indices = @transform_9, window_bounds = array<i64: 16, 1>}]} {
    %c0_i32 = arith.constant 0 : i32
    %0 = arith.cmpi eq, %arg1, %c0_i32 : i32
    %1 = arith.extui %0 : i1 to i32
    %c0_i32_0 = arith.constant 0 : i32
    %2 = arith.cmpi ne, %1, %c0_i32_0 : i32
    scf.if %2 {
      %cst_175 = arith.constant 0.000000e+00 : bf16
      %497 = vector.broadcast %cst_175 : bf16 to vector<16x128xbf16>
      %c0_176 = arith.constant 0 : index
      %c0_177 = arith.constant 0 : index
      %498 = vector.load %arg13[%c0_176, %c0_177] : memref<16x128xbf16, #tpu.memory_space<vmem>>, vector<16x128xbf16>
      tpu.vector_store %arg13[%c0_176, %c0_177], %497 {strides = array<i32>} : memref<16x128xbf16, #tpu.memory_space<vmem>>, vector<16x128xbf16>,
      %cst_178 = arith.constant 0.000000e+00 : f32
      %499 = vector.broadcast %cst_178 : f32 to vector<16x128xf32>
      %c0_179 = arith.constant 0 : index
      %c0_180 = arith.constant 0 : index
      %500 = vector.load %arg14[%c0_179, %c0_180] : memref<16x128xf32, #tpu.memory_space<vmem>>, vector<16x128xf32>
      tpu.vector_store %arg14[%c0_179, %c0_180], %499 {strides = array<i32>} : memref<16x128xf32, #tpu.memory_space<vmem>>, vector<16x128xf32>,
      %cst_181 = arith.constant 0.000000e+00 : bf16
      %501 = vector.broadcast %cst_181 : bf16 to vector<16x128xbf16>
      %c0_182 = arith.constant 0 : index
      %c0_183 = arith.constant 0 : index
      %502 = vector.load %arg15[%c0_182, %c0_183] : memref<16x128xbf16, #tpu.memory_space<vmem>>, vector<16x128xbf16>
      tpu.vector_store %arg15[%c0_182, %c0_183], %501 {strides = array<i32>} : memref<16x128xbf16, #tpu.memory_space<vmem>>, vector<16x128xbf16>,
      %cst_184 = arith.constant 0.000000e+00 : f32
      %503 = vector.broadcast %cst_184 : f32 to vector<16x128xf32>
      %c0_185 = arith.constant 0 : index
      %c0_186 = arith.constant 0 : index
      %504 = vector.load %arg16[%c0_185, %c0_186] : memref<16x128xf32, #tpu.memory_space<vmem>>, vector<16x128xf32>
      tpu.vector_store %arg16[%c0_185, %c0_186], %503 {strides = array<i32>} : memref<16x128xf32, #tpu.memory_space<vmem>>, vector<16x128xf32>,
    } else {
    }
    %c0 = arith.constant 0 : index
    %c0_1 = arith.constant 0 : index
    %c0_2 = arith.constant 0 : index
    %3 = vector.load %arg2[%c0, %c0_1, %c0_2] : memref<8x16x8xbf16, #tpu.memory_space<vmem>>, vector<8x16x8xbf16>
    %4 = vector.shape_cast %3 : vector<8x16x8xbf16> to vector<128x8xbf16>
    %c0_3 = arith.constant 0 : index
    %c0_4 = arith.constant 0 : index
    %5 = vector.load %arg3[%c0_3, %c0_4] : memref<8x512xbf16, #tpu.memory_space<vmem>>, vector<8x512xbf16>
    %cst = arith.constant dense<0.000000e+00> : vector<128x512xf32>
    %6 = tpu.matmul %4, %5, %cst {dimension_numbers = #tpu.dot_dimension_numbers<[1], [0], [0], [1], [0, 0, 1, 1], [], []>} : vector<128x8xbf16>, vector<8x512xbf16>, vector<128x512xf32> -> vector<128x512xf32>
    %7 = vector.shape_cast %6 : vector<128x512xf32> to vector<8x16x512xf32>
    %c0_5 = arith.constant 0 : index
    %c0_6 = arith.constant 0 : index
    %8 = vector.load %arg5[%c0_5, %c0_6] : memref<1x512xf32, #tpu.memory_space<vmem>>, vector<1x512xf32>
    %9 = vector.shape_cast %8 : vector<1x512xf32> to vector<1x1x512xf32>
    %10 = vector.broadcast %9 : vector<1x1x512xf32> to vector<8x16x512xf32>
    %11 = arith.addf %7, %10 : vector<8x16x512xf32>
    %c0_7 = arith.constant 0 : index
    %c0_8 = arith.constant 0 : index
    %c0_9 = arith.constant 0 : index
    %12 = vector.load %arg12[%c0_7, %c0_8, %c0_9] : memref<8x16x512xf32, #tpu.memory_space<vmem>>, vector<8x16x512xf32>
    tpu.vector_store %arg12[%c0_7, %c0_8, %c0_9], %11 {strides = array<i32>} : memref<8x16x512xf32, #tpu.memory_space<vmem>>, vector<8x16x512xf32>,
    %c0_10 = arith.constant 0 : index
    %c0_11 = arith.constant 0 : index
    %13 = vector.load %arg4[%c0_10, %c0_11] : memref<128x512xbf16, #tpu.memory_space<vmem>>, vector<128x512xbf16>
    %c0_12 = arith.constant 0 : index
    %c0_13 = arith.constant 0 : index
    %14 = vector.load %arg6[%c0_12, %c0_13] : memref<128x512xbf16, #tpu.memory_space<vmem>>, vector<128x512xbf16>
    %c0_14 = arith.constant 0 : index
    %c0_15 = arith.constant 0 : index
    %15 = vector.load %arg7[%c0_14, %c0_15] : memref<128x512xbf16, #tpu.memory_space<vmem>>, vector<128x512xbf16>
    %c0_16 = arith.constant 0 : index
    %c0_17 = arith.constant 0 : index
    %16 = vector.load %arg8[%c0_16, %c0_17] : memref<1x512xf32, #tpu.memory_space<vmem>>, vector<1x512xf32>
    %17 = vector.shape_cast %16 : vector<1x512xf32> to vector<1x512xf32>
    %18 = vector.broadcast %17 : vector<1x512xf32> to vector<16x512xf32>
    %19 = tpu.iota {dimensions = array<i32: 1>} : vector<1x512xi32>
    %c256_i32 = arith.constant 256 : i32
    %20 = vector.broadcast %c256_i32 : i32 to vector<1x512xi32>
    %21 = arith.cmpi sge, %19, %20 : vector<1x512xi32>
    %c384_i32 = arith.constant 384 : i32
    %22 = vector.broadcast %c384_i32 : i32 to vector<1x512xi32>
    %23 = arith.cmpi slt, %19, %22 : vector<1x512xi32>
    %24 = arith.andi %21, %23 : vector<1x512xi1>
    %cst_18 = arith.constant 1.000000e+00 : f32
    %cst_19 = arith.constant 5.000000e-01 : f32
    %25 = vector.broadcast %cst_18 : f32 to vector<1x512xf32>
    %26 = vector.broadcast %cst_19 : f32 to vector<1x512xf32>
    %27 = arith.select %24, %25, %26 : vector<1x512xi1>, vector<1x512xf32>
    %28 = vector.shape_cast %27 : vector<1x512xf32> to vector<1x512xf32>
    %29 = vector.broadcast %28 : vector<1x512xf32> to vector<16x512xf32>
    %c0_20 = arith.constant 0 : index
    %c0_21 = arith.constant 0 : index
    %30 = vector.load %arg13[%c0_20, %c0_21] : memref<16x128xbf16, #tpu.memory_space<vmem>>, vector<16x128xbf16>
    %c0_22 = arith.constant 0 : index
    %c0_23 = arith.constant 0 : index
    %31 = vector.load %arg14[%c0_22, %c0_23] : memref<16x128xf32, #tpu.memory_space<vmem>>, vector<16x128xf32>
    %c0_24 = arith.constant 0 : index
    %c0_25 = arith.constant 0 : index
    %32 = vector.load %arg15[%c0_24, %c0_25] : memref<16x128xbf16, #tpu.memory_space<vmem>>, vector<16x128xbf16>
    %c0_26 = arith.constant 0 : index
    %c0_27 = arith.constant 0 : index
    %33 = vector.load %arg16[%c0_26, %c0_27] : memref<16x128xf32, #tpu.memory_space<vmem>>, vector<16x128xf32>
    %c0_i32_28 = arith.constant 0 : i32
    %34 = arith.index_cast %c0_i32_28 : i32 to index
    %c0_29 = arith.constant 0 : index
    %c0_30 = arith.constant 0 : index
    %35 = vector.load %arg12[%34, %c0_29, %c0_30] : memref<8x16x512xf32, #tpu.memory_space<vmem>>, vector<1x16x512xf32>
    %36 = vector.shape_cast %35 : vector<1x16x512xf32> to vector<16x512xf32>
    %cst_31 = arith.constant dense<0.000000e+00> : vector<16x512xf32>
    %37 = tpu.matmul %30, %13, %cst_31 {dimension_numbers = #tpu.dot_dimension_numbers<[1], [0], [0], [1], [0, 0, 1, 1], [], []>} : vector<16x128xbf16>, vector<128x512xbf16>, vector<16x512xf32> -> vector<16x512xf32>
    %38 = arith.addf %36, %37 : vector<16x512xf32>
    %39 = arith.mulf %38, %29 : vector<16x512xf32>
    %40 = math.tanh %39 : vector<16x512xf32>
    %41 = vector.extract_strided_slice %40 {offsets = [0, 0], sizes = [16, 128], strides = [1, 1]} : vector<16x512xf32> to vector<16x128xf32>
    %cst_32 = arith.constant 5.000000e-01 : f32
    %42 = vector.broadcast %cst_32 : f32 to vector<16x128xf32>
    %43 = arith.mulf %42, %41 : vector<16x128xf32>
    %cst_33 = arith.constant 5.000000e-01 : f32
    %44 = vector.broadcast %cst_33 : f32 to vector<16x128xf32>
    %45 = arith.addf %43, %44 : vector<16x128xf32>
    %46 = vector.extract_strided_slice %40 {offsets = [0, 128], sizes = [16, 128], strides = [1, 1]} : vector<16x512xf32> to vector<16x128xf32>
    %cst_34 = arith.constant 5.000000e-01 : f32
    %47 = vector.broadcast %cst_34 : f32 to vector<16x128xf32>
    %48 = arith.mulf %47, %46 : vector<16x128xf32>
    %cst_35 = arith.constant 5.000000e-01 : f32
    %49 = vector.broadcast %cst_35 : f32 to vector<16x128xf32>
    %50 = arith.addf %48, %49 : vector<16x128xf32>
    %51 = vector.extract_strided_slice %40 {offsets = [0, 256], sizes = [16, 128], strides = [1, 1]} : vector<16x512xf32> to vector<16x128xf32>
    %52 = vector.extract_strided_slice %40 {offsets = [0, 384], sizes = [16, 128], strides = [1, 1]} : vector<16x512xf32> to vector<16x128xf32>
    %cst_36 = arith.constant 5.000000e-01 : f32
    %53 = vector.broadcast %cst_36 : f32 to vector<16x128xf32>
    %54 = arith.mulf %53, %52 : vector<16x128xf32>
    %cst_37 = arith.constant 5.000000e-01 : f32
    %55 = vector.broadcast %cst_37 : f32 to vector<16x128xf32>
    %56 = arith.addf %54, %55 : vector<16x128xf32>
    %57 = arith.mulf %50, %31 : vector<16x128xf32>
    %58 = arith.mulf %45, %51 : vector<16x128xf32>
    %59 = arith.addf %57, %58 : vector<16x128xf32>
    %60 = math.tanh %59 : vector<16x128xf32>
    %61 = arith.mulf %56, %60 : vector<16x128xf32>
    %62 = arith.truncf %61 : vector<16x128xf32> to vector<16x128xbf16>
    %cst_38 = arith.constant dense<0.000000e+00> : vector<16x512xf32>
    %63 = tpu.matmul %62, %14, %cst_38 {dimension_numbers = #tpu.dot_dimension_numbers<[1], [0], [0], [1], [0, 0, 1, 1], [], []>} : vector<16x128xbf16>, vector<128x512xbf16>, vector<16x512xf32> -> vector<16x512xf32>
    %cst_39 = arith.constant dense<0.000000e+00> : vector<16x512xf32>
    %64 = tpu.matmul %32, %15, %cst_39 {dimension_numbers = #tpu.dot_dimension_numbers<[1], [0], [0], [1], [0, 0, 1, 1], [], []>} : vector<16x128xbf16>, vector<128x512xbf16>, vector<16x512xf32> -> vector<16x512xf32>
    %65 = arith.addf %63, %64 : vector<16x512xf32>
    %66 = arith.addf %65, %18 : vector<16x512xf32>
    %67 = arith.mulf %66, %29 : vector<16x512xf32>
    %68 = math.tanh %67 : vector<16x512xf32>
    %69 = vector.extract_strided_slice %68 {offsets = [0, 0], sizes = [16, 128], strides = [1, 1]} : vector<16x512xf32> to vector<16x128xf32>
    %cst_40 = arith.constant 5.000000e-01 : f32
    %70 = vector.broadcast %cst_40 : f32 to vector<16x128xf32>
    %71 = arith.mulf %70, %69 : vector<16x128xf32>
    %cst_41 = arith.constant 5.000000e-01 : f32
    %72 = vector.broadcast %cst_41 : f32 to vector<16x128xf32>
    %73 = arith.addf %71, %72 : vector<16x128xf32>
    %74 = vector.extract_strided_slice %68 {offsets = [0, 128], sizes = [16, 128], strides = [1, 1]} : vector<16x512xf32> to vector<16x128xf32>
    %cst_42 = arith.constant 5.000000e-01 : f32
    %75 = vector.broadcast %cst_42 : f32 to vector<16x128xf32>
    %76 = arith.mulf %75, %74 : vector<16x128xf32>
    %cst_43 = arith.constant 5.000000e-01 : f32
    %77 = vector.broadcast %cst_43 : f32 to vector<16x128xf32>
    %78 = arith.addf %76, %77 : vector<16x128xf32>
    %79 = vector.extract_strided_slice %68 {offsets = [0, 256], sizes = [16, 128], strides = [1, 1]} : vector<16x512xf32> to vector<16x128xf32>
    %80 = vector.extract_strided_slice %68 {offsets = [0, 384], sizes = [16, 128], strides = [1, 1]} : vector<16x512xf32> to vector<16x128xf32>
    %cst_44 = arith.constant 5.000000e-01 : f32
    %81 = vector.broadcast %cst_44 : f32 to vector<16x128xf32>
    %82 = arith.mulf %81, %80 : vector<16x128xf32>
    %cst_45 = arith.constant 5.000000e-01 : f32
    %83 = vector.broadcast %cst_45 : f32 to vector<16x128xf32>
    %84 = arith.addf %82, %83 : vector<16x128xf32>
    %85 = arith.mulf %78, %33 : vector<16x128xf32>
    %86 = arith.mulf %73, %79 : vector<16x128xf32>
    %87 = arith.addf %85, %86 : vector<16x128xf32>
    %88 = math.tanh %87 : vector<16x128xf32>
    %89 = arith.mulf %84, %88 : vector<16x128xf32>
    %90 = arith.truncf %89 : vector<16x128xf32> to vector<16x128xbf16>
    %c1_i32 = arith.constant 1 : i32
    %91 = arith.index_cast %c1_i32 : i32 to index
    %c0_46 = arith.constant 0 : index
    %c0_47 = arith.constant 0 : index
    %92 = vector.load %arg12[%91, %c0_46, %c0_47] : memref<8x16x512xf32, #tpu.memory_space<vmem>>, vector<1x16x512xf32>
    %93 = vector.shape_cast %92 : vector<1x16x512xf32> to vector<16x512xf32>
    %cst_48 = arith.constant dense<0.000000e+00> : vector<16x512xf32>
    %94 = tpu.matmul %62, %13, %cst_48 {dimension_numbers = #tpu.dot_dimension_numbers<[1], [0], [0], [1], [0, 0, 1, 1], [], []>} : vector<16x128xbf16>, vector<128x512xbf16>, vector<16x512xf32> -> vector<16x512xf32>
    %95 = arith.addf %93, %94 : vector<16x512xf32>
    %96 = arith.mulf %95, %29 : vector<16x512xf32>
    %97 = math.tanh %96 : vector<16x512xf32>
    %98 = vector.extract_strided_slice %97 {offsets = [0, 0], sizes = [16, 128], strides = [1, 1]} : vector<16x512xf32> to vector<16x128xf32>
    %cst_49 = arith.constant 5.000000e-01 : f32
    %99 = vector.broadcast %cst_49 : f32 to vector<16x128xf32>
    %100 = arith.mulf %99, %98 : vector<16x128xf32>
    %cst_50 = arith.constant 5.000000e-01 : f32
    %101 = vector.broadcast %cst_50 : f32 to vector<16x128xf32>
    %102 = arith.addf %100, %101 : vector<16x128xf32>
    %103 = vector.extract_strided_slice %97 {offsets = [0, 128], sizes = [16, 128], strides = [1, 1]} : vector<16x512xf32> to vector<16x128xf32>
    %cst_51 = arith.constant 5.000000e-01 : f32
    %104 = vector.broadcast %cst_51 : f32 to vector<16x128xf32>
    %105 = arith.mulf %104, %103 : vector<16x128xf32>
    %cst_52 = arith.constant 5.000000e-01 : f32
    %106 = vector.broadcast %cst_52 : f32 to vector<16x128xf32>
    %107 = arith.addf %105, %106 : vector<16x128xf32>
    %108 = vector.extract_strided_slice %97 {offsets = [0, 256], sizes = [16, 128], strides = [1, 1]} : vector<16x512xf32> to vector<16x128xf32>
    %109 = vector.extract_strided_slice %97 {offsets = [0, 384], sizes = [16, 128], strides = [1, 1]} : vector<16x512xf32> to vector<16x128xf32>
    %cst_53 = arith.constant 5.000000e-01 : f32
    %110 = vector.broadcast %cst_53 : f32 to vector<16x128xf32>
    %111 = arith.mulf %110, %109 : vector<16x128xf32>
    %cst_54 = arith.constant 5.000000e-01 : f32
    %112 = vector.broadcast %cst_54 : f32 to vector<16x128xf32>
    %113 = arith.addf %111, %112 : vector<16x128xf32>
    %114 = arith.mulf %107, %59 : vector<16x128xf32>
    %115 = arith.mulf %102, %108 : vector<16x128xf32>
    %116 = arith.addf %114, %115 : vector<16x128xf32>
    %117 = math.tanh %116 : vector<16x128xf32>
    %118 = arith.mulf %113, %117 : vector<16x128xf32>
    %119 = arith.truncf %118 : vector<16x128xf32> to vector<16x128xbf16>
    %cst_55 = arith.constant dense<0.000000e+00> : vector<16x512xf32>
    %120 = tpu.matmul %119, %14, %cst_55 {dimension_numbers = #tpu.dot_dimension_numbers<[1], [0], [0], [1], [0, 0, 1, 1], [], []>} : vector<16x128xbf16>, vector<128x512xbf16>, vector<16x512xf32> -> vector<16x512xf32>
    %cst_56 = arith.constant dense<0.000000e+00> : vector<16x512xf32>
    %121 = tpu.matmul %90, %15, %cst_56 {dimension_numbers = #tpu.dot_dimension_numbers<[1], [0], [0], [1], [0, 0, 1, 1], [], []>} : vector<16x128xbf16>, vector<128x512xbf16>, vector<16x512xf32> -> vector<16x512xf32>
    %122 = arith.addf %120, %121 : vector<16x512xf32>
    %123 = arith.addf %122, %18 : vector<16x512xf32>
    %124 = arith.mulf %123, %29 : vector<16x512xf32>
    %125 = math.tanh %124 : vector<16x512xf32>
    %126 = vector.extract_strided_slice %125 {offsets = [0, 0], sizes = [16, 128], strides = [1, 1]} : vector<16x512xf32> to vector<16x128xf32>
    %cst_57 = arith.constant 5.000000e-01 : f32
    %127 = vector.broadcast %cst_57 : f32 to vector<16x128xf32>
    %128 = arith.mulf %127, %126 : vector<16x128xf32>
    %cst_58 = arith.constant 5.000000e-01 : f32
    %129 = vector.broadcast %cst_58 : f32 to vector<16x128xf32>
    %130 = arith.addf %128, %129 : vector<16x128xf32>
    %131 = vector.extract_strided_slice %125 {offsets = [0, 128], sizes = [16, 128], strides = [1, 1]} : vector<16x512xf32> to vector<16x128xf32>
    %cst_59 = arith.constant 5.000000e-01 : f32
    %132 = vector.broadcast %cst_59 : f32 to vector<16x128xf32>
    %133 = arith.mulf %132, %131 : vector<16x128xf32>
    %cst_60 = arith.constant 5.000000e-01 : f32
    %134 = vector.broadcast %cst_60 : f32 to vector<16x128xf32>
    %135 = arith.addf %133, %134 : vector<16x128xf32>
    %136 = vector.extract_strided_slice %125 {offsets = [0, 256], sizes = [16, 128], strides = [1, 1]} : vector<16x512xf32> to vector<16x128xf32>
    %137 = vector.extract_strided_slice %125 {offsets = [0, 384], sizes = [16, 128], strides = [1, 1]} : vector<16x512xf32> to vector<16x128xf32>
    %cst_61 = arith.constant 5.000000e-01 : f32
    %138 = vector.broadcast %cst_61 : f32 to vector<16x128xf32>
    %139 = arith.mulf %138, %137 : vector<16x128xf32>
    %cst_62 = arith.constant 5.000000e-01 : f32
    %140 = vector.broadcast %cst_62 : f32 to vector<16x128xf32>
    %141 = arith.addf %139, %140 : vector<16x128xf32>
    %142 = arith.mulf %135, %87 : vector<16x128xf32>
    %143 = arith.mulf %130, %136 : vector<16x128xf32>
    %144 = arith.addf %142, %143 : vector<16x128xf32>
    %145 = math.tanh %144 : vector<16x128xf32>
    %146 = arith.mulf %141, %145 : vector<16x128xf32>
    %147 = arith.truncf %146 : vector<16x128xf32> to vector<16x128xbf16>
    %c2_i32 = arith.constant 2 : i32
    %148 = arith.index_cast %c2_i32 : i32 to index
    %c0_63 = arith.constant 0 : index
    %c0_64 = arith.constant 0 : index
    %149 = vector.load %arg12[%148, %c0_63, %c0_64] : memref<8x16x512xf32, #tpu.memory_space<vmem>>, vector<1x16x512xf32>
    %150 = vector.shape_cast %149 : vector<1x16x512xf32> to vector<16x512xf32>
    %cst_65 = arith.constant dense<0.000000e+00> : vector<16x512xf32>
    %151 = tpu.matmul %119, %13, %cst_65 {dimension_numbers = #tpu.dot_dimension_numbers<[1], [0], [0], [1], [0, 0, 1, 1], [], []>} : vector<16x128xbf16>, vector<128x512xbf16>, vector<16x512xf32> -> vector<16x512xf32>
    %152 = arith.addf %150, %151 : vector<16x512xf32>
    %153 = arith.mulf %152, %29 : vector<16x512xf32>
    %154 = math.tanh %153 : vector<16x512xf32>
    %155 = vector.extract_strided_slice %154 {offsets = [0, 0], sizes = [16, 128], strides = [1, 1]} : vector<16x512xf32> to vector<16x128xf32>
    %cst_66 = arith.constant 5.000000e-01 : f32
    %156 = vector.broadcast %cst_66 : f32 to vector<16x128xf32>
    %157 = arith.mulf %156, %155 : vector<16x128xf32>
    %cst_67 = arith.constant 5.000000e-01 : f32
    %158 = vector.broadcast %cst_67 : f32 to vector<16x128xf32>
    %159 = arith.addf %157, %158 : vector<16x128xf32>
    %160 = vector.extract_strided_slice %154 {offsets = [0, 128], sizes = [16, 128], strides = [1, 1]} : vector<16x512xf32> to vector<16x128xf32>
    %cst_68 = arith.constant 5.000000e-01 : f32
    %161 = vector.broadcast %cst_68 : f32 to vector<16x128xf32>
    %162 = arith.mulf %161, %160 : vector<16x128xf32>
    %cst_69 = arith.constant 5.000000e-01 : f32
    %163 = vector.broadcast %cst_69 : f32 to vector<16x128xf32>
    %164 = arith.addf %162, %163 : vector<16x128xf32>
    %165 = vector.extract_strided_slice %154 {offsets = [0, 256], sizes = [16, 128], strides = [1, 1]} : vector<16x512xf32> to vector<16x128xf32>
    %166 = vector.extract_strided_slice %154 {offsets = [0, 384], sizes = [16, 128], strides = [1, 1]} : vector<16x512xf32> to vector<16x128xf32>
    %cst_70 = arith.constant 5.000000e-01 : f32
    %167 = vector.broadcast %cst_70 : f32 to vector<16x128xf32>
    %168 = arith.mulf %167, %166 : vector<16x128xf32>
    %cst_71 = arith.constant 5.000000e-01 : f32
    %169 = vector.broadcast %cst_71 : f32 to vector<16x128xf32>
    %170 = arith.addf %168, %169 : vector<16x128xf32>
    %171 = arith.mulf %164, %116 : vector<16x128xf32>
    %172 = arith.mulf %159, %165 : vector<16x128xf32>
    %173 = arith.addf %171, %172 : vector<16x128xf32>
    %174 = math.tanh %173 : vector<16x128xf32>
    %175 = arith.mulf %170, %174 : vector<16x128xf32>
    %176 = arith.truncf %175 : vector<16x128xf32> to vector<16x128xbf16>
    %cst_72 = arith.constant dense<0.000000e+00> : vector<16x512xf32>
    %177 = tpu.matmul %176, %14, %cst_72 {dimension_numbers = #tpu.dot_dimension_numbers<[1], [0], [0], [1], [0, 0, 1, 1], [], []>} : vector<16x128xbf16>, vector<128x512xbf16>, vector<16x512xf32> -> vector<16x512xf32>
    %cst_73 = arith.constant dense<0.000000e+00> : vector<16x512xf32>
    %178 = tpu.matmul %147, %15, %cst_73 {dimension_numbers = #tpu.dot_dimension_numbers<[1], [0], [0], [1], [0, 0, 1, 1], [], []>} : vector<16x128xbf16>, vector<128x512xbf16>, vector<16x512xf32> -> vector<16x512xf32>
    %179 = arith.addf %177, %178 : vector<16x512xf32>
    %180 = arith.addf %179, %18 : vector<16x512xf32>
    %181 = arith.mulf %180, %29 : vector<16x512xf32>
    %182 = math.tanh %181 : vector<16x512xf32>
    %183 = vector.extract_strided_slice %182 {offsets = [0, 0], sizes = [16, 128], strides = [1, 1]} : vector<16x512xf32> to vector<16x128xf32>
    %cst_74 = arith.constant 5.000000e-01 : f32
    %184 = vector.broadcast %cst_74 : f32 to vector<16x128xf32>
    %185 = arith.mulf %184, %183 : vector<16x128xf32>
    %cst_75 = arith.constant 5.000000e-01 : f32
    %186 = vector.broadcast %cst_75 : f32 to vector<16x128xf32>
    %187 = arith.addf %185, %186 : vector<16x128xf32>
    %188 = vector.extract_strided_slice %182 {offsets = [0, 128], sizes = [16, 128], strides = [1, 1]} : vector<16x512xf32> to vector<16x128xf32>
    %cst_76 = arith.constant 5.000000e-01 : f32
    %189 = vector.broadcast %cst_76 : f32 to vector<16x128xf32>
    %190 = arith.mulf %189, %188 : vector<16x128xf32>
    %cst_77 = arith.constant 5.000000e-01 : f32
    %191 = vector.broadcast %cst_77 : f32 to vector<16x128xf32>
    %192 = arith.addf %190, %191 : vector<16x128xf32>
    %193 = vector.extract_strided_slice %182 {offsets = [0, 256], sizes = [16, 128], strides = [1, 1]} : vector<16x512xf32> to vector<16x128xf32>
    %194 = vector.extract_strided_slice %182 {offsets = [0, 384], sizes = [16, 128], strides = [1, 1]} : vector<16x512xf32> to vector<16x128xf32>
    %cst_78 = arith.constant 5.000000e-01 : f32
    %195 = vector.broadcast %cst_78 : f32 to vector<16x128xf32>
    %196 = arith.mulf %195, %194 : vector<16x128xf32>
    %cst_79 = arith.constant 5.000000e-01 : f32
    %197 = vector.broadcast %cst_79 : f32 to vector<16x128xf32>
    %198 = arith.addf %196, %197 : vector<16x128xf32>
    %199 = arith.mulf %192, %144 : vector<16x128xf32>
    %200 = arith.mulf %187, %193 : vector<16x128xf32>
    %201 = arith.addf %199, %200 : vector<16x128xf32>
    %202 = math.tanh %201 : vector<16x128xf32>
    %203 = arith.mulf %198, %202 : vector<16x128xf32>
    %204 = arith.truncf %203 : vector<16x128xf32> to vector<16x128xbf16>
    %c3_i32 = arith.constant 3 : i32
    %205 = arith.index_cast %c3_i32 : i32 to index
    %c0_80 = arith.constant 0 : index
    %c0_81 = arith.constant 0 : index
    %206 = vector.load %arg12[%205, %c0_80, %c0_81] : memref<8x16x512xf32, #tpu.memory_space<vmem>>, vector<1x16x512xf32>
    %207 = vector.shape_cast %206 : vector<1x16x512xf32> to vector<16x512xf32>
    %cst_82 = arith.constant dense<0.000000e+00> : vector<16x512xf32>
    %208 = tpu.matmul %176, %13, %cst_82 {dimension_numbers = #tpu.dot_dimension_numbers<[1], [0], [0], [1], [0, 0, 1, 1], [], []>} : vector<16x128xbf16>, vector<128x512xbf16>, vector<16x512xf32> -> vector<16x512xf32>
    %209 = arith.addf %207, %208 : vector<16x512xf32>
    %210 = arith.mulf %209, %29 : vector<16x512xf32>
    %211 = math.tanh %210 : vector<16x512xf32>
    %212 = vector.extract_strided_slice %211 {offsets = [0, 0], sizes = [16, 128], strides = [1, 1]} : vector<16x512xf32> to vector<16x128xf32>
    %cst_83 = arith.constant 5.000000e-01 : f32
    %213 = vector.broadcast %cst_83 : f32 to vector<16x128xf32>
    %214 = arith.mulf %213, %212 : vector<16x128xf32>
    %cst_84 = arith.constant 5.000000e-01 : f32
    %215 = vector.broadcast %cst_84 : f32 to vector<16x128xf32>
    %216 = arith.addf %214, %215 : vector<16x128xf32>
    %217 = vector.extract_strided_slice %211 {offsets = [0, 128], sizes = [16, 128], strides = [1, 1]} : vector<16x512xf32> to vector<16x128xf32>
    %cst_85 = arith.constant 5.000000e-01 : f32
    %218 = vector.broadcast %cst_85 : f32 to vector<16x128xf32>
    %219 = arith.mulf %218, %217 : vector<16x128xf32>
    %cst_86 = arith.constant 5.000000e-01 : f32
    %220 = vector.broadcast %cst_86 : f32 to vector<16x128xf32>
    %221 = arith.addf %219, %220 : vector<16x128xf32>
    %222 = vector.extract_strided_slice %211 {offsets = [0, 256], sizes = [16, 128], strides = [1, 1]} : vector<16x512xf32> to vector<16x128xf32>
    %223 = vector.extract_strided_slice %211 {offsets = [0, 384], sizes = [16, 128], strides = [1, 1]} : vector<16x512xf32> to vector<16x128xf32>
    %cst_87 = arith.constant 5.000000e-01 : f32
    %224 = vector.broadcast %cst_87 : f32 to vector<16x128xf32>
    %225 = arith.mulf %224, %223 : vector<16x128xf32>
    %cst_88 = arith.constant 5.000000e-01 : f32
    %226 = vector.broadcast %cst_88 : f32 to vector<16x128xf32>
    %227 = arith.addf %225, %226 : vector<16x128xf32>
    %228 = arith.mulf %221, %173 : vector<16x128xf32>
    %229 = arith.mulf %216, %222 : vector<16x128xf32>
    %230 = arith.addf %228, %229 : vector<16x128xf32>
    %231 = math.tanh %230 : vector<16x128xf32>
    %232 = arith.mulf %227, %231 : vector<16x128xf32>
    %233 = arith.truncf %232 : vector<16x128xf32> to vector<16x128xbf16>
    %cst_89 = arith.constant dense<0.000000e+00> : vector<16x512xf32>
    %234 = tpu.matmul %233, %14, %cst_89 {dimension_numbers = #tpu.dot_dimension_numbers<[1], [0], [0], [1], [0, 0, 1, 1], [], []>} : vector<16x128xbf16>, vector<128x512xbf16>, vector<16x512xf32> -> vector<16x512xf32>
    %cst_90 = arith.constant dense<0.000000e+00> : vector<16x512xf32>
    %235 = tpu.matmul %204, %15, %cst_90 {dimension_numbers = #tpu.dot_dimension_numbers<[1], [0], [0], [1], [0, 0, 1, 1], [], []>} : vector<16x128xbf16>, vector<128x512xbf16>, vector<16x512xf32> -> vector<16x512xf32>
    %236 = arith.addf %234, %235 : vector<16x512xf32>
    %237 = arith.addf %236, %18 : vector<16x512xf32>
    %238 = arith.mulf %237, %29 : vector<16x512xf32>
    %239 = math.tanh %238 : vector<16x512xf32>
    %240 = vector.extract_strided_slice %239 {offsets = [0, 0], sizes = [16, 128], strides = [1, 1]} : vector<16x512xf32> to vector<16x128xf32>
    %cst_91 = arith.constant 5.000000e-01 : f32
    %241 = vector.broadcast %cst_91 : f32 to vector<16x128xf32>
    %242 = arith.mulf %241, %240 : vector<16x128xf32>
    %cst_92 = arith.constant 5.000000e-01 : f32
    %243 = vector.broadcast %cst_92 : f32 to vector<16x128xf32>
    %244 = arith.addf %242, %243 : vector<16x128xf32>
    %245 = vector.extract_strided_slice %239 {offsets = [0, 128], sizes = [16, 128], strides = [1, 1]} : vector<16x512xf32> to vector<16x128xf32>
    %cst_93 = arith.constant 5.000000e-01 : f32
    %246 = vector.broadcast %cst_93 : f32 to vector<16x128xf32>
    %247 = arith.mulf %246, %245 : vector<16x128xf32>
    %cst_94 = arith.constant 5.000000e-01 : f32
    %248 = vector.broadcast %cst_94 : f32 to vector<16x128xf32>
    %249 = arith.addf %247, %248 : vector<16x128xf32>
    %250 = vector.extract_strided_slice %239 {offsets = [0, 256], sizes = [16, 128], strides = [1, 1]} : vector<16x512xf32> to vector<16x128xf32>
    %251 = vector.extract_strided_slice %239 {offsets = [0, 384], sizes = [16, 128], strides = [1, 1]} : vector<16x512xf32> to vector<16x128xf32>
    %cst_95 = arith.constant 5.000000e-01 : f32
    %252 = vector.broadcast %cst_95 : f32 to vector<16x128xf32>
    %253 = arith.mulf %252, %251 : vector<16x128xf32>
    %cst_96 = arith.constant 5.000000e-01 : f32
    %254 = vector.broadcast %cst_96 : f32 to vector<16x128xf32>
    %255 = arith.addf %253, %254 : vector<16x128xf32>
    %256 = arith.mulf %249, %201 : vector<16x128xf32>
    %257 = arith.mulf %244, %250 : vector<16x128xf32>
    %258 = arith.addf %256, %257 : vector<16x128xf32>
    %259 = math.tanh %258 : vector<16x128xf32>
    %260 = arith.mulf %255, %259 : vector<16x128xf32>
    %261 = arith.truncf %260 : vector<16x128xf32> to vector<16x128xbf16>
    %c4_i32 = arith.constant 4 : i32
    %262 = arith.index_cast %c4_i32 : i32 to index
    %c0_97 = arith.constant 0 : index
    %c0_98 = arith.constant 0 : index
    %263 = vector.load %arg12[%262, %c0_97, %c0_98] : memref<8x16x512xf32, #tpu.memory_space<vmem>>, vector<1x16x512xf32>
    %264 = vector.shape_cast %263 : vector<1x16x512xf32> to vector<16x512xf32>
    %cst_99 = arith.constant dense<0.000000e+00> : vector<16x512xf32>
    %265 = tpu.matmul %233, %13, %cst_99 {dimension_numbers = #tpu.dot_dimension_numbers<[1], [0], [0], [1], [0, 0, 1, 1], [], []>} : vector<16x128xbf16>, vector<128x512xbf16>, vector<16x512xf32> -> vector<16x512xf32>
    %266 = arith.addf %264, %265 : vector<16x512xf32>
    %267 = arith.mulf %266, %29 : vector<16x512xf32>
    %268 = math.tanh %267 : vector<16x512xf32>
    %269 = vector.extract_strided_slice %268 {offsets = [0, 0], sizes = [16, 128], strides = [1, 1]} : vector<16x512xf32> to vector<16x128xf32>
    %cst_100 = arith.constant 5.000000e-01 : f32
    %270 = vector.broadcast %cst_100 : f32 to vector<16x128xf32>
    %271 = arith.mulf %270, %269 : vector<16x128xf32>
    %cst_101 = arith.constant 5.000000e-01 : f32
    %272 = vector.broadcast %cst_101 : f32 to vector<16x128xf32>
    %273 = arith.addf %271, %272 : vector<16x128xf32>
    %274 = vector.extract_strided_slice %268 {offsets = [0, 128], sizes = [16, 128], strides = [1, 1]} : vector<16x512xf32> to vector<16x128xf32>
    %cst_102 = arith.constant 5.000000e-01 : f32
    %275 = vector.broadcast %cst_102 : f32 to vector<16x128xf32>
    %276 = arith.mulf %275, %274 : vector<16x128xf32>
    %cst_103 = arith.constant 5.000000e-01 : f32
    %277 = vector.broadcast %cst_103 : f32 to vector<16x128xf32>
    %278 = arith.addf %276, %277 : vector<16x128xf32>
    %279 = vector.extract_strided_slice %268 {offsets = [0, 256], sizes = [16, 128], strides = [1, 1]} : vector<16x512xf32> to vector<16x128xf32>
    %280 = vector.extract_strided_slice %268 {offsets = [0, 384], sizes = [16, 128], strides = [1, 1]} : vector<16x512xf32> to vector<16x128xf32>
    %cst_104 = arith.constant 5.000000e-01 : f32
    %281 = vector.broadcast %cst_104 : f32 to vector<16x128xf32>
    %282 = arith.mulf %281, %280 : vector<16x128xf32>
    %cst_105 = arith.constant 5.000000e-01 : f32
    %283 = vector.broadcast %cst_105 : f32 to vector<16x128xf32>
    %284 = arith.addf %282, %283 : vector<16x128xf32>
    %285 = arith.mulf %278, %230 : vector<16x128xf32>
    %286 = arith.mulf %273, %279 : vector<16x128xf32>
    %287 = arith.addf %285, %286 : vector<16x128xf32>
    %288 = math.tanh %287 : vector<16x128xf32>
    %289 = arith.mulf %284, %288 : vector<16x128xf32>
    %290 = arith.truncf %289 : vector<16x128xf32> to vector<16x128xbf16>
    %cst_106 = arith.constant dense<0.000000e+00> : vector<16x512xf32>
    %291 = tpu.matmul %290, %14, %cst_106 {dimension_numbers = #tpu.dot_dimension_numbers<[1], [0], [0], [1], [0, 0, 1, 1], [], []>} : vector<16x128xbf16>, vector<128x512xbf16>, vector<16x512xf32> -> vector<16x512xf32>
    %cst_107 = arith.constant dense<0.000000e+00> : vector<16x512xf32>
    %292 = tpu.matmul %261, %15, %cst_107 {dimension_numbers = #tpu.dot_dimension_numbers<[1], [0], [0], [1], [0, 0, 1, 1], [], []>} : vector<16x128xbf16>, vector<128x512xbf16>, vector<16x512xf32> -> vector<16x512xf32>
    %293 = arith.addf %291, %292 : vector<16x512xf32>
    %294 = arith.addf %293, %18 : vector<16x512xf32>
    %295 = arith.mulf %294, %29 : vector<16x512xf32>
    %296 = math.tanh %295 : vector<16x512xf32>
    %297 = vector.extract_strided_slice %296 {offsets = [0, 0], sizes = [16, 128], strides = [1, 1]} : vector<16x512xf32> to vector<16x128xf32>
    %cst_108 = arith.constant 5.000000e-01 : f32
    %298 = vector.broadcast %cst_108 : f32 to vector<16x128xf32>
    %299 = arith.mulf %298, %297 : vector<16x128xf32>
    %cst_109 = arith.constant 5.000000e-01 : f32
    %300 = vector.broadcast %cst_109 : f32 to vector<16x128xf32>
    %301 = arith.addf %299, %300 : vector<16x128xf32>
    %302 = vector.extract_strided_slice %296 {offsets = [0, 128], sizes = [16, 128], strides = [1, 1]} : vector<16x512xf32> to vector<16x128xf32>
    %cst_110 = arith.constant 5.000000e-01 : f32
    %303 = vector.broadcast %cst_110 : f32 to vector<16x128xf32>
    %304 = arith.mulf %303, %302 : vector<16x128xf32>
    %cst_111 = arith.constant 5.000000e-01 : f32
    %305 = vector.broadcast %cst_111 : f32 to vector<16x128xf32>
    %306 = arith.addf %304, %305 : vector<16x128xf32>
    %307 = vector.extract_strided_slice %296 {offsets = [0, 256], sizes = [16, 128], strides = [1, 1]} : vector<16x512xf32> to vector<16x128xf32>
    %308 = vector.extract_strided_slice %296 {offsets = [0, 384], sizes = [16, 128], strides = [1, 1]} : vector<16x512xf32> to vector<16x128xf32>
    %cst_112 = arith.constant 5.000000e-01 : f32
    %309 = vector.broadcast %cst_112 : f32 to vector<16x128xf32>
    %310 = arith.mulf %309, %308 : vector<16x128xf32>
    %cst_113 = arith.constant 5.000000e-01 : f32
    %311 = vector.broadcast %cst_113 : f32 to vector<16x128xf32>
    %312 = arith.addf %310, %311 : vector<16x128xf32>
    %313 = arith.mulf %306, %258 : vector<16x128xf32>
    %314 = arith.mulf %301, %307 : vector<16x128xf32>
    %315 = arith.addf %313, %314 : vector<16x128xf32>
    %316 = math.tanh %315 : vector<16x128xf32>
    %317 = arith.mulf %312, %316 : vector<16x128xf32>
    %318 = arith.truncf %317 : vector<16x128xf32> to vector<16x128xbf16>
    %c5_i32 = arith.constant 5 : i32
    %319 = arith.index_cast %c5_i32 : i32 to index
    %c0_114 = arith.constant 0 : index
    %c0_115 = arith.constant 0 : index
    %320 = vector.load %arg12[%319, %c0_114, %c0_115] : memref<8x16x512xf32, #tpu.memory_space<vmem>>, vector<1x16x512xf32>
    %321 = vector.shape_cast %320 : vector<1x16x512xf32> to vector<16x512xf32>
    %cst_116 = arith.constant dense<0.000000e+00> : vector<16x512xf32>
    %322 = tpu.matmul %290, %13, %cst_116 {dimension_numbers = #tpu.dot_dimension_numbers<[1], [0], [0], [1], [0, 0, 1, 1], [], []>} : vector<16x128xbf16>, vector<128x512xbf16>, vector<16x512xf32> -> vector<16x512xf32>
    %323 = arith.addf %321, %322 : vector<16x512xf32>
    %324 = arith.mulf %323, %29 : vector<16x512xf32>
    %325 = math.tanh %324 : vector<16x512xf32>
    %326 = vector.extract_strided_slice %325 {offsets = [0, 0], sizes = [16, 128], strides = [1, 1]} : vector<16x512xf32> to vector<16x128xf32>
    %cst_117 = arith.constant 5.000000e-01 : f32
    %327 = vector.broadcast %cst_117 : f32 to vector<16x128xf32>
    %328 = arith.mulf %327, %326 : vector<16x128xf32>
    %cst_118 = arith.constant 5.000000e-01 : f32
    %329 = vector.broadcast %cst_118 : f32 to vector<16x128xf32>
    %330 = arith.addf %328, %329 : vector<16x128xf32>
    %331 = vector.extract_strided_slice %325 {offsets = [0, 128], sizes = [16, 128], strides = [1, 1]} : vector<16x512xf32> to vector<16x128xf32>
    %cst_119 = arith.constant 5.000000e-01 : f32
    %332 = vector.broadcast %cst_119 : f32 to vector<16x128xf32>
    %333 = arith.mulf %332, %331 : vector<16x128xf32>
    %cst_120 = arith.constant 5.000000e-01 : f32
    %334 = vector.broadcast %cst_120 : f32 to vector<16x128xf32>
    %335 = arith.addf %333, %334 : vector<16x128xf32>
    %336 = vector.extract_strided_slice %325 {offsets = [0, 256], sizes = [16, 128], strides = [1, 1]} : vector<16x512xf32> to vector<16x128xf32>
    %337 = vector.extract_strided_slice %325 {offsets = [0, 384], sizes = [16, 128], strides = [1, 1]} : vector<16x512xf32> to vector<16x128xf32>
    %cst_121 = arith.constant 5.000000e-01 : f32
    %338 = vector.broadcast %cst_121 : f32 to vector<16x128xf32>
    %339 = arith.mulf %338, %337 : vector<16x128xf32>
    %cst_122 = arith.constant 5.000000e-01 : f32
    %340 = vector.broadcast %cst_122 : f32 to vector<16x128xf32>
    %341 = arith.addf %339, %340 : vector<16x128xf32>
    %342 = arith.mulf %335, %287 : vector<16x128xf32>
    %343 = arith.mulf %330, %336 : vector<16x128xf32>
    %344 = arith.addf %342, %343 : vector<16x128xf32>
    %345 = math.tanh %344 : vector<16x128xf32>
    %346 = arith.mulf %341, %345 : vector<16x128xf32>
    %347 = arith.truncf %346 : vector<16x128xf32> to vector<16x128xbf16>
    %cst_123 = arith.constant dense<0.000000e+00> : vector<16x512xf32>
    %348 = tpu.matmul %347, %14, %cst_123 {dimension_numbers = #tpu.dot_dimension_numbers<[1], [0], [0], [1], [0, 0, 1, 1], [], []>} : vector<16x128xbf16>, vector<128x512xbf16>, vector<16x512xf32> -> vector<16x512xf32>
    %cst_124 = arith.constant dense<0.000000e+00> : vector<16x512xf32>
    %349 = tpu.matmul %318, %15, %cst_124 {dimension_numbers = #tpu.dot_dimension_numbers<[1], [0], [0], [1], [0, 0, 1, 1], [], []>} : vector<16x128xbf16>, vector<128x512xbf16>, vector<16x512xf32> -> vector<16x512xf32>
    %350 = arith.addf %348, %349 : vector<16x512xf32>
    %351 = arith.addf %350, %18 : vector<16x512xf32>
    %352 = arith.mulf %351, %29 : vector<16x512xf32>
    %353 = math.tanh %352 : vector<16x512xf32>
    %354 = vector.extract_strided_slice %353 {offsets = [0, 0], sizes = [16, 128], strides = [1, 1]} : vector<16x512xf32> to vector<16x128xf32>
    %cst_125 = arith.constant 5.000000e-01 : f32
    %355 = vector.broadcast %cst_125 : f32 to vector<16x128xf32>
    %356 = arith.mulf %355, %354 : vector<16x128xf32>
    %cst_126 = arith.constant 5.000000e-01 : f32
    %357 = vector.broadcast %cst_126 : f32 to vector<16x128xf32>
    %358 = arith.addf %356, %357 : vector<16x128xf32>
    %359 = vector.extract_strided_slice %353 {offsets = [0, 128], sizes = [16, 128], strides = [1, 1]} : vector<16x512xf32> to vector<16x128xf32>
    %cst_127 = arith.constant 5.000000e-01 : f32
    %360 = vector.broadcast %cst_127 : f32 to vector<16x128xf32>
    %361 = arith.mulf %360, %359 : vector<16x128xf32>
    %cst_128 = arith.constant 5.000000e-01 : f32
    %362 = vector.broadcast %cst_128 : f32 to vector<16x128xf32>
    %363 = arith.addf %361, %362 : vector<16x128xf32>
    %364 = vector.extract_strided_slice %353 {offsets = [0, 256], sizes = [16, 128], strides = [1, 1]} : vector<16x512xf32> to vector<16x128xf32>
    %365 = vector.extract_strided_slice %353 {offsets = [0, 384], sizes = [16, 128], strides = [1, 1]} : vector<16x512xf32> to vector<16x128xf32>
    %cst_129 = arith.constant 5.000000e-01 : f32
    %366 = vector.broadcast %cst_129 : f32 to vector<16x128xf32>
    %367 = arith.mulf %366, %365 : vector<16x128xf32>
    %cst_130 = arith.constant 5.000000e-01 : f32
    %368 = vector.broadcast %cst_130 : f32 to vector<16x128xf32>
    %369 = arith.addf %367, %368 : vector<16x128xf32>
    %370 = arith.mulf %363, %315 : vector<16x128xf32>
    %371 = arith.mulf %358, %364 : vector<16x128xf32>
    %372 = arith.addf %370, %371 : vector<16x128xf32>
    %373 = math.tanh %372 : vector<16x128xf32>
    %374 = arith.mulf %369, %373 : vector<16x128xf32>
    %375 = arith.truncf %374 : vector<16x128xf32> to vector<16x128xbf16>
    %c6_i32 = arith.constant 6 : i32
    %376 = arith.index_cast %c6_i32 : i32 to index
    %c0_131 = arith.constant 0 : index
    %c0_132 = arith.constant 0 : index
    %377 = vector.load %arg12[%376, %c0_131, %c0_132] : memref<8x16x512xf32, #tpu.memory_space<vmem>>, vector<1x16x512xf32>
    %378 = vector.shape_cast %377 : vector<1x16x512xf32> to vector<16x512xf32>
    %cst_133 = arith.constant dense<0.000000e+00> : vector<16x512xf32>
    %379 = tpu.matmul %347, %13, %cst_133 {dimension_numbers = #tpu.dot_dimension_numbers<[1], [0], [0], [1], [0, 0, 1, 1], [], []>} : vector<16x128xbf16>, vector<128x512xbf16>, vector<16x512xf32> -> vector<16x512xf32>
    %380 = arith.addf %378, %379 : vector<16x512xf32>
    %381 = arith.mulf %380, %29 : vector<16x512xf32>
    %382 = math.tanh %381 : vector<16x512xf32>
    %383 = vector.extract_strided_slice %382 {offsets = [0, 0], sizes = [16, 128], strides = [1, 1]} : vector<16x512xf32> to vector<16x128xf32>
    %cst_134 = arith.constant 5.000000e-01 : f32
    %384 = vector.broadcast %cst_134 : f32 to vector<16x128xf32>
    %385 = arith.mulf %384, %383 : vector<16x128xf32>
    %cst_135 = arith.constant 5.000000e-01 : f32
    %386 = vector.broadcast %cst_135 : f32 to vector<16x128xf32>
    %387 = arith.addf %385, %386 : vector<16x128xf32>
    %388 = vector.extract_strided_slice %382 {offsets = [0, 128], sizes = [16, 128], strides = [1, 1]} : vector<16x512xf32> to vector<16x128xf32>
    %cst_136 = arith.constant 5.000000e-01 : f32
    %389 = vector.broadcast %cst_136 : f32 to vector<16x128xf32>
    %390 = arith.mulf %389, %388 : vector<16x128xf32>
    %cst_137 = arith.constant 5.000000e-01 : f32
    %391 = vector.broadcast %cst_137 : f32 to vector<16x128xf32>
    %392 = arith.addf %390, %391 : vector<16x128xf32>
    %393 = vector.extract_strided_slice %382 {offsets = [0, 256], sizes = [16, 128], strides = [1, 1]} : vector<16x512xf32> to vector<16x128xf32>
    %394 = vector.extract_strided_slice %382 {offsets = [0, 384], sizes = [16, 128], strides = [1, 1]} : vector<16x512xf32> to vector<16x128xf32>
    %cst_138 = arith.constant 5.000000e-01 : f32
    %395 = vector.broadcast %cst_138 : f32 to vector<16x128xf32>
    %396 = arith.mulf %395, %394 : vector<16x128xf32>
    %cst_139 = arith.constant 5.000000e-01 : f32
    %397 = vector.broadcast %cst_139 : f32 to vector<16x128xf32>
    %398 = arith.addf %396, %397 : vector<16x128xf32>
    %399 = arith.mulf %392, %344 : vector<16x128xf32>
    %400 = arith.mulf %387, %393 : vector<16x128xf32>
    %401 = arith.addf %399, %400 : vector<16x128xf32>
    %402 = math.tanh %401 : vector<16x128xf32>
    %403 = arith.mulf %398, %402 : vector<16x128xf32>
    %404 = arith.truncf %403 : vector<16x128xf32> to vector<16x128xbf16>
    %cst_140 = arith.constant dense<0.000000e+00> : vector<16x512xf32>
    %405 = tpu.matmul %404, %14, %cst_140 {dimension_numbers = #tpu.dot_dimension_numbers<[1], [0], [0], [1], [0, 0, 1, 1], [], []>} : vector<16x128xbf16>, vector<128x512xbf16>, vector<16x512xf32> -> vector<16x512xf32>
    %cst_141 = arith.constant dense<0.000000e+00> : vector<16x512xf32>
    %406 = tpu.matmul %375, %15, %cst_141 {dimension_numbers = #tpu.dot_dimension_numbers<[1], [0], [0], [1], [0, 0, 1, 1], [], []>} : vector<16x128xbf16>, vector<128x512xbf16>, vector<16x512xf32> -> vector<16x512xf32>
    %407 = arith.addf %405, %406 : vector<16x512xf32>
    %408 = arith.addf %407, %18 : vector<16x512xf32>
    %409 = arith.mulf %408, %29 : vector<16x512xf32>
    %410 = math.tanh %409 : vector<16x512xf32>
    %411 = vector.extract_strided_slice %410 {offsets = [0, 0], sizes = [16, 128], strides = [1, 1]} : vector<16x512xf32> to vector<16x128xf32>
    %cst_142 = arith.constant 5.000000e-01 : f32
    %412 = vector.broadcast %cst_142 : f32 to vector<16x128xf32>
    %413 = arith.mulf %412, %411 : vector<16x128xf32>
    %cst_143 = arith.constant 5.000000e-01 : f32
    %414 = vector.broadcast %cst_143 : f32 to vector<16x128xf32>
    %415 = arith.addf %413, %414 : vector<16x128xf32>
    %416 = vector.extract_strided_slice %410 {offsets = [0, 128], sizes = [16, 128], strides = [1, 1]} : vector<16x512xf32> to vector<16x128xf32>
    %cst_144 = arith.constant 5.000000e-01 : f32
    %417 = vector.broadcast %cst_144 : f32 to vector<16x128xf32>
    %418 = arith.mulf %417, %416 : vector<16x128xf32>
    %cst_145 = arith.constant 5.000000e-01 : f32
    %419 = vector.broadcast %cst_145 : f32 to vector<16x128xf32>
    %420 = arith.addf %418, %419 : vector<16x128xf32>
    %421 = vector.extract_strided_slice %410 {offsets = [0, 256], sizes = [16, 128], strides = [1, 1]} : vector<16x512xf32> to vector<16x128xf32>
    %422 = vector.extract_strided_slice %410 {offsets = [0, 384], sizes = [16, 128], strides = [1, 1]} : vector<16x512xf32> to vector<16x128xf32>
    %cst_146 = arith.constant 5.000000e-01 : f32
    %423 = vector.broadcast %cst_146 : f32 to vector<16x128xf32>
    %424 = arith.mulf %423, %422 : vector<16x128xf32>
    %cst_147 = arith.constant 5.000000e-01 : f32
    %425 = vector.broadcast %cst_147 : f32 to vector<16x128xf32>
    %426 = arith.addf %424, %425 : vector<16x128xf32>
    %427 = arith.mulf %420, %372 : vector<16x128xf32>
    %428 = arith.mulf %415, %421 : vector<16x128xf32>
    %429 = arith.addf %427, %428 : vector<16x128xf32>
    %430 = math.tanh %429 : vector<16x128xf32>
    %431 = arith.mulf %426, %430 : vector<16x128xf32>
    %432 = arith.truncf %431 : vector<16x128xf32> to vector<16x128xbf16>
    %c7_i32 = arith.constant 7 : i32
    %433 = arith.index_cast %c7_i32 : i32 to index
    %c0_148 = arith.constant 0 : index
    %c0_149 = arith.constant 0 : index
    %434 = vector.load %arg12[%433, %c0_148, %c0_149] : memref<8x16x512xf32, #tpu.memory_space<vmem>>, vector<1x16x512xf32>
    %435 = vector.shape_cast %434 : vector<1x16x512xf32> to vector<16x512xf32>
    %cst_150 = arith.constant dense<0.000000e+00> : vector<16x512xf32>
    %436 = tpu.matmul %404, %13, %cst_150 {dimension_numbers = #tpu.dot_dimension_numbers<[1], [0], [0], [1], [0, 0, 1, 1], [], []>} : vector<16x128xbf16>, vector<128x512xbf16>, vector<16x512xf32> -> vector<16x512xf32>
    %437 = arith.addf %435, %436 : vector<16x512xf32>
    %438 = arith.mulf %437, %29 : vector<16x512xf32>
    %439 = math.tanh %438 : vector<16x512xf32>
    %440 = vector.extract_strided_slice %439 {offsets = [0, 0], sizes = [16, 128], strides = [1, 1]} : vector<16x512xf32> to vector<16x128xf32>
    %cst_151 = arith.constant 5.000000e-01 : f32
    %441 = vector.broadcast %cst_151 : f32 to vector<16x128xf32>
    %442 = arith.mulf %441, %440 : vector<16x128xf32>
    %cst_152 = arith.constant 5.000000e-01 : f32
    %443 = vector.broadcast %cst_152 : f32 to vector<16x128xf32>
    %444 = arith.addf %442, %443 : vector<16x128xf32>
    %445 = vector.extract_strided_slice %439 {offsets = [0, 128], sizes = [16, 128], strides = [1, 1]} : vector<16x512xf32> to vector<16x128xf32>
    %cst_153 = arith.constant 5.000000e-01 : f32
    %446 = vector.broadcast %cst_153 : f32 to vector<16x128xf32>
    %447 = arith.mulf %446, %445 : vector<16x128xf32>
    %cst_154 = arith.constant 5.000000e-01 : f32
    %448 = vector.broadcast %cst_154 : f32 to vector<16x128xf32>
    %449 = arith.addf %447, %448 : vector<16x128xf32>
    %450 = vector.extract_strided_slice %439 {offsets = [0, 256], sizes = [16, 128], strides = [1, 1]} : vector<16x512xf32> to vector<16x128xf32>
    %451 = vector.extract_strided_slice %439 {offsets = [0, 384], sizes = [16, 128], strides = [1, 1]} : vector<16x512xf32> to vector<16x128xf32>
    %cst_155 = arith.constant 5.000000e-01 : f32
    %452 = vector.broadcast %cst_155 : f32 to vector<16x128xf32>
    %453 = arith.mulf %452, %451 : vector<16x128xf32>
    %cst_156 = arith.constant 5.000000e-01 : f32
    %454 = vector.broadcast %cst_156 : f32 to vector<16x128xf32>
    %455 = arith.addf %453, %454 : vector<16x128xf32>
    %456 = arith.mulf %449, %401 : vector<16x128xf32>
    %457 = arith.mulf %444, %450 : vector<16x128xf32>
    %458 = arith.addf %456, %457 : vector<16x128xf32>
    %459 = math.tanh %458 : vector<16x128xf32>
    %460 = arith.mulf %455, %459 : vector<16x128xf32>
    %461 = arith.truncf %460 : vector<16x128xf32> to vector<16x128xbf16>
    %cst_157 = arith.constant dense<0.000000e+00> : vector<16x512xf32>
    %462 = tpu.matmul %461, %14, %cst_157 {dimension_numbers = #tpu.dot_dimension_numbers<[1], [0], [0], [1], [0, 0, 1, 1], [], []>} : vector<16x128xbf16>, vector<128x512xbf16>, vector<16x512xf32> -> vector<16x512xf32>
    %cst_158 = arith.constant dense<0.000000e+00> : vector<16x512xf32>
    %463 = tpu.matmul %432, %15, %cst_158 {dimension_numbers = #tpu.dot_dimension_numbers<[1], [0], [0], [1], [0, 0, 1, 1], [], []>} : vector<16x128xbf16>, vector<128x512xbf16>, vector<16x512xf32> -> vector<16x512xf32>
    %464 = arith.addf %462, %463 : vector<16x512xf32>
    %465 = arith.addf %464, %18 : vector<16x512xf32>
    %466 = arith.mulf %465, %29 : vector<16x512xf32>
    %467 = math.tanh %466 : vector<16x512xf32>
    %468 = vector.extract_strided_slice %467 {offsets = [0, 0], sizes = [16, 128], strides = [1, 1]} : vector<16x512xf32> to vector<16x128xf32>
    %cst_159 = arith.constant 5.000000e-01 : f32
    %469 = vector.broadcast %cst_159 : f32 to vector<16x128xf32>
    %470 = arith.mulf %469, %468 : vector<16x128xf32>
    %cst_160 = arith.constant 5.000000e-01 : f32
    %471 = vector.broadcast %cst_160 : f32 to vector<16x128xf32>
    %472 = arith.addf %470, %471 : vector<16x128xf32>
    %473 = vector.extract_strided_slice %467 {offsets = [0, 128], sizes = [16, 128], strides = [1, 1]} : vector<16x512xf32> to vector<16x128xf32>
    %cst_161 = arith.constant 5.000000e-01 : f32
    %474 = vector.broadcast %cst_161 : f32 to vector<16x128xf32>
    %475 = arith.mulf %474, %473 : vector<16x128xf32>
    %cst_162 = arith.constant 5.000000e-01 : f32
    %476 = vector.broadcast %cst_162 : f32 to vector<16x128xf32>
    %477 = arith.addf %475, %476 : vector<16x128xf32>
    %478 = vector.extract_strided_slice %467 {offsets = [0, 256], sizes = [16, 128], strides = [1, 1]} : vector<16x512xf32> to vector<16x128xf32>
    %479 = vector.extract_strided_slice %467 {offsets = [0, 384], sizes = [16, 128], strides = [1, 1]} : vector<16x512xf32> to vector<16x128xf32>
    %cst_163 = arith.constant 5.000000e-01 : f32
    %480 = vector.broadcast %cst_163 : f32 to vector<16x128xf32>
    %481 = arith.mulf %480, %479 : vector<16x128xf32>
    %cst_164 = arith.constant 5.000000e-01 : f32
    %482 = vector.broadcast %cst_164 : f32 to vector<16x128xf32>
    %483 = arith.addf %481, %482 : vector<16x128xf32>
    %484 = arith.mulf %477, %429 : vector<16x128xf32>
    %485 = arith.mulf %472, %478 : vector<16x128xf32>
    %486 = arith.addf %484, %485 : vector<16x128xf32>
    %487 = math.tanh %486 : vector<16x128xf32>
    %488 = arith.mulf %483, %487 : vector<16x128xf32>
    %489 = arith.truncf %488 : vector<16x128xf32> to vector<16x128xbf16>
    %c8_i32 = arith.constant 8 : i32
    %c0_165 = arith.constant 0 : index
    %c0_166 = arith.constant 0 : index
    %490 = vector.load %arg13[%c0_165, %c0_166] : memref<16x128xbf16, #tpu.memory_space<vmem>>, vector<16x128xbf16>
    tpu.vector_store %arg13[%c0_165, %c0_166], %461 {strides = array<i32>} : memref<16x128xbf16, #tpu.memory_space<vmem>>, vector<16x128xbf16>,
    %c0_167 = arith.constant 0 : index
    %c0_168 = arith.constant 0 : index
    %491 = vector.load %arg14[%c0_167, %c0_168] : memref<16x128xf32, #tpu.memory_space<vmem>>, vector<16x128xf32>
    tpu.vector_store %arg14[%c0_167, %c0_168], %458 {strides = array<i32>} : memref<16x128xf32, #tpu.memory_space<vmem>>, vector<16x128xf32>,
    %c0_169 = arith.constant 0 : index
    %c0_170 = arith.constant 0 : index
    %492 = vector.load %arg15[%c0_169, %c0_170] : memref<16x128xbf16, #tpu.memory_space<vmem>>, vector<16x128xbf16>
    tpu.vector_store %arg15[%c0_169, %c0_170], %489 {strides = array<i32>} : memref<16x128xbf16, #tpu.memory_space<vmem>>, vector<16x128xbf16>,
    %c0_171 = arith.constant 0 : index
    %c0_172 = arith.constant 0 : index
    %493 = vector.load %arg16[%c0_171, %c0_172] : memref<16x128xf32, #tpu.memory_space<vmem>>, vector<16x128xf32>
    tpu.vector_store %arg16[%c0_171, %c0_172], %486 {strides = array<i32>} : memref<16x128xf32, #tpu.memory_space<vmem>>, vector<16x128xf32>,
    %c0_i32_173 = arith.constant 0 : i32
    %494 = arith.cmpi eq, %arg1, %c0_i32_173 : i32
    %495 = arith.extui %494 : i1 to i32
    %c0_i32_174 = arith.constant 0 : i32
    %496 = arith.cmpi ne, %495, %c0_i32_174 : i32
    scf.if %496 {
      %c0_175 = arith.constant 0 : index
      %c0_176 = arith.constant 0 : index
      %497 = vector.load %arg9[%c0_175, %c0_176] : memref<128x1xbf16, #tpu.memory_space<vmem>>, vector<128x1xbf16>
      %cst_177 = arith.constant dense<0.000000e+00> : vector<16x1xf32>
      %498 = tpu.matmul %489, %497, %cst_177 {dimension_numbers = #tpu.dot_dimension_numbers<[1], [0], [0], [1], [0, 0, 1, 1], [], []>} : vector<16x128xbf16>, vector<128x1xbf16>, vector<16x1xf32> -> vector<16x1xf32>
      %c0_178 = arith.constant 0 : index
      %c0_179 = arith.constant 0 : index
      %499 = vector.load %arg10[%c0_178, %c0_179] : memref<1x1xf32, #tpu.memory_space<vmem>>, vector<1x1xf32>
      %500 = vector.broadcast %499 : vector<1x1xf32> to vector<16x1xf32>
      %501 = arith.addf %498, %500 : vector<16x1xf32>
      %c0_180 = arith.constant 0 : index
      %c0_181 = arith.constant 0 : index
      %502 = vector.load %arg11[%c0_180, %c0_181] : memref<16x1xf32, #tpu.memory_space<vmem>>, vector<16x1xf32>
      tpu.vector_store %arg11[%c0_180, %c0_181], %501 {strides = array<i32>} : memref<16x1xf32, #tpu.memory_space<vmem>>, vector<16x1xf32>,
    } else {
    }
    return
  }
  func.func @transform_0(%arg0: i32, %arg1: i32) -> (i32, i32, i32) {
    %c0_i32 = arith.constant 0 : i32
    %c0_i32_0 = arith.constant 0 : i32
    return %arg1, %arg0, %c0_i32 : i32, i32, i32
  }
  func.func @transform_1(%arg0: i32, %arg1: i32) -> (i32, i32) {
    %c0_i32 = arith.constant 0 : i32
    %c0_i32_0 = arith.constant 0 : i32
    %c0_i32_1 = arith.constant 0 : i32
    return %c0_i32, %c0_i32_0 : i32, i32
  }
  func.func @transform_2(%arg0: i32, %arg1: i32) -> (i32, i32) {
    %c0_i32 = arith.constant 0 : i32
    %c0_i32_0 = arith.constant 0 : i32
    %c0_i32_1 = arith.constant 0 : i32
    return %c0_i32, %c0_i32_0 : i32, i32
  }
  func.func @transform_3(%arg0: i32, %arg1: i32) -> (i32, i32) {
    %c0_i32 = arith.constant 0 : i32
    %c0_i32_0 = arith.constant 0 : i32
    %c0_i32_1 = arith.constant 0 : i32
    return %c0_i32, %c0_i32_0 : i32, i32
  }
  func.func @transform_4(%arg0: i32, %arg1: i32) -> (i32, i32) {
    %c0_i32 = arith.constant 0 : i32
    %c0_i32_0 = arith.constant 0 : i32
    %c0_i32_1 = arith.constant 0 : i32
    return %c0_i32, %c0_i32_0 : i32, i32
  }
  func.func @transform_5(%arg0: i32, %arg1: i32) -> (i32, i32) {
    %c0_i32 = arith.constant 0 : i32
    %c0_i32_0 = arith.constant 0 : i32
    %c0_i32_1 = arith.constant 0 : i32
    return %c0_i32, %c0_i32_0 : i32, i32
  }
  func.func @transform_6(%arg0: i32, %arg1: i32) -> (i32, i32) {
    %c0_i32 = arith.constant 0 : i32
    %c0_i32_0 = arith.constant 0 : i32
    %c0_i32_1 = arith.constant 0 : i32
    return %c0_i32, %c0_i32_0 : i32, i32
  }
  func.func @transform_7(%arg0: i32, %arg1: i32) -> (i32, i32) {
    %c0_i32 = arith.constant 0 : i32
    %c0_i32_0 = arith.constant 0 : i32
    %c0_i32_1 = arith.constant 0 : i32
    return %c0_i32, %c0_i32_0 : i32, i32
  }
  func.func @transform_8(%arg0: i32, %arg1: i32) -> (i32, i32) {
    %c0_i32 = arith.constant 0 : i32
    %c0_i32_0 = arith.constant 0 : i32
    %c0_i32_1 = arith.constant 0 : i32
    return %c0_i32, %c0_i32_0 : i32, i32
  }
  func.func @transform_9(%arg0: i32, %arg1: i32) -> (i32, i32) {
    %c0_i32 = arith.constant 0 : i32
    %c0_i32_0 = arith.constant 0 : i32
    return %arg0, %c0_i32 : i32, i32
  }
}

</mosaic_0001>

<bundles_post_ra>
// kernel: tpu_custom_call.1
= control target key start
LH: loop header
LB: loop body
LE: loop exit
PB: predicated region body
PF: predicated region fallthrough
CT: control target
= control target key end

     0   :  { %s7202_s0 = inlined_call_operand.vmem [shape: bf16[8,16,8], index: 0, kind: input, shape index: {}]   ;;  %s7203_s1 = inlined_call_operand.vmem [shape: bf16[8,512], index: 1, kind: input, shape index: {}]   ;;  %s7204_s2 = inlined_call_operand.hbm [shape: bf16[128,512], index: 2, kind: input, shape index: {}]   ;;  %s7205_s3 = inlined_call_operand.vmem [shape: f32[1,512], index: 3, kind: input, shape index: {}]   ;;  %s7206_s4 = inlined_call_operand.hbm [shape: bf16[128,512], index: 4, kind: input, shape index: {}]   ;;  %s7207_s5 = inlined_call_operand.hbm [shape: bf16[128,512], index: 5, kind: input, shape index: {}]   ;;  %s7208_s6 = inlined_call_operand.vmem [shape: f32[1,512], index: 6, kind: input, shape index: {}]   ;;  %s7209_s7 = inlined_call_operand.vmem [shape: bf16[128,1], index: 7, kind: input, shape index: {}]   ;;  %s7210_s8 = inlined_call_operand.<no memory space> [shape: f32[1,1], index: 8, kind: input, shape index: {}]   ;;  %s7211_s9 = inlined_call_operand.vmem [shape: f32[16,1], index: 9, kind: output, shape index: {}]  }
   0x1   :  { %v14_v0 = vstv %s7210_s8 }
   0x2   :  { %15 = vst [vmem:[#allocation7] sm:$0x1] %v14_v0 }
   0x3   :  { %16 = vsyncpa [#allocation9], 0 }
   0x4   :  { %17 = vsyncpa [#allocation11], 0  ;;  %s5188_s11 = smov [#allocation10]   ;;  %s5189_s13 = smov [#allocation8]  }
   0x5   :  { %s41_s12 = sshll.u32 %s5188_s11, 4  ;;  %s27_s14 = sshll.u32 %s5189_s13, 4  ;;  %s42_s12 = int_to_ptr.vmem [resolvable:$true] %s41_s12  ;;  %s28_s14 = int_to_ptr.vmem [resolvable:$true] %s27_s14 }
   0x6   :  { %s5132_s15 = scalar_lea.vmem %s42_s12, 4096  ;;  %p5137_p1 = scmp.lt.s32.totalorder %s42_s12, %s42_s12 }
   0x7   :  { %p5133_p0 = scmp.ne.s32.totalorder %s42_s12, %s5132_s15  ;;  %p5138_p2 = scmp.lt.s32.totalorder %s5132_s15, %s5132_s15 }
   0x9   :  { %p5139_p3 = por %p5138_p2, %p5137_p1 }
   0xb   :  { %p5140_p4 = pnand %p5139_p3, %p5133_p0 }
   0xd   :  { %5143 = shalt.err (!%p5140_p4)
}
   0xe   :  { %s5190_s16 = smov 256   ;;  %s5191_s17 = smov 16  }
   0xf   :  { %47 = dma.hbm_to_vmem [thread:$0]  %s7206_s4, 4096, %s42_s12, [#allocation11], %s5190_s16, %s5190_s16, %s5191_s17  }
  0x10   :  { %s5152_s19 = scalar_lea.vmem %s28_s14, 4096  ;;  %p5157_p6 = scmp.lt.s32.totalorder %s28_s14, %s28_s14 }
  0x11   :  { %p5153_p5 = scmp.ne.s32.totalorder %s28_s14, %s5152_s19  ;;  %p5158_p7 = scmp.lt.s32.totalorder %s5152_s19, %s5152_s19 }
  0x13   :  { %p5159_p8 = por %p5158_p7, %p5157_p6 }
  0x15   :  { %p5160_p9 = pnand %p5159_p8, %p5153_p5 }
  0x17   :  { %5163 = shalt.err (!%p5160_p9)
}
  0x18   :  { %33 = dma.hbm_to_vmem [thread:$0]  %s7204_s2, 4096, %s28_s14, [#allocation9], %s5190_s16, %s5190_s16, %s5191_s17  }
  0x19   :  { %s5192_s22 = smov [#allocation12]  }
  0x1a   :  { %s53_s23 = sshll.u32 %s5192_s22, 4  ;;  %s54_s23 = int_to_ptr.vmem [resolvable:$true] %s53_s23 }
  0x1b   :  { %s5172_s24 = scalar_lea.vmem %s54_s23, 4096  ;;  %p5177_p11 = scmp.lt.s32.totalorder %s54_s23, %s54_s23 }
  0x1c   :  { %p5173_p10 = scmp.ne.s32.totalorder %s54_s23, %s5172_s24  ;;  %p5178_p12 = scmp.lt.s32.totalorder %s5172_s24, %s5172_s24 }
  0x1e   :  { %p5179_p13 = por %p5178_p12, %p5177_p11 }
  0x20   :  { %p5180_p0 = pnand %p5179_p13, %p5173_p10 }
  0x22   :  { %5183 = shalt.err (!%p5180_p0)
}
  0x23   :  { %59 = dma.hbm_to_vmem [thread:$0]  %s7207_s5, 4096, %s54_s23, [#allocation11], %s5190_s16, %s5190_s16, %s5191_s17  }
  0x24   :  { %5184 = dma.done.wait [#allocation9], 4096  }
  0x25   :  { %5185 = vsyncadd [#allocation9], 4294963200 }
  0x26   :  { %5186 = dma.done.wait [#allocation11], 8192  }
  0x27   :  { %5187 = vsyncadd [#allocation11], 4294959104  ;;  %v7215_v1 = vmov 0   ;;  %v104_v2 = vld [vmem:[%s7203_s1] sm:$0xff]  ;;  %vm181_vm0 = vcmask 1043456   ;;  %v105_v6 = vld [vmem:[%s7203_s1 + $0x8] sm:$0xff] }
  0x28   :  { %226 = vmatprep.mubr.bf16.mxu0 %v7215_v1  ;;  %80 = vst [vmem:[#allocation3] sm:$0xf] %v7215_v1  ;;  %81 = vst [vmem:[#allocation3 + $0x4] sm:$0xf] %v7215_v1  ;;  %286 = vmatprep.mubr.bf16.mxu1 %v7215_v1  ;;  %v4251_v3 = vcombine.high %v104_v2, %v104_v2  ;;  %v4250_v4 = vcombine.low %v104_v2, %v104_v2  ;;  %v4438_v5 = vld [vmem:[%s7202_s0] sm:$0xff]   ;;  %v5276_v8 = vld [vmem:[%s7202_s0 + $0x30] sm:$0xff]  }
  0x29   :  { %84 = vst [vmem:[#allocation5] sm:$0xf] %v7215_v1  ;;  %85 = vst [vmem:[#allocation5 + $0x4] sm:$0xf] %v7215_v1  ;;  %v4253_v9 = vcombine.high %v105_v6, %v105_v6  ;;  %v4252_v10 = vcombine.low %v105_v6, %v105_v6  ;;  %vm156_vm1 = vcmask 64512   ;;  %v4442_v15 = vld [vmem:[%s7202_s0 + $0x8] sm:$0xff]  }
  0x2a   :  { %4254 = vmatprep.subr.msk.bf16.mxu0 %vm181_vm0, %v4251_v3  ;;  %4426 = vmatprep.subr.msk.bf16.mxu1 %vm181_vm0, %v4251_v3  ;;  %v183_v7 = vsel %vm181_vm0, %v4250_v4, 0  ;;  %v5278_v12 = vld [vmem:[#allocation8 + $0xe4] ss:$16 sps:$4 sm:$0xff]   ;;  %v5283_v13 = vld [vmem:[#allocation8 + $0xec] ss:$16 sps:$4 sm:$0xff]   ;;  %vm5195_vm2 = vmmov 0  }
  0x2b   :  { %209 = vmatpush1.bf16.msra.mxu0 %v183_v7  ;;  %4427 = vmatpush1.bf16.msra.mxu1 %v183_v7  ;;  %v189_v11 = vsel %vm181_vm0, %v4252_v10, 0  ;;  %v4449_v14 = vld [vmem:[#allocation8 + $0xe0] ss:$16 sps:$4 sm:$0xff]   ;;  %v4451_v16 = vld [vmem:[#allocation8 + $0xc4] ss:$16 sps:$4 sm:$0xff]   ;;  %vm4233_vm3 = vcmask 7168  }
  0x2c   :  { %4263 = vmatprep.subr.msk.bf16.mxu1 %vm181_vm0, %v4253_v9  ;;  %891 = vmatprep.subr.bf16.mxu0 %v5278_v12  ;;  %v4453_v17 = vld [vmem:[#allocation8 + $0xc0] ss:$16 sps:$4 sm:$0xff]   ;;  %v5295_v18 = vld [vmem:[%s7202_s0 + $0x38] sm:$0xff]   ;;  %v4474_v46 = vld [vmem:[%s7202_s0 + $0x28] sm:$0xff]  }
  0x2d   :  { %v4455_v19 = vld [vmem:[#allocation8 + $0xa4] ss:$16 sps:$4 sm:$0xff]   ;;  %v4459_v20 = vld [vmem:[#allocation8 + $0xa0] ss:$16 sps:$4 sm:$0xff]   ;;  %v5305_v24 = vld [vmem:[#allocation8 + $0xe8] ss:$16 sps:$4 sm:$0xff]  }
  0x2e   :  { %4255 = vmatmul.mubr.msk.bf16.vlgmr.msra.gmra.mxu0 %vm156_vm1, %v4438_v5  ;;  %4261 = vmatmul.mubr.msk.bf16.vlgmr.msra.gmra.mxu1 %vm156_vm1, %v5276_v8  ;;  %v4461_v21 = vld [vmem:[#allocation8 + $0x84] ss:$16 sps:$4 sm:$0xff]   ;;  %v4463_v22 = vld [vmem:[#allocation8 + $0x80] ss:$16 sps:$4 sm:$0xff]   ;;  %v5307_v25 = vld [vmem:[#allocation8 + $0xcc] ss:$16 sps:$4 sm:$0xff]  }
  0x2f   :  { %322 = vmatpush1.bf16.msra.mxu1 %v189_v11  ;;  %236 = vmatprep.mubr.bf16.mxu0 %v7215_v1  ;;  %v4444_v23 = vld [vmem:[%s7202_s0 + $0x10] sm:$0xff]   ;;  %v5313_v28 = vld [vmem:[#allocation8 + $0xc8] ss:$16 sps:$4 sm:$0xff]   ;;  %v4464_v40 = vld [vmem:[%s7202_s0 + $0x20] sm:$0xff]  }
  0x30   :  { %296 = vmatprep.mubr.bf16.mxu1 %v7215_v1  ;;  %934 = vmatprep.subr.bf16.mxu1 %v5283_v13  ;;  %v4465_v26 = vld [vmem:[#allocation8 + $0x64] ss:$16 sps:$4 sm:$0xff]   ;;  %v4469_v27 = vld [vmem:[#allocation8 + $0x60] ss:$16 sps:$4 sm:$0xff]   ;;  %v5317_v30 = vld [vmem:[#allocation8 + $0xac] ss:$16 sps:$4 sm:$0xff]  }
  0x31   :  { %892 = vmatpush1.bf16.msra.mxu0 %v4449_v14  ;;  %v4471_v29 = vld [vmem:[#allocation8 + $0x44] ss:$16 sps:$4 sm:$0xff]   ;;  %v5324_v32 = vld [vmem:[#allocation8 + $0xa8] ss:$16 sps:$4 sm:$0xff]   ;;  %v5326_v33 = vld [vmem:[#allocation8 + $0x40] ss:$16 sps:$4 sm:$0xff]  }
  0x32   :  { %893 = vmatprep.subr.bf16.mxu0 %v4451_v16  ;;  %v4454_v31 = vld [vmem:[%s7202_s0 + $0x18] sm:$0xff]   ;;  %v5334_v36 = vld [vmem:[#allocation8 + $0x20] ss:$16 sps:$4 sm:$0xff]  }
  0x33   :  { %v5328_v34 = vld [vmem:[#allocation8 + $0x24] ss:$16 sps:$4 sm:$0xff]   ;;  %v5330_v35 = vld [vmem:[#allocation8 + $0x8c] ss:$16 sps:$4 sm:$0xff]   ;;  %v5336_v37 = vld [vmem:[#allocation8 + $0x88] ss:$16 sps:$4 sm:$0xff]  }
  0x34   :  { %v5340_v38 = vld [vmem:[#allocation8 + $0x4] ss:$16 sps:$4 sm:$0xff]   ;;  %v5342_v39 = vld [vmem:[#allocation8 + $0x6c] ss:$16 sps:$4 sm:$0xff]   ;;  %v5351_v41 = vld [vmem:[#allocation8] ss:$16 sps:$4 sm:$0xff]  }
  0x35   :  { %894 = vmatpush1.bf16.msra.mxu0 %v4453_v17  ;;  %v5353_v42 = vld [vmem:[#allocation8 + $0x68] ss:$16 sps:$4 sm:$0xff]   ;;  %v5355_v43 = vld [vmem:[#allocation8 + $0x4c] ss:$16 sps:$4 sm:$0xff]   ;;  %v5402_v51 = vld [vmem:[#allocation12 + $0xe4] ss:$16 sps:$4 sm:$0xff]  }
  0x36   :  { %4256 = vmatmul.mubr.msk.bf16.gmra.mxu0 %vm156_vm1, %v4442_v15  ;;  %4262 = vmatmul.mubr.msk.bf16.gmra.mxu1 %vm156_vm1, %v5295_v18  ;;  %v5363_v44 = vld [vmem:[#allocation8 + $0x48] ss:$16 sps:$4 sm:$0xff]   ;;  %v5367_v45 = vld [vmem:[#allocation8 + $0x2c] ss:$16 sps:$4 sm:$0xff]   ;;  %v5404_v52 = vld [vmem:[#allocation12 + $0xe0] ss:$16 sps:$4 sm:$0xff]  }
  0x37   :  { %246 = vmatprep.mubr.bf16.mxu0 %v7215_v1  ;;  %339 = vmatprep.mubr.bf16.mxu1 %v7215_v1  ;;  %v5375_v47 = vld [vmem:[#allocation8 + $0x28] ss:$16 sps:$4 sm:$0xff]   ;;  %v5377_v48 = vld [vmem:[#allocation8 + $0xc] ss:$16 sps:$4 sm:$0xff]   ;;  %v5410_v54 = vld [vmem:[#allocation12 + $0xc4] ss:$16 sps:$4 sm:$0xff]  }
  0x38   :  { %895 = vmatprep.subr.bf16.mxu0 %v4455_v19  ;;  %v5383_v49 = vld [vmem:[#allocation8 + $0x8] ss:$16 sps:$4 sm:$0xff]   ;;  %v4484_v50 = vld [vmem:[#allocation3] sm:$0xff]  }
  0x39   :  { %896 = vmatpush1.bf16.msra.mxu0 %v4459_v20  ;;  %v5408_v53 = vld [vmem:[#allocation12 + $0xec] ss:$16 sps:$4 sm:$0xff]   ;;  %v5412_v55 = vld [vmem:[#allocation12 + $0xe8] ss:$16 sps:$4 sm:$0xff]   ;;  %v5414_v56 = vld [vmem:[#allocation12 + $0xc0] ss:$16 sps:$4 sm:$0xff]  }
  0x3a   :  { %897 = vmatprep.subr.bf16.mxu0 %v4461_v21  ;;  %v5420_v57 = vld [vmem:[#allocation12 + $0xcc] ss:$16 sps:$4 sm:$0xff]   ;;  %v5422_v58 = vld [vmem:[#allocation12 + $0xa4] ss:$16 sps:$4 sm:$0xff]   ;;  %v5424_v59 = vld [vmem:[#allocation12 + $0xc8] ss:$16 sps:$4 sm:$0xff]  }
  0x3b   :  { %v5426_v60 = vld [vmem:[#allocation12 + $0xa0] ss:$16 sps:$4 sm:$0xff]   ;;  %v5432_v61 = vld [vmem:[#allocation12 + $0xac] ss:$16 sps:$4 sm:$0xff]   ;;  %v5434_v62 = vld [vmem:[#allocation12 + $0x84] ss:$16 sps:$4 sm:$0xff]  }
  0x3c   :  { %v5436_v63 = vld [vmem:[#allocation12 + $0xa8] ss:$16 sps:$4 sm:$0xff]   ;;  %v5438_v0 = vld [vmem:[#allocation12 + $0x80] ss:$16 sps:$4 sm:$0xff]   ;;  %v5444_v2 = vld [vmem:[#allocation12 + $0x8c] ss:$16 sps:$4 sm:$0xff]  }
  0x3d   :  { %898 = vmatpush1.bf16.msra.mxu0 %v4463_v22  ;;  %v5446_v3 = vld [vmem:[#allocation12 + $0x64] ss:$16 sps:$4 sm:$0xff]   ;;  %v5448_v4 = vld [vmem:[#allocation12 + $0x88] ss:$16 sps:$4 sm:$0xff]   ;;  %v5456_v6 = vld [vmem:[#allocation12 + $0x6c] ss:$16 sps:$4 sm:$0xff]  }
  0x3e   :  { %4257 = vmatmul.mubr.msk.bf16.gmra.mxu0 %vm156_vm1, %v4444_v23  ;;  %4264 = vmatmul.mubr.msk.bf16.vlgmr.msra.gmra.mxu1 %vm156_vm1, %v4438_v5  ;;  %v5450_v5 = vld [vmem:[#allocation12 + $0x60] ss:$16 sps:$4 sm:$0xff]   ;;  %7501 = vst [vmem:[#allocation16_spill] sm:$0xff] %v5456_v6  ;;  %v5458_v7 = vld [vmem:[#allocation12 + $0x44] ss:$16 sps:$4 sm:$0xff]  }
  0x3f   :  { %935 = vmatpush1.bf16.msra.mxu1 %v5305_v24  ;;  %256 = vmatprep.mubr.bf16.mxu0 %v7215_v1  ;;  %7500 = vst [vmem:[#allocation15_spill] sm:$0xff] %v5450_v5  ;;  %7502 = vst [vmem:[#allocation17_spill] sm:$0xff] %v5458_v7  ;;  %v5462_v9 = vld [vmem:[#allocation12 + $0x40] ss:$16 sps:$4 sm:$0xff]   ;;  %v5468_v10 = vld [vmem:[#allocation12 + $0x4c] ss:$16 sps:$4 sm:$0xff]  }
  0x40   :  { %349 = vmatprep.mubr.bf16.mxu1 %v7215_v1  ;;  %936 = vmatprep.subr.bf16.mxu1 %v5307_v25  ;;  %7504 = vst [vmem:[#allocation19_spill] sm:$0xff] %v5462_v9  ;;  %7505 = vst [vmem:[#allocation20_spill] sm:$0xff] %v5468_v10  ;;  %v5470_v11 = vld [vmem:[#allocation12 + $0x24] ss:$16 sps:$4 sm:$0xff]   ;;  %v5472_v14 = vld [vmem:[#allocation12 + $0x48] ss:$16 sps:$4 sm:$0xff]  }
  0x41   :  { %899 = vmatprep.subr.bf16.mxu0 %v4465_v26  ;;  %7506 = vst [vmem:[#allocation21_spill] sm:$0xff] %v5470_v11  ;;  %7507 = vst [vmem:[#allocation22_spill] sm:$0xff] %v5472_v14  ;;  %v5480_v16 = vld [vmem:[#allocation12 + $0x2c] ss:$16 sps:$4 sm:$0xff]   ;;  %v5482_v17 = vld [vmem:[#allocation12 + $0x4] ss:$16 sps:$4 sm:$0xff]  }
  0x42   :  { %900 = vmatpush1.bf16.msra.mxu0 %v4469_v27  ;;  %7509 = vst [vmem:[#allocation24_spill] sm:$0xff] %v5480_v16  ;;  %7510 = vst [vmem:[#allocation25_spill] sm:$0xff] %v5482_v17  ;;  %v5488_v19 = vld [vmem:[#allocation12] ss:$16 sps:$4 sm:$0xff]   ;;  %v5492_v20 = vld [vmem:[#allocation12 + $0xc] ss:$16 sps:$4 sm:$0xff]  }
  0x43   :  { %937 = vmatpush1.bf16.msra.mxu1 %v5313_v28  ;;  %901 = vmatprep.subr.bf16.mxu0 %v4471_v29  ;;  %7512 = vst [vmem:[#allocation27_spill] sm:$0xff] %v5488_v19  ;;  %7513 = vst [vmem:[#allocation28_spill] sm:$0xff] %v5492_v20  ;;  %v4544_v21 = vld [vmem:[#allocation5] sm:$0xff]   ;;  %v5503_v27 = vld [vmem:[#allocation10 + $0xe0] ss:$16 sps:$4 sm:$0xff]  }
  0x44   :  { %938 = vmatprep.subr.bf16.mxu1 %v5317_v30  ;;  %v5494_v22 = vld [vmem:[#allocation12 + $0x8] ss:$16 sps:$4 sm:$0xff]   ;;  %v5501_v26 = vld [vmem:[#allocation10 + $0xec] ss:$16 sps:$4 sm:$0xff]   ;;  %7517 = vst [vmem:[#allocation32_spill] sm:$0xff] %v5503_v27 }
  0x45   :  { %7514 = vst [vmem:[#allocation29_spill] sm:$0xff] %v5494_v22  ;;  %7516 = vst [vmem:[#allocation31_spill] sm:$0xff] %v5501_v26  ;;  %v5505_v29 = vld [vmem:[#allocation10 + $0xe8] ss:$16 sps:$4 sm:$0xff]  }
  0x46   :  { %4258 = vmatmul.mubr.msk.bf16.gmra.mxu0 %vm156_vm1, %v4454_v31  ;;  %4265 = vmatmul.mubr.msk.bf16.gmra.mxu1 %vm156_vm1, %v4442_v15  ;;  %v5474_v15 = vld [vmem:[#allocation12 + $0x20] ss:$16 sps:$4 sm:$0xff]   ;;  %7518 = vst [vmem:[#allocation33_spill] sm:$0xff] %v5505_v29 }
  0x47   :  { %266 = vmatprep.mubr.bf16.mxu0 %v7215_v1  ;;  %359 = vmatprep.mubr.bf16.mxu1 %v7215_v1  ;;  %7508 = vst [vmem:[#allocation23_spill] sm:$0xff] %v5474_v15 }
  0x48   :  { %939 = vmatpush1.bf16.msra.mxu1 %v5324_v32  ;;  %902 = vmatpush1.bf16.msra.mxu0 %v5326_v33 }
  0x49   :  { %903 = vmatprep.subr.bf16.mxu0 %v5328_v34  ;;  %940 = vmatprep.subr.bf16.mxu1 %v5330_v35 }
  0x4c   :  { %904 = vmatpush1.bf16.msra.mxu0 %v5334_v36  ;;  %941 = vmatpush1.bf16.msra.mxu1 %v5336_v37 }
  0x4d   :  { %905 = vmatprep.subr.bf16.mxu0 %v5340_v38  ;;  %942 = vmatprep.subr.bf16.mxu1 %v5342_v39 }
  0x4e   :  { %4259 = vmatmul.mubr.msk.bf16.gmra.mxu0 %vm156_vm1, %v4464_v40  ;;  %4266 = vmatmul.mubr.msk.bf16.gmra.mxu1 %vm156_vm1, %v4444_v23  ;;  %v5499_v23 = vld [vmem:[#allocation10 + $0xe4] ss:$16 sps:$4 sm:$0xff]  }
  0x4f   :  { %276 = vmatprep.mubr.bf16.mxu0 %v7215_v1  ;;  %369 = vmatprep.mubr.bf16.mxu1 %v7215_v1  ;;  %7515 = vst [vmem:[#allocation30_spill] sm:$0xff] %v5499_v23 }
  0x50   :  { %906 = vmatpush1.bf16.msra.mxu0 %v5351_v41  ;;  %943 = vmatpush1.bf16.msra.mxu1 %v5353_v42 }
  0x51   :  { %944 = vmatprep.subr.bf16.mxu1 %v5355_v43  ;;  %1190 = vmatprep.subr.bf16.mxu0 %v5402_v51 }
  0x54   :  { %945 = vmatpush1.bf16.msra.mxu1 %v5363_v44 }
  0x55   :  { %946 = vmatprep.subr.bf16.mxu1 %v5367_v45 }
  0x56   :  { %4260 = vmatmul.mubr.msk.bf16.gmra.mxu0 %vm156_vm1, %v4474_v46  ;;  %4267 = vmatmul.mubr.msk.bf16.gmra.mxu1 %vm156_vm1, %v4454_v31  ;;  %v5511_v31 = vld [vmem:[#allocation10 + $0xc4] ss:$16 sps:$4 sm:$0xff]  }
  0x57   :  { %379 = vmatprep.mubr.bf16.mxu1 %v7215_v1  ;;  %923 = vmatprep.mubr.bf16.mxu0 %v7215_v1  ;;  %7519 = vst [vmem:[#allocation34_spill] sm:$0xff] %v5511_v31 }
  0x58   :  { %947 = vmatpush1.bf16.msra.mxu1 %v5375_v47 }
  0x59   :  { %948 = vmatprep.subr.bf16.mxu1 %v5377_v48 }
  0x5c   :  { %949 = vmatpush1.bf16.msra.mxu1 %v5383_v49 }
  0x5d   :  { %1233 = vmatprep.subr.bf16.mxu1 %v5408_v53 }
  0x5e   :  { %4268 = vmatmul.mubr.msk.bf16.gmra.mxu1 %vm156_vm1, %v4464_v40  ;;  %924 = vmatmul.mubr.bf16.vlgmr.msra.gmra.mxu0 %v4484_v50  ;;  %v5513_v40 = vld [vmem:[#allocation10 + $0xcc] ss:$16 sps:$4 sm:$0xff]  }
  0x5f   :  { %389 = vmatprep.mubr.bf16.mxu1 %v7215_v1  ;;  %1222 = vmatprep.mubr.bf16.mxu0 %v7215_v1  ;;  %7520 = vst [vmem:[#allocation35_spill] sm:$0xff] %v5513_v40 }
  0x60   :  { %1191 = vmatpush1.bf16.msra.mxu0 %v5404_v52 }
  0x61   :  { %1192 = vmatprep.subr.bf16.mxu0 %v5410_v54 }
  0x64   :  { %1193 = vmatpush1.bf16.msra.mxu0 %v5414_v56 }
  0x65   :  { %1194 = vmatprep.subr.bf16.mxu0 %v5422_v58 }
  0x66   :  { %4269 = vmatmul.mubr.msk.bf16.gmra.mxu1 %vm156_vm1, %v4474_v46  ;;  %v5516_v46 = vld [vmem:[#allocation10 + $0xc0] ss:$16 sps:$4 sm:$0xff]  }
  0x67   :  { %399 = vmatprep.mubr.bf16.mxu1 %v7215_v1  ;;  %7521 = vst [vmem:[#allocation36_spill] sm:$0xff] %v5516_v46 }
  0x68   :  { %1195 = vmatpush1.bf16.msra.mxu0 %v5426_v60 }
  0x69   :  { %1196 = vmatprep.subr.bf16.mxu0 %v5434_v62 }
  0x6c   :  { %1197 = vmatpush1.bf16.msra.mxu0 %v5438_v0 }
  0x6d   :  { %1198 = vmatprep.subr.bf16.mxu0 %v5446_v3 }
  0x6e   :  { %4270 = vmatmul.mubr.msk.bf16.gmra.mxu1 %vm156_vm1, %v5276_v8  ;;  %v5460_v8 = vld [vmem:[#allocation12 + $0x68] ss:$16 sps:$4 sm:$0xff]  }
  0x6f   :  { %409 = vmatprep.mubr.bf16.mxu1 %v7215_v1  ;;  %7503 = vst [vmem:[#allocation18_spill] sm:$0xff] %v5460_v8 }
  0x70   :  { %1199 = vmatpush1.bf16.msra.mxu0 %v5450_v5 }
  0x71   :  { %1200 = vmatprep.subr.bf16.mxu0 %v5458_v7 }
  0x74   :  { %1201 = vmatpush1.bf16.msra.mxu0 %v5462_v9 }
  0x75   :  { %1202 = vmatprep.subr.bf16.mxu0 %v5470_v11 }
  0x76   :  { %4271 = vmatmul.mubr.msk.bf16.gmra.mxu1 %vm156_vm1, %v5295_v18  ;;  %v5484_v18 = vld [vmem:[#allocation12 + $0x28] ss:$16 sps:$4 sm:$0xff]  }
  0x77   :  { %966 = vmatprep.mubr.bf16.mxu1 %v7215_v1  ;;  %7511 = vst [vmem:[#allocation26_spill] sm:$0xff] %v5484_v18 }
  0x78   :  { %1203 = vmatpush1.bf16.msra.mxu0 %v5474_v15 }
  0x79   :  { %1204 = vmatprep.subr.bf16.mxu0 %v5482_v17 }
  0x7c   :  { %1205 = vmatpush1.bf16.msra.mxu0 %v5488_v19 }
  0x7d   :  { %1436 = vmatprep.subr.bf16.mxu0 %v5499_v23  ;;  %v5592_v23 = vld [vmem:[#allocation10 + $0x8] ss:$16 sps:$4 sm:$0xff]  }
  0x7e   :  { %967 = vmatmul.mubr.bf16.vlgmr.msra.gmra.mxu1 %v4484_v50  ;;  %v5518_v50 = vld [vmem:[#allocation10 + $0xc8] ss:$16 sps:$4 sm:$0xff]   ;;  %7547 = vst [vmem:[#allocation62_spill] sm:$0xff] %v5592_v23 }
  0x7f   :  { %1265 = vmatprep.mubr.bf16.mxu1 %v7215_v1  ;;  %1234 = vmatpush1.bf16.msra.mxu1 %v5412_v55  ;;  %7522 = vst [vmem:[#allocation37_spill] sm:$0xff] %v5518_v50 }
  0x80   :  { %1235 = vmatprep.subr.bf16.mxu1 %v5420_v57  ;;  %1223 = vmatmul.mubr.bf16.vlgmr.msra.gmra.mxu0 %v4544_v21 }
  0x81   :  { %1468 = vmatprep.mubr.bf16.mxu0 %v7215_v1  ;;  %1437 = vmatpush1.bf16.msra.mxu0 %v5503_v27  ;;  %v5528_v27 = vld [vmem:[#allocation10 + $0xa0] ss:$16 sps:$4 sm:$0xff]  }
  0x82   :  { %1438 = vmatprep.subr.bf16.mxu0 %v5511_v31  ;;  %7525 = vst [vmem:[#allocation40_spill] sm:$0xff] %v5528_v27  ;;  %v5578_v31 = vld [vmem:[#allocation10 + $0x28] ss:$16 sps:$4 sm:$0xff]  }
  0x83   :  { %1236 = vmatpush1.bf16.msra.mxu1 %v5424_v59  ;;  %7542 = vst [vmem:[#allocation57_spill] sm:$0xff] %v5578_v31 }
  0x84   :  { %1237 = vmatprep.subr.bf16.mxu1 %v5432_v61 }
  0x85   :  { %1439 = vmatpush1.bf16.msra.mxu0 %v5516_v46  ;;  %v5538_v46 = vld [vmem:[#allocation10 + $0x8c] ss:$16 sps:$4 sm:$0xff]  }
  0x86   :  { %7528 = vst [vmem:[#allocation43_spill] sm:$0xff] %v5538_v46 }
  0x87   :  { %1238 = vmatpush1.bf16.msra.mxu1 %v5436_v63 }
  0x88   :  { %1239 = vmatprep.subr.bf16.mxu1 %v5444_v2 }
  0x8b   :  { %1240 = vmatpush1.bf16.msra.mxu1 %v5448_v4 }
  0x8c   :  { %1241 = vmatprep.subr.bf16.mxu1 %v5456_v6 }
  0x8f   :  { %1242 = vmatpush1.bf16.msra.mxu1 %v5460_v8 }
  0x90   :  { %1243 = vmatprep.subr.bf16.mxu1 %v5468_v10 }
  0x93   :  { %1244 = vmatpush1.bf16.msra.mxu1 %v5472_v14 }
  0x94   :  { %1245 = vmatprep.subr.bf16.mxu1 %v5480_v16 }
  0x97   :  { %1246 = vmatpush1.bf16.msra.mxu1 %v5484_v18 }
  0x98   :  { %1247 = vmatprep.subr.bf16.mxu1 %v5492_v20 }
  0x9b   :  { %1248 = vmatpush1.bf16.msra.mxu1 %v5494_v22 }
  0x9c   :  { %1479 = vmatprep.subr.bf16.mxu1 %v5501_v26  ;;  %v5530_v26 = vld [vmem:[#allocation10 + $0xa8] ss:$16 sps:$4 sm:$0xff]  }
  0x9d   :  { %7526 = vst [vmem:[#allocation41_spill] sm:$0xff] %v5530_v26 }
  0x9e   :  { %1266 = vmatmul.mubr.bf16.vlgmr.msra.gmra.mxu1 %v4544_v21  ;;  %v5524_v21 = vld [vmem:[#allocation10 + $0xa4] ss:$16 sps:$4 sm:$0xff]  }
  0x9f   :  { %1480 = vmatpush1.bf16.msra.mxu1 %v5505_v29  ;;  %1511 = vmatprep.mubr.bf16.mxu1 %v7215_v1  ;;  %7523 = vst [vmem:[#allocation38_spill] sm:$0xff] %v5524_v21  ;;  %v5526_v29 = vld [vmem:[#allocation10 + $0xac] ss:$16 sps:$4 sm:$0xff]   ;;  %v5536_v1 = vld [vmem:[#allocation10 + $0x84] ss:$16 sps:$4 sm:$0xff]  }
  0xa0   :  { %1481 = vmatprep.subr.bf16.mxu1 %v5513_v40  ;;  %7524 = vst [vmem:[#allocation39_spill] sm:$0xff] %v5526_v29  ;;  %1440 = vmatprep.subr.bf16.mxu0 %v5524_v21  ;;  %7527 = vst [vmem:[#allocation42_spill] sm:$0xff] %v5536_v1  ;;  %v5542_v40 = vld [vmem:[#allocation10 + $0x88] ss:$16 sps:$4 sm:$0xff]  }
  0xa1   :  { %1441 = vmatpush1.bf16.msra.mxu0 %v5528_v27  ;;  %7530 = vst [vmem:[#allocation45_spill] sm:$0xff] %v5542_v40  ;;  %v5550_v27 = vld [vmem:[#allocation10 + $0x6c] ss:$16 sps:$4 sm:$0xff]   ;;  %v5554_v21 = vld [vmem:[#allocation10 + $0x68] ss:$16 sps:$4 sm:$0xff]  }
  0xa2   :  { %1442 = vmatprep.subr.bf16.mxu0 %v5536_v1  ;;  %7532 = vst [vmem:[#allocation47_spill] sm:$0xff] %v5550_v27  ;;  %7534 = vst [vmem:[#allocation49_spill] sm:$0xff] %v5554_v21  ;;  %v5566_v1 = vld [vmem:[#allocation10 + $0x48] ss:$16 sps:$4 sm:$0xff]  }
  0xa3   :  { %1482 = vmatpush1.bf16.msra.mxu1 %v5518_v50  ;;  %v5540_v50 = vld [vmem:[#allocation10 + $0x80] ss:$16 sps:$4 sm:$0xff]   ;;  %7538 = vst [vmem:[#allocation53_spill] sm:$0xff] %v5566_v1 }
  0xa4   :  { %1483 = vmatprep.subr.bf16.mxu1 %v5526_v29  ;;  %7529 = vst [vmem:[#allocation44_spill] sm:$0xff] %v5540_v50  ;;  %v5548_v29 = vld [vmem:[#allocation10 + $0x64] ss:$16 sps:$4 sm:$0xff]  }
  0xa5   :  { %1443 = vmatpush1.bf16.msra.mxu0 %v5540_v50  ;;  %7531 = vst [vmem:[#allocation46_spill] sm:$0xff] %v5548_v29  ;;  %v5562_v50 = vld [vmem:[#allocation10 + $0x4c] ss:$16 sps:$4 sm:$0xff]  }
  0xa6   :  { %1444 = vmatprep.subr.bf16.mxu0 %v5548_v29  ;;  %7536 = vst [vmem:[#allocation51_spill] sm:$0xff] %v5562_v50  ;;  %v422_v29 = vlaneseq }
  0xa7   :  { %1484 = vmatpush1.bf16.msra.mxu1 %v5530_v26  ;;  %v5552_v26 = vld [vmem:[#allocation10 + $0x60] ss:$16 sps:$4 sm:$0xff]  }
  0xa8   :  { %1485 = vmatprep.subr.bf16.mxu1 %v5538_v46  ;;  %7533 = vst [vmem:[#allocation48_spill] sm:$0xff] %v5552_v26  ;;  %v5560_v46 = vld [vmem:[#allocation10 + $0x44] ss:$16 sps:$4 sm:$0xff]  }
  0xa9   :  { %1445 = vmatpush1.bf16.msra.mxu0 %v5552_v26  ;;  %7535 = vst [vmem:[#allocation50_spill] sm:$0xff] %v5560_v46  ;;  %v5572_v26 = vld [vmem:[#allocation10 + $0x24] ss:$16 sps:$4 sm:$0xff]  }
  0xaa   :  { %1446 = vmatprep.subr.bf16.mxu0 %v5560_v46  ;;  %7539 = vst [vmem:[#allocation54_spill] sm:$0xff] %v5572_v26  ;;  %v5590_v46 = vld [vmem:[#allocation10] ss:$16 sps:$4 sm:$0xff]  }
  0xab   :  { %1486 = vmatpush1.bf16.msra.mxu1 %v5542_v40  ;;  %v5564_v40 = vld [vmem:[#allocation10 + $0x40] ss:$16 sps:$4 sm:$0xff]   ;;  %7546 = vst [vmem:[#allocation61_spill] sm:$0xff] %v5590_v46 }
  0xac   :  { %1487 = vmatprep.subr.bf16.mxu1 %v5550_v27  ;;  %7537 = vst [vmem:[#allocation52_spill] sm:$0xff] %v5564_v40  ;;  %v5576_v27 = vld [vmem:[#allocation10 + $0x20] ss:$16 sps:$4 sm:$0xff]  }
  0xad   :  { %1447 = vmatpush1.bf16.msra.mxu0 %v5564_v40  ;;  %7541 = vst [vmem:[#allocation56_spill] sm:$0xff] %v5576_v27  ;;  %v5586_v40 = vld [vmem:[#allocation10 + $0x4] ss:$16 sps:$4 sm:$0xff]  }
  0xae   :  { %1448 = vmatprep.subr.bf16.mxu0 %v5572_v26  ;;  %7544 = vst [vmem:[#allocation59_spill] sm:$0xff] %v5586_v40 }
  0xaf   :  { %1488 = vmatpush1.bf16.msra.mxu1 %v5554_v21  ;;  %v5574_v21 = vld [vmem:[#allocation10 + $0x2c] ss:$16 sps:$4 sm:$0xff]  }
  0xb0   :  { %1489 = vmatprep.subr.bf16.mxu1 %v5562_v50  ;;  %7540 = vst [vmem:[#allocation55_spill] sm:$0xff] %v5574_v21  ;;  %v5583_v50 = vshrl.u32 %v422_v29, 7  ;;  %v420_v29 = vld [vmem:[%s7205_s3] sm:$0xf] }
  0xb1   :  { %1449 = vmatpush1.bf16.msra.mxu0 %v5576_v27 }
  0xb2   :  { %7543 = vst [vmem:[#allocation58_spill] sm:$0xff] %v5583_v50  ;;  %1450 = vmatprep.subr.bf16.mxu0 %v5586_v40  ;;  %v7247_v27 = vsub.s32 0, %v5583_v50 }
  0xb3   :  { %1490 = vmatpush1.bf16.msra.mxu1 %v5566_v1  ;;  %v5588_v1 = vld [vmem:[#allocation10 + $0xc] ss:$16 sps:$4 sm:$0xff]  }
  0xb4   :  { %1491 = vmatprep.subr.bf16.mxu1 %v5574_v21  ;;  %7545 = vst [vmem:[#allocation60_spill] sm:$0xff] %v5588_v1  ;;  %v5607_v40 = vrot.slane %v420_v29, %v7247_v27 }
  0xb5   :  { %1451 = vmatpush1.bf16.msra.mxu0 %v5590_v46 }
  0xb6   :  { %1578 = vmatprep.subr.bf16.mxu0 %v5278_v12 }
  0xb7   :  { %1492 = vmatpush1.bf16.msra.mxu1 %v5578_v31  ;;  %v7249_v31 = vsub.s32 1, %v5583_v50 }
  0xb8   :  { %1493 = vmatprep.subr.bf16.mxu1 %v5588_v1 }
  0xb9   :  { %v5611_v46 = vrot.slane %v420_v29, %v7249_v31 }
  0xbb   :  { %1494 = vmatpush1.bf16.msra.mxu1 %v5592_v23  ;;  %7548 = vst [vmem:[#allocation63_spill] sm:$0xff] %v5611_v46 }
  0xbc   :  { %1621 = vmatprep.subr.bf16.mxu1 %v5283_v13 }
  0xee   :  { %v5613_v1 = vpop.f32.mrf.mxu0  ;;  %v288_v23 = vpop.f32.mrf.mxu1 }
  0xef   :  { %v5616_v12 = vadd.f32 %v5607_v40, %v288_v23 }
  0xf0   :  { %v5618_v21 = vpop.f32.mrf.mxu0  ;;  %v290_v26 = vpop.f32.mrf.mxu1 }
  0xf1   :  { %7549 = vst [vmem:[#allocation64_spill] sm:$0xff] %v5616_v12  ;;  %v5621_v13 = vadd.f32 %v5611_v46, %v290_v26 }
  0xf2   :  { %v5623_v22 = vpop.f32.mrf.mxu0  ;;  %v292_v27 = vpop.f32.mrf.mxu1 }
  0xf3   :  { %7550 = vst [vmem:[#allocation65_spill] sm:$0xff] %v5621_v13  ;;  %v5626_v19 = vadd.f32 %v5607_v40, %v292_v27 }
  0xf4   :  { %v5628_v31 = vpop.f32.mrf.mxu0  ;;  %v5630_v20 = vpop.f32.mrf.mxu1 }
  0xf5   :  { %7551 = vst [vmem:[#allocation66_spill] sm:$0xff] %v5626_v19  ;;  %7552 = vst [vmem:[#allocation67_spill] sm:$0xff] %v5630_v20 }
  0xf6   :  { %v238_v17 = vpop.f32.mrf.mxu0  ;;  %v298_v18 = vpop.f32.mrf.mxu1 }
  0xf7   :  { %v5633_v23 = vadd.f32 %v5607_v40, %v238_v17  ;;  %v5636_v12 = vadd.f32 %v5607_v40, %v298_v18 }
  0xf8   :  { %v240_v26 = vpop.f32.mrf.mxu0  ;;  %v300_v13 = vpop.f32.mrf.mxu1 }
  0xf9   :  { %7553 = vst [vmem:[#allocation68_spill] sm:$0xff] %v5633_v23  ;;  %7554 = vst [vmem:[#allocation69_spill] sm:$0xff] %v5636_v12  ;;  %v5639_v15 = vadd.f32 %v5611_v46, %v240_v26  ;;  %v5642_v27 = vadd.f32 %v5611_v46, %v300_v13 }
  0xfa   :  { %v242_v19 = vpop.f32.mrf.mxu0  ;;  %v302_v16 = vpop.f32.mrf.mxu1 }
  0xfb   :  { %7555 = vst [vmem:[#allocation70_spill] sm:$0xff] %v5639_v15  ;;  %7556 = vst [vmem:[#allocation71_spill] sm:$0xff] %v5642_v27  ;;  %v5645_v20 = vadd.f32 %v5607_v40, %v242_v19  ;;  %v5648_v11 = vadd.f32 %v5607_v40, %v302_v16  ;;  %v7259_v15 = vsub.s32 2, %v5583_v50 }
  0xfc   :  { %v5650_v17 = vpop.f32.mrf.mxu0  ;;  %v5652_v18 = vpop.f32.mrf.mxu1 }
  0xfd   :  { %7557 = vst [vmem:[#allocation72_spill] sm:$0xff] %v5645_v20  ;;  %7558 = vst [vmem:[#allocation73_spill] sm:$0xff] %v5648_v11  ;;  %v7264_v20 = vsub.s32 3, %v5583_v50 }
  0xfe   :  { %7559 = vst [vmem:[#allocation74_spill] sm:$0xff] %v5650_v17  ;;  %7560 = vst [vmem:[#allocation75_spill] sm:$0xff] %v5652_v18  ;;  %v248_v12 = vpop.f32.mrf.mxu0  ;;  %v5654_v23 = vpop.f32.mrf.mxu1 }
  0xff   :  { %v5657_v26 = vadd.f32 %v5607_v40, %v248_v12 }
 0x100   :  { %v250_v13 = vpop.f32.mrf.mxu0  ;;  %v5659_v27 = vpop.f32.mrf.mxu1 }
 0x101   :  { %7561 = vst [vmem:[#allocation76_spill] sm:$0xff] %v5657_v26  ;;  %v5663_v19 = vadd.f32 %v5611_v46, %v250_v13  ;;  %v5677_v26 = vrot.slane %v420_v29, %v7259_v15  ;;  %v5681_v13 = vrot.slane %v420_v29, %v7264_v20 }
 0x102   :  { %v252_v16 = vpop.f32.mrf.mxu0  ;;  %v5665_v11 = vpop.f32.mrf.mxu1 }
 0x103   :  { %7562 = vst [vmem:[#allocation77_spill] sm:$0xff] %v5663_v19  ;;  %v5669_v18 = vadd.f32 %v5607_v40, %v252_v16 }
 0x104   :  { %v5671_v17 = vpop.f32.mrf.mxu0  ;;  %v5673_v12 = vpop.f32.mrf.mxu1 }
 0x105   :  { %7563 = vst [vmem:[#allocation78_spill] sm:$0xff] %v5669_v18  ;;  %7564 = vst [vmem:[#allocation79_spill] sm:$0xff] %v5671_v17 }
 0x106   :  { %v258_v14 = vpop.f32.mrf.mxu0  ;;  %v351_v9 = vpop.f32.mrf.mxu1 }
 0x107   :  { %v5684_v19 = vadd.f32 %v5607_v40, %v258_v14  ;;  %v5687_v16 = vadd.f32 %v5677_v26, %v351_v9 }
 0x108   :  { %v260_v18 = vpop.f32.mrf.mxu0  ;;  %v353_v17 = vpop.f32.mrf.mxu1 }
 0x109   :  { %7565 = vst [vmem:[#allocation80_spill] sm:$0xff] %v5684_v19  ;;  %7566 = vst [vmem:[#allocation81_spill] sm:$0xff] %v5687_v16  ;;  %v5690_v10 = vadd.f32 %v5611_v46, %v260_v18  ;;  %v5693_v15 = vadd.f32 %v5681_v13, %v353_v17 }
 0x10a   :  { %v262_v7 = vpop.f32.mrf.mxu0  ;;  %v355_v8 = vpop.f32.mrf.mxu1 }
 0x10b   :  { %7567 = vst [vmem:[#allocation82_spill] sm:$0xff] %v5690_v10  ;;  %7568 = vst [vmem:[#allocation83_spill] sm:$0xff] %v5693_v15  ;;  %v5696_v50 = vadd.f32 %v5607_v40, %v262_v7  ;;  %v5699_v29 = vadd.f32 %v5677_v26, %v355_v8 }
 0x10c   :  { %v264_v14 = vpop.f32.mrf.mxu0  ;;  %v5701_v20 = vpop.f32.mrf.mxu1 }
 0x10d   :  { %7569 = vst [vmem:[#allocation84_spill] sm:$0xff] %v5696_v50  ;;  %7570 = vst [vmem:[#allocation85_spill] sm:$0xff] %v5699_v29  ;;  %v5704_v9 = vadd.f32 %v5611_v46, %v264_v14 }
 0x10e   :  { %7571 = vst [vmem:[#allocation86_spill] sm:$0xff] %v5701_v20  ;;  %v268_v19 = vpop.f32.mrf.mxu0  ;;  %v361_v18 = vpop.f32.mrf.mxu1 }
 0x10f   :  { %7572 = vst [vmem:[#allocation87_spill] sm:$0xff] %v5704_v9  ;;  %v5707_v10 = vadd.f32 %v5607_v40, %v268_v19  ;;  %v5710_v17 = vadd.f32 %v5677_v26, %v361_v18 }
 0x110   :  { %v270_v15 = vpop.f32.mrf.mxu0  ;;  %v363_v7 = vpop.f32.mrf.mxu1 }
 0x111   :  { %7573 = vst [vmem:[#allocation88_spill] sm:$0xff] %v5707_v10  ;;  %7574 = vst [vmem:[#allocation89_spill] sm:$0xff] %v5710_v17  ;;  %v5713_v50 = vadd.f32 %v5611_v46, %v270_v15  ;;  %v5716_v8 = vadd.f32 %v5681_v13, %v363_v7 }
 0x112   :  { %v272_v20 = vpop.f32.mrf.mxu0  ;;  %v365_v29 = vpop.f32.mrf.mxu1 }
 0x113   :  { %7575 = vst [vmem:[#allocation90_spill] sm:$0xff] %v5713_v50  ;;  %7576 = vst [vmem:[#allocation91_spill] sm:$0xff] %v5716_v8  ;;  %v5719_v14 = vadd.f32 %v5607_v40, %v272_v20  ;;  %v5722_v9 = vadd.f32 %v5677_v26, %v365_v29 }
 0x114   :  { %v274_v19 = vpop.f32.mrf.mxu0  ;;  %v5724_v10 = vpop.f32.mrf.mxu1 }
 0x115   :  { %7577 = vst [vmem:[#allocation92_spill] sm:$0xff] %v5719_v14  ;;  %7578 = vst [vmem:[#allocation93_spill] sm:$0xff] %v5722_v9  ;;  %v5727_v18 = vadd.f32 %v5611_v46, %v274_v19 }
 0x116   :  { %7579 = vst [vmem:[#allocation94_spill] sm:$0xff] %v5724_v10  ;;  %v278_v17 = vpop.f32.mrf.mxu0  ;;  %v371_v15 = vpop.f32.mrf.mxu1 }
 0x117   :  { %7580 = vst [vmem:[#allocation95_spill] sm:$0xff] %v5727_v18  ;;  %v5730_v50 = vadd.f32 %v5607_v40, %v278_v17  ;;  %v5733_v7 = vadd.f32 %v5677_v26, %v371_v15 }
 0x118   :  { %v280_v8 = vpop.f32.mrf.mxu0  ;;  %v373_v20 = vpop.f32.mrf.mxu1 }
 0x119   :  { %7581 = vst [vmem:[#allocation96_spill] sm:$0xff] %v5730_v50  ;;  %7582 = vst [vmem:[#allocation97_spill] sm:$0xff] %v5733_v7  ;;  %v5736_v14 = vadd.f32 %v5611_v46, %v280_v8  ;;  %v5739_v29 = vadd.f32 %v5681_v13, %v373_v20 }
 0x11a   :  { %v282_v10 = vpop.f32.mrf.mxu0  ;;  %v375_v9 = vpop.f32.mrf.mxu1 }
 0x11b   :  { %7583 = vst [vmem:[#allocation98_spill] sm:$0xff] %v5736_v14  ;;  %7584 = vst [vmem:[#allocation99_spill] sm:$0xff] %v5739_v29  ;;  %v5742_v19 = vadd.f32 %v5607_v40, %v282_v10  ;;  %v5745_v18 = vadd.f32 %v5677_v26, %v375_v9 }
 0x11c   :  { %v284_v17 = vpop.f32.mrf.mxu0  ;;  %v5747_v50 = vpop.f32.mrf.mxu1 }
 0x11d   :  { %7585 = vst [vmem:[#allocation100_spill] sm:$0xff] %v5742_v19  ;;  %7586 = vst [vmem:[#allocation101_spill] sm:$0xff] %v5745_v18  ;;  %v5750_v15 = vadd.f32 %v5611_v46, %v284_v17 }
 0x11e   :  { %7587 = vst [vmem:[#allocation102_spill] sm:$0xff] %v5747_v50  ;;  %v381_v7 = vpop.f32.mrf.mxu1  ;;  %v925_v19 = vpop.f32.mrf.mxu0 }
 0x11f   :  { %7588 = vst [vmem:[#allocation103_spill] sm:$0xff] %v5750_v15  ;;  %v5753_v8 = vadd.f32 %v5677_v26, %v381_v7 }
 0x120   :  { %v383_v20 = vpop.f32.mrf.mxu1  ;;  %v927_v7 = vpop.f32.mrf.mxu0 }
 0x121   :  { %7589 = vst [vmem:[#allocation104_spill] sm:$0xff] %v5753_v8  ;;  %v5756_v14 = vadd.f32 %v5681_v13, %v383_v20 }
 0x122   :  { %v385_v29 = vpop.f32.mrf.mxu1 }
 0x123   :  { %7590 = vst [vmem:[#allocation105_spill] sm:$0xff] %v5756_v14  ;;  %v5759_v10 = vadd.f32 %v5677_v26, %v385_v29 }
 0x124   :  { %v387_v9 = vpop.f32.mrf.mxu1 }
 0x125   :  { %7591 = vst [vmem:[#allocation106_spill] sm:$0xff] %v5759_v10  ;;  %v5762_v18 = vadd.f32 %v5681_v13, %v387_v9  ;;  %v929_v10 = vpop.f32.mrf.mxu0  ;;  %v443_v9 = vadd.f32 %v5611_v46, %v5618_v21 }
 0x126   :  { %v391_v50 = vpop.f32.mrf.mxu1 }
 0x127   :  { %7592 = vst [vmem:[#allocation107_spill] sm:$0xff] %v5762_v18  ;;  %v5765_v17 = vadd.f32 %v5677_v26, %v391_v50  ;;  %v442_v50 = vadd.f32 %v5607_v40, %v5613_v1  ;;  %v446_v1 = vadd.f32 %v5607_v40, %v5623_v22 }
 0x128   :  { %v393_v15 = vpop.f32.mrf.mxu1 }
 0x129   :  { %7593 = vst [vmem:[#allocation108_spill] sm:$0xff] %v5765_v17  ;;  %v5768_v8 = vadd.f32 %v5681_v13, %v393_v15  ;;  %v978_v15 = vadd.f32 %v927_v7, %v443_v9  ;;  %v977_v5 = vadd.f32 %v925_v19, %v442_v50  ;;  %v981_v9 = vadd.f32 %v929_v10, %v446_v1 }
 0x12a   :  { %v395_v20 = vpop.f32.mrf.mxu1  ;;  %v444_v10 = vadd.f32 %v5677_v26, %v5654_v23  ;;  %v449_v23 = vadd.f32 %v5681_v13, %v5673_v12 }
 0x12b   :  { %7594 = vst [vmem:[#allocation109_spill] sm:$0xff] %v5768_v8  ;;  %v5771_v14 = vadd.f32 %v5677_v26, %v395_v20  ;;  %v931_v20 = vpop.f32.mrf.mxu0  ;;  %v986_v6 = vmul.f32 0.5, %v978_v15  ;;  %v985_v7 = vmul.f32 0.5, %v977_v5  ;;  %v989_v22 = vmul.f32 0.5, %v981_v9 }
 0x12c   :  { %v397_v29 = vpop.f32.mrf.mxu1  ;;  %v445_v9 = vadd.f32 %v5681_v13, %v5659_v27 }
 0x12d   :  { %7595 = vst [vmem:[#allocation110_spill] sm:$0xff] %v5771_v14  ;;  %v5774_v16 = vadd.f32 %v5681_v13, %v397_v29  ;;  %v447_v29 = vadd.f32 %v5611_v46, %v5628_v31  ;;  %4602 = vtanh.f32 %v986_v6 }
 0x12e   :  { %v401_v18 = vpop.f32.mrf.mxu1  ;;  %4604 = vtanh.f32 %v985_v7 }
 0x12f   :  { %7596 = vst [vmem:[#allocation111_spill] sm:$0xff] %v5774_v16  ;;  %v5781_v17 = vadd.f32 %v5677_v26, %v401_v18  ;;  %v982_v18 = vadd.f32 %v931_v20, %v447_v29 }
 0x130   :  { %v403_v8 = vpop.f32.mrf.mxu1 }
 0x131   :  { %7597 = vst [vmem:[#allocation112_spill] sm:$0xff] %v5781_v17  ;;  %v5784_v14 = vadd.f32 %v5681_v13, %v403_v8  ;;  %v990_v31 = vmul.f32 0.5, %v982_v18 }
 0x132   :  { %v405_v16 = vpop.f32.mrf.mxu1 }
 0x133   :  { %7598 = vst [vmem:[#allocation113_spill] sm:$0xff] %v5784_v14  ;;  %v5789_v21 = vadd.f32 %v5677_v26, %v405_v16  ;;  %4606 = vtanh.f32 %v990_v31 }
 0x134   :  { %v407_v17 = vpop.f32.mrf.mxu1  ;;  %4608 = vtanh.f32 %v989_v22 }
 0x135   :  { %7599 = vst [vmem:[#allocation114_spill] sm:$0xff] %v5789_v21  ;;  %v5794_v19 = vadd.f32 %v5681_v13, %v407_v17  ;;  %v6139_v21 = vld [vmem:[#allocation12 + $0x44] ss:$16 sps:$4 sm:$0xff]  }
 0x136   :  { %v411_v8 = vpop.f32.mrf.mxu1 }
 0x137   :  { %7600 = vst [vmem:[#allocation115_spill] sm:$0xff] %v5794_v19  ;;  %v5797_v50 = vadd.f32 %v5677_v26, %v411_v8 }
 0x138   :  { %v413_v14 = vpop.f32.mrf.mxu1 }
 0x139   :  { %7601 = vst [vmem:[#allocation116_spill] sm:$0xff] %v5797_v50  ;;  %v5800_v16 = vadd.f32 %v5681_v13, %v413_v14  ;;  %v448_v14 = vadd.f32 %v5677_v26, %v5665_v11 }
 0x13a   :  { %v415_v40 = vpop.f32.mrf.mxu1  ;;  %v4603_v7 = vpop.eup %4602 }
 0x13b   :  { %7602 = vst [vmem:[#allocation117_spill] sm:$0xff] %v5800_v16  ;;  %v5803_v15 = vadd.f32 %v5677_v26, %v415_v40  ;;  %v4605_v31 = vpop.eup %4604  ;;  %v1005_v40 = vmul.f32 0.5, %v4603_v7 }
 0x13c   :  { %v417_v5 = vpop.f32.mrf.mxu1 }
 0x13d   :  { %7603 = vst [vmem:[#allocation118_spill] sm:$0xff] %v5803_v15  ;;  %v5808_v17 = vadd.f32 %v5681_v13, %v417_v5  ;;  %v1007_v26 = vadd.f32 0.5, %v1005_v40 }
 0x13e   :  { %v968_v6 = vpop.f32.mrf.mxu1 }
 0x13f   :  { %7604 = vst [vmem:[#allocation119_spill] sm:$0xff] %v5808_v17  ;;  %v979_v20 = vadd.f32 %v968_v6, %v444_v10  ;;  %v1001_v6 = vmul.f32 0.5, %v4605_v31  ;;  %v1013_v50 = vmul.f32 0.0, %v1007_v26  ;;  %v7605_v26 = vmov 0  }
 0x140   :  { %v970_v29 = vpop.f32.mrf.mxu1  ;;  %v4607_v10 = vpop.eup %4606 }
 0x141   :  { %4610 = vtanh.f32 %v979_v20  ;;  %v980_v22 = vadd.f32 %v970_v29, %v445_v9  ;;  %v4609_v17 = vpop.eup %4608  ;;  %v1006_v20 = vmul.f32 0.5, %v4607_v10 }
 0x142   :  { %v972_v1 = vpop.f32.mrf.mxu1  ;;  %v1002_v15 = vmul.f32 0.5, %v4609_v17 }
 0x143   :  { %v983_v18 = vadd.f32 %v972_v1, %v448_v14  ;;  %v988_v11 = vmul.f32 0.5, %v980_v22  ;;  %v1003_v1 = vadd.f32 0.5, %v1001_v6  ;;  %v1008_v19 = vadd.f32 0.5, %v1006_v20  ;;  %v5832_v20 = vld [vmem:[#allocation8 + $0xc0] ss:$16 sps:$4 sm:$0xff]  }
 0x144   :  { %v974_v8 = vpop.f32.mrf.mxu1  ;;  %v1004_v12 = vadd.f32 0.5, %v1002_v15 }
 0x145   :  { %4612 = vtanh.f32 %v983_v18  ;;  %v984_v5 = vadd.f32 %v974_v8, %v449_v23  ;;  %v1014_v7 = vmul.f32 0.0, %v1008_v19  ;;  %v5822_v19 = vld [vmem:[#allocation8 + $0xe0] ss:$16 sps:$4 sm:$0xff]  }
 0x146   :  { %4614 = vtanh.f32 %v988_v11  ;;  %v5826_v11 = vld [vmem:[#allocation8 + $0xc4] ss:$16 sps:$4 sm:$0xff]  }
 0x147   :  { %v992_v14 = vmul.f32 0.5, %v984_v5 }
 0x149   :  { %4616 = vtanh.f32 %v992_v14  ;;  %v5836_v14 = vld [vmem:[#allocation8 + $0xa4] ss:$16 sps:$4 sm:$0xff]  }
 0x14e   :  { %v4611_v16 = vpop.eup %4610 }
 0x14f   :  { %v1015_v27 = vmul.f32 %v4611_v16, %v1003_v1  ;;  %v5848_v1 = vld [vmem:[#allocation8 + $0x80] ss:$16 sps:$4 sm:$0xff]  }
 0x151   :  { %v5816_v18 = vadd.f32 %v1015_v27, %v1013_v50 }
 0x152   :  { %v4613_v29 = vpop.eup %4612 }
 0x153   :  { %v1016_v9 = vmul.f32 %v4613_v29, %v1004_v12  ;;  %4618 = vtanh.f32 %v5816_v18  ;;  %v4615_v31 = vpop.eup %4614 }
 0x154   :  { %v1009_v17 = vmul.f32 0.5, %v4615_v31 }
 0x155   :  { %v5819_v8 = vadd.f32 %v1016_v9, %v1014_v7 }
 0x156   :  { %v4617_v23 = vpop.eup %4616  ;;  %v1011_v40 = vadd.f32 0.5, %v1009_v17 }
 0x157   :  { %4620 = vtanh.f32 %v5819_v8  ;;  %v1010_v16 = vmul.f32 0.5, %v4617_v23 }
 0x159   :  { %v1012_v5 = vadd.f32 0.5, %v1010_v16 }
 0x160   :  { %v4619_v22 = vpop.eup %4618 }
 0x161   :  { %v1021_v15 = vmul.f32 %v4619_v22, %v1011_v40 }
 0x164   :  { %v4621_v10 = vpop.eup %4620 }
 0x165   :  { %v1022_v50 = vmul.f32 %v4621_v10, %v1012_v5 }
 0x167   :  { %v1023_v6 = vpack.c.bf16 %v1022_v50, %v1021_v15 }
 0x169   :  { %1469 = vmatmul.mubr.bf16.vlgmr.msra.gmra.mxu0 %v1023_v6  ;;  %1512 = vmatmul.mubr.bf16.vlgmr.msra.gmra.mxu1 %v1023_v6 }
 0x16a   :  { %1579 = vmatpush1.bf16.msra.mxu0 %v5822_v19  ;;  %1622 = vmatpush1.bf16.msra.mxu1 %v5305_v24  ;;  %v5840_v24 = vld [vmem:[#allocation8 + $0xa0] ss:$16 sps:$4 sm:$0xff]  }
 0x16b   :  { %1580 = vmatprep.subr.bf16.mxu0 %v5826_v11  ;;  %1623 = vmatprep.subr.bf16.mxu1 %v5307_v25  ;;  %v5844_v25 = vld [vmem:[#allocation8 + $0x84] ss:$16 sps:$4 sm:$0xff]  }
 0x16c   :  { %1610 = vmatprep.mubr.bf16.mxu0 %v7605_v26  ;;  %1653 = vmatprep.mubr.bf16.mxu1 %v7605_v26 }
 0x16e   :  { %1581 = vmatpush1.bf16.msra.mxu0 %v5832_v20  ;;  %1624 = vmatpush1.bf16.msra.mxu1 %v5313_v28  ;;  %v5852_v28 = vld [vmem:[#allocation8 + $0x64] ss:$16 sps:$4 sm:$0xff]  }
 0x16f   :  { %1582 = vmatprep.subr.bf16.mxu0 %v5836_v14  ;;  %1625 = vmatprep.subr.bf16.mxu1 %v5317_v30  ;;  %v5856_v30 = vld [vmem:[#allocation8 + $0x60] ss:$16 sps:$4 sm:$0xff]  }
 0x172   :  { %1583 = vmatpush1.bf16.msra.mxu0 %v5840_v24  ;;  %1626 = vmatpush1.bf16.msra.mxu1 %v5324_v32  ;;  %v5860_v32 = vld [vmem:[#allocation8 + $0x44] ss:$16 sps:$4 sm:$0xff]  }
 0x173   :  { %1584 = vmatprep.subr.bf16.mxu0 %v5844_v25  ;;  %1627 = vmatprep.subr.bf16.mxu1 %v5330_v35  ;;  %v7608_v35 = vld [vmem:[#allocation18_spill] sm:$0xff] }
 0x176   :  { %1585 = vmatpush1.bf16.msra.mxu0 %v5848_v1  ;;  %1628 = vmatpush1.bf16.msra.mxu1 %v5336_v37  ;;  %v7610_v37 = vld [vmem:[#allocation20_spill] sm:$0xff] }
 0x177   :  { %1586 = vmatprep.subr.bf16.mxu0 %v5852_v28  ;;  %1629 = vmatprep.subr.bf16.mxu1 %v5342_v39  ;;  %v7612_v39 = vld [vmem:[#allocation22_spill] sm:$0xff] }
 0x17a   :  { %1587 = vmatpush1.bf16.msra.mxu0 %v5856_v30  ;;  %1630 = vmatpush1.bf16.msra.mxu1 %v5353_v42  ;;  %v7614_v42 = vld [vmem:[#allocation24_spill] sm:$0xff] }
 0x17b   :  { %1588 = vmatprep.subr.bf16.mxu0 %v5860_v32  ;;  %1631 = vmatprep.subr.bf16.mxu1 %v5355_v43  ;;  %v7615_v43 = vld [vmem:[#allocation23_spill] sm:$0xff] }
 0x17e   :  { %1589 = vmatpush1.bf16.msra.mxu0 %v5326_v33  ;;  %1632 = vmatpush1.bf16.msra.mxu1 %v5363_v44  ;;  %v7606_v33 = vld [vmem:[#allocation16_spill] sm:$0xff]  ;;  %v7616_v44 = vld [vmem:[#allocation26_spill] sm:$0xff] }
 0x17f   :  { %1590 = vmatprep.subr.bf16.mxu0 %v5328_v34  ;;  %1633 = vmatprep.subr.bf16.mxu1 %v5367_v45  ;;  %v7607_v34 = vld [vmem:[#allocation15_spill] sm:$0xff]  ;;  %v7617_v45 = vld [vmem:[#allocation25_spill] sm:$0xff] }
 0x182   :  { %1591 = vmatpush1.bf16.msra.mxu0 %v5334_v36  ;;  %1634 = vmatpush1.bf16.msra.mxu1 %v5375_v47  ;;  %v7609_v36 = vld [vmem:[#allocation17_spill] sm:$0xff]  ;;  %v7618_v47 = vld [vmem:[#allocation28_spill] sm:$0xff] }
 0x183   :  { %1592 = vmatprep.subr.bf16.mxu0 %v5340_v38  ;;  %1635 = vmatprep.subr.bf16.mxu1 %v5377_v48  ;;  %v7611_v38 = vld [vmem:[#allocation19_spill] sm:$0xff] }
 0x184   :  { %v7619_v48 = vld [vmem:[#allocation27_spill] sm:$0xff] }
 0x186   :  { %1593 = vmatpush1.bf16.msra.mxu0 %v5351_v41  ;;  %1636 = vmatpush1.bf16.msra.mxu1 %v5383_v49  ;;  %v7613_v41 = vld [vmem:[#allocation21_spill] sm:$0xff] }
 0x187   :  { %1711 = vmatprep.subr.bf16.mxu0 %v5402_v51  ;;  %1754 = vmatprep.subr.bf16.mxu1 %v5408_v53  ;;  %v7620_v49 = vld [vmem:[#allocation29_spill] sm:$0xff]  ;;  %v7621_v51 = vld [vmem:[#allocation30_spill] sm:$0xff]  ;;  %v1224_v53 = vpop.f32.mrf.mxu0 }
 0x189   :  { %1611 = vmatmul.mubr.bf16.vlgmr.msra.gmra.mxu0 %v1023_v6  ;;  %1654 = vmatmul.mubr.bf16.vlgmr.msra.gmra.mxu1 %v1023_v6 }
 0x18a   :  { %1712 = vmatpush1.bf16.msra.mxu0 %v5404_v52  ;;  %1755 = vmatpush1.bf16.msra.mxu1 %v5412_v55  ;;  %v7622_v52 = vld [vmem:[#allocation31_spill] sm:$0xff]  ;;  %v1226_v55 = vpop.f32.mrf.mxu0 }
 0x18b   :  { %1713 = vmatprep.subr.bf16.mxu0 %v5410_v54  ;;  %1756 = vmatprep.subr.bf16.mxu1 %v5420_v57  ;;  %v1267_v54 = vpop.f32.mrf.mxu1 }
 0x18c   :  { %1743 = vmatprep.mubr.bf16.mxu0 %v7605_v26  ;;  %1786 = vmatprep.mubr.bf16.mxu1 %v7605_v26  ;;  %v1228_v57 = vpop.f32.mrf.mxu0 }
 0x18e   :  { %1714 = vmatpush1.bf16.msra.mxu0 %v5414_v56  ;;  %1757 = vmatpush1.bf16.msra.mxu1 %v5424_v59  ;;  %v1269_v56 = vpop.f32.mrf.mxu1  ;;  %v666_v59 = vld [vmem:[%s7208_s6] sm:$0xf] }
 0x18f   :  { %1715 = vmatprep.subr.bf16.mxu0 %v5422_v58  ;;  %1758 = vmatprep.subr.bf16.mxu1 %v5432_v61 }
 0x190   :  { %v1271_v58 = vpop.f32.mrf.mxu1 }
 0x192   :  { %1716 = vmatpush1.bf16.msra.mxu0 %v5426_v60  ;;  %1759 = vmatpush1.bf16.msra.mxu1 %v5436_v63  ;;  %v1230_v60 = vpop.f32.mrf.mxu0  ;;  %v1273_v61 = vpop.f32.mrf.mxu1 }
 0x193   :  { %1717 = vmatprep.subr.bf16.mxu0 %v5434_v62  ;;  %1760 = vmatprep.subr.bf16.mxu1 %v5444_v2  ;;  %v7623_v62 = vld [vmem:[#allocation58_spill] sm:$0xff] }
 0x194   :  { %v7624_v63 = vsub.s32 0, %v7623_v62  ;;  %v7625_v27 = vsub.s32 1, %v7623_v62  ;;  %v7626_v31 = vsub.s32 2, %v7623_v62 }
 0x196   :  { %1718 = vmatpush1.bf16.msra.mxu0 %v5438_v0  ;;  %1761 = vmatpush1.bf16.msra.mxu1 %v5448_v4  ;;  %v5915_v0 = vrot.slane %v666_v59, %v7624_v63  ;;  %v5919_v12 = vrot.slane %v666_v59, %v7625_v27  ;;  %v5924_v23 = vrot.slane %v666_v59, %v7626_v31 }
 0x197   :  { %1719 = vmatprep.subr.bf16.mxu0 %v5446_v3  ;;  %1762 = vmatprep.subr.bf16.mxu1 %v7606_v33 }
 0x19a   :  { %1720 = vmatpush1.bf16.msra.mxu0 %v7607_v34  ;;  %1763 = vmatpush1.bf16.msra.mxu1 %v7608_v35 }
 0x19b   :  { %1721 = vmatprep.subr.bf16.mxu0 %v7609_v36  ;;  %1764 = vmatprep.subr.bf16.mxu1 %v7610_v37 }
 0x19e   :  { %1722 = vmatpush1.bf16.msra.mxu0 %v7611_v38  ;;  %1765 = vmatpush1.bf16.msra.mxu1 %v7612_v39 }
 0x19f   :  { %1723 = vmatprep.subr.bf16.mxu0 %v7613_v41  ;;  %1766 = vmatprep.subr.bf16.mxu1 %v7614_v42 }
 0x1a2   :  { %1724 = vmatpush1.bf16.msra.mxu0 %v7615_v43  ;;  %1767 = vmatpush1.bf16.msra.mxu1 %v7616_v44  ;;  %v7627_v43 = vsub.s32 3, %v7623_v62 }
 0x1a3   :  { %1725 = vmatprep.subr.bf16.mxu0 %v7617_v45  ;;  %1768 = vmatprep.subr.bf16.mxu1 %v7618_v47 }
 0x1a4   :  { %v5933_v44 = vrot.slane %v666_v59, %v7627_v43 }
 0x1a6   :  { %1726 = vmatpush1.bf16.msra.mxu0 %v7619_v48  ;;  %1769 = vmatpush1.bf16.msra.mxu1 %v7620_v49 }
 0x1a7   :  { %1797 = vmatprep.subr.bf16.mxu0 %v7621_v51  ;;  %1840 = vmatprep.subr.bf16.mxu1 %v7622_v52 }
 0x229   :  { %v1470_v2 = vpop.f32.mrf.mxu0  ;;  %v1513_v3 = vpop.f32.mrf.mxu1 }
 0x22a   :  { %v1471_v4 = vadd.f32 %v1470_v2, %v1224_v53  ;;  %v1514_v17 = vadd.f32 %v1513_v3, %v1267_v54 }
 0x22b   :  { %v1472_v29 = vpop.f32.mrf.mxu0  ;;  %v1515_v7 = vpop.f32.mrf.mxu1 }
 0x22c   :  { %v1522_v9 = vadd.f32 %v1471_v4, %v5915_v0  ;;  %v1473_v16 = vadd.f32 %v1472_v29, %v1226_v55  ;;  %v1524_v6 = vadd.f32 %v1514_v17, %v5924_v23  ;;  %v1516_v45 = vadd.f32 %v1515_v7, %v1269_v56 }
 0x22d   :  { %v1474_v22 = vpop.f32.mrf.mxu0  ;;  %v1517_v15 = vpop.f32.mrf.mxu1 }
 0x22e   :  { %v1530_v40 = vmul.f32 0.5, %v1522_v9  ;;  %v1523_v5 = vadd.f32 %v1473_v16, %v5919_v12  ;;  %v1475_v10 = vadd.f32 %v1474_v22, %v1228_v57  ;;  %v1518_v36 = vadd.f32 %v1517_v15, %v1271_v58 }
 0x22f   :  { %v1476_v50 = vpop.f32.mrf.mxu0  ;;  %v1519_v41 = vpop.f32.mrf.mxu1  ;;  %v1525_v48 = vadd.f32 %v1516_v45, %v5933_v44 }
 0x230   :  { %4622 = vtanh.f32 %v1530_v40  ;;  %v1531_v33 = vmul.f32 0.5, %v1523_v5  ;;  %v1477_v34 = vadd.f32 %v1476_v50, %v1230_v60  ;;  %v1526_v35 = vadd.f32 %v1475_v10, %v5915_v0  ;;  %v7628_v40 = vld [vmem:[#allocation68_spill] sm:$0xff] }
 0x231   :  { %v1528_v42 = vadd.f32 %v1518_v36, %v5924_v23  ;;  %v1520_v47 = vadd.f32 %v1519_v41, %v1273_v61  ;;  %v1533_v54 = vmul.f32 0.5, %v1525_v48  ;;  %v7632_v41 = vld [vmem:[#allocation72_spill] sm:$0xff] }
 0x232   :  { %4624 = vtanh.f32 %v1531_v33  ;;  %v1527_v37 = vadd.f32 %v1477_v34, %v5919_v12  ;;  %v1534_v38 = vmul.f32 0.5, %v1526_v35  ;;  %v7630_v34 = vld [vmem:[#allocation81_spill] sm:$0xff] }
 0x233   :  { %4626 = vtanh.f32 %v1524_v6  ;;  %v1529_v49 = vadd.f32 %v1520_v47, %v5933_v44  ;;  %v7629_v6 = vld [vmem:[#allocation70_spill] sm:$0xff] }
 0x234   :  { %v1535_v39 = vmul.f32 0.5, %v1527_v37  ;;  %4628 = vtanh.f32 %v1534_v38  ;;  %v7631_v37 = vld [vmem:[#allocation74_spill] sm:$0xff] }
 0x235   :  { %v1537_v58 = vmul.f32 0.5, %v1529_v49  ;;  %v455_v38 = vadd.f32 %v5611_v46, %v7631_v37 }
 0x236   :  { %4630 = vtanh.f32 %v1535_v39 }
 0x237   :  { %4632 = vtanh.f32 %v1528_v42 }
 0x238   :  { %4634 = vtanh.f32 %v1533_v54 }
 0x239   :  { %4636 = vtanh.f32 %v1537_v58 }
 0x23d   :  { %v4623_v51 = vpop.eup %4622 }
 0x23e   :  { %v1546_v52 = vmul.f32 0.5, %v4623_v51 }
 0x23f   :  { %v4625_v53 = vpop.eup %4624 }
 0x240   :  { %v1548_v55 = vadd.f32 0.5, %v1546_v52  ;;  %v1550_v57 = vmul.f32 0.5, %v4625_v53  ;;  %v4627_v60 = vpop.eup %4626  ;;  %v7633_v52 = vld [vmem:[#allocation85_spill] sm:$0xff] }
 0x241   :  { %v4629_v63 = vpop.eup %4628 }
 0x242   :  { %v1552_v2 = vadd.f32 0.5, %v1550_v57  ;;  %v1547_v59 = vmul.f32 0.5, %v4629_v63  ;;  %v1560_v61 = vmul.f32 %v4627_v60, %v1548_v55  ;;  %v7634_v63 = vld [vmem:[#allocation86_spill] sm:$0xff] }
 0x243   :  { %v4631_v62 = vpop.eup %4630 }
 0x244   :  { %v1558_v56 = vmul.f32 0.0, %v1552_v2  ;;  %v1551_v3 = vmul.f32 0.5, %v4631_v62  ;;  %v1549_v4 = vadd.f32 0.5, %v1547_v59  ;;  %v4633_v7 = vpop.eup %4632  ;;  %v457_v2 = vadd.f32 %v5681_v13, %v7634_v63  ;;  %v7646_v63 = vld [vmem:[#allocation42_spill] sm:$0xff] }
 0x245   :  { %v4635_v47 = vpop.eup %4634 }
 0x246   :  { %v5937_v27 = vadd.f32 %v1560_v61, %v1558_v56  ;;  %v1553_v29 = vadd.f32 0.5, %v1551_v3  ;;  %v1561_v31 = vmul.f32 %v4633_v7, %v1549_v4  ;;  %v4637_v51 = vpop.eup %4636  ;;  %v1554_v55 = vmul.f32 0.5, %v4635_v47  ;;  %v7635_v61 = vld [vmem:[#allocation83_spill] sm:$0xff] }
 0x247   :  { %v1555_v57 = vmul.f32 0.5, %v4637_v51 }
 0x248   :  { %v1559_v9 = vmul.f32 0.0, %v1553_v29  ;;  %4638 = vtanh.f32 %v5937_v27  ;;  %v1556_v62 = vadd.f32 0.5, %v1554_v55  ;;  %v7643_v55 = vld [vmem:[#allocation39_spill] sm:$0xff] }
 0x249   :  { %v1612_v17 = vpop.f32.mrf.mxu0  ;;  %v1655_v16 = vpop.f32.mrf.mxu1  ;;  %v1557_v59 = vadd.f32 0.5, %v1555_v57 }
 0x24a   :  { %v5940_v22 = vadd.f32 %v1561_v31, %v1559_v9  ;;  %v1664_v5 = vadd.f32 %v1612_v17, %v7628_v40  ;;  %v1666_v35 = vadd.f32 %v1655_v16, %v7630_v34  ;;  %v7636_v34 = vld [vmem:[#allocation32_spill] sm:$0xff] }
 0x24b   :  { %v1614_v10 = vpop.f32.mrf.mxu0  ;;  %v1657_v15 = vpop.f32.mrf.mxu1 }
 0x24c   :  { %4640 = vtanh.f32 %v5940_v22  ;;  %v1672_v50 = vmul.f32 0.5, %v1664_v5  ;;  %v1665_v33 = vadd.f32 %v1614_v10, %v7629_v6  ;;  %v1667_v3 = vadd.f32 %v1657_v15, %v7635_v61 }
 0x24d   :  { %v1616_v36 = vpop.f32.mrf.mxu0  ;;  %v1659_v43 = vpop.f32.mrf.mxu1 }
 0x24e   :  { %4642 = vtanh.f32 %v1672_v50  ;;  %v1673_v39 = vmul.f32 0.5, %v1665_v33  ;;  %v1668_v42 = vadd.f32 %v1616_v36, %v7632_v41  ;;  %v1670_v53 = vadd.f32 %v1659_v43, %v7633_v52 }
 0x24f   :  { %v1618_v45 = vpop.f32.mrf.mxu0  ;;  %v1661_v60 = vpop.f32.mrf.mxu1  ;;  %v1675_v40 = vmul.f32 0.5, %v1667_v3 }
 0x250   :  { %4644 = vtanh.f32 %v1673_v39  ;;  %v1676_v48 = vmul.f32 0.5, %v1668_v42  ;;  %v1669_v49 = vadd.f32 %v1618_v45, %v455_v38  ;;  %v1671_v4 = vadd.f32 %v1661_v60, %v457_v2  ;;  %v7638_v38 = vld [vmem:[#allocation34_spill] sm:$0xff]  ;;  %v7639_v39 = vld [vmem:[#allocation35_spill] sm:$0xff] }
 0x251   :  { %4646 = vtanh.f32 %v1666_v35  ;;  %v7637_v35 = vld [vmem:[#allocation33_spill] sm:$0xff]  ;;  %v7647_v2 = vld [vmem:[#allocation43_spill] sm:$0xff] }
 0x252   :  { %4648 = vtanh.f32 %v1676_v48  ;;  %v1677_v54 = vmul.f32 0.5, %v1669_v49  ;;  %v1679_v6 = vmul.f32 0.5, %v1671_v4  ;;  %v7640_v48 = vld [vmem:[#allocation36_spill] sm:$0xff]  ;;  %v7641_v49 = vld [vmem:[#allocation37_spill] sm:$0xff] }
 0x253   :  { %v7652_v4 = vld [vmem:[#allocation48_spill] sm:$0xff] }
 0x254   :  { %4650 = vtanh.f32 %v1677_v54  ;;  %v7642_v54 = vld [vmem:[#allocation38_spill] sm:$0xff] }
 0x255   :  { %4652 = vtanh.f32 %v1670_v53  ;;  %v4639_v58 = vpop.eup %4638  ;;  %7698 = vst [vmem:[#allocation38_spill] sm:$0xff] %v6139_v21 }
 0x256   :  { %v1566_v29 = vmul.f32 %v4639_v58, %v1556_v62  ;;  %4654 = vtanh.f32 %v1675_v40  ;;  %v7644_v58 = vld [vmem:[#allocation40_spill] sm:$0xff]  ;;  %v7657_v40 = vld [vmem:[#allocation53_spill] sm:$0xff] }
 0x257   :  { %4656 = vtanh.f32 %v1679_v6  ;;  %v7648_v62 = vld [vmem:[#allocation44_spill] sm:$0xff] }
 0x259   :  { %v4641_v56 = vpop.eup %4640 }
 0x25a   :  { %v1567_v7 = vmul.f32 %v4641_v56, %v1557_v59  ;;  %v7649_v59 = vld [vmem:[#allocation45_spill] sm:$0xff]  ;;  %v7650_v56 = vld [vmem:[#allocation46_spill] sm:$0xff] }
 0x25b   :  { %v4643_v9 = vpop.eup %4642 }
 0x25c   :  { %v1688_v31 = vmul.f32 0.5, %v4643_v9  ;;  %v1568_v17 = vpack.c.bf16 %v1567_v7, %v1566_v29  ;;  %v7653_v29 = vld [vmem:[#allocation49_spill] sm:$0xff]  ;;  %v7654_v7 = vld [vmem:[#allocation50_spill] sm:$0xff]  ;;  %v7655_v9 = vld [vmem:[#allocation51_spill] sm:$0xff] }
 0x25d   :  { %v4645_v16 = vpop.eup %4644 }
 0x25e   :  { %v4647_v5 = vpop.eup %4646  ;;  %v1690_v10 = vadd.f32 0.5, %v1688_v31  ;;  %v1692_v50 = vmul.f32 0.5, %v4645_v16  ;;  %1744 = vmatmul.mubr.bf16.vlgmr.msra.gmra.mxu0 %v1568_v17  ;;  %1787 = vmatmul.mubr.bf16.vlgmr.msra.gmra.mxu1 %v1568_v17  ;;  %v7656_v16 = vld [vmem:[#allocation52_spill] sm:$0xff] }
 0x25f   :  { %v4649_v33 = vpop.eup %4648  ;;  %1798 = vmatpush1.bf16.msra.mxu0 %v7636_v34  ;;  %1841 = vmatpush1.bf16.msra.mxu1 %v7637_v35  ;;  %v7660_v35 = vld [vmem:[#allocation56_spill] sm:$0xff] }
 0x260   :  { %v1694_v15 = vadd.f32 0.5, %v1692_v50  ;;  %v1702_v36 = vmul.f32 %v4647_v5, %v1690_v10  ;;  %v1689_v37 = vmul.f32 0.5, %v4649_v33  ;;  %1799 = vmatprep.subr.bf16.mxu0 %v7638_v38  ;;  %1842 = vmatprep.subr.bf16.mxu1 %v7639_v39  ;;  %v7658_v5 = vld [vmem:[#allocation54_spill] sm:$0xff]  ;;  %v7659_v10 = vld [vmem:[#allocation55_spill] sm:$0xff]  ;;  %v7663_v39 = vld [vmem:[#allocation60_spill] sm:$0xff] }
 0x261   :  { %v4651_v41 = vpop.eup %4650  ;;  %1829 = vmatprep.mubr.bf16.mxu0 %v7605_v26  ;;  %1872 = vmatprep.mubr.bf16.mxu1 %v7605_v26  ;;  %v7662_v38 = vld [vmem:[#allocation59_spill] sm:$0xff] }
 0x262   :  { %v1700_v42 = vmul.f32 %v1694_v15, %v5816_v18  ;;  %v1691_v43 = vadd.f32 0.5, %v1689_v37  ;;  %v1693_v45 = vmul.f32 0.5, %v4651_v41  ;;  %v4653_v47 = vpop.eup %4652  ;;  %v7645_v18 = vld [vmem:[#allocation41_spill] sm:$0xff] }
 0x263   :  { %1800 = vmatpush1.bf16.msra.mxu0 %v7640_v48  ;;  %1843 = vmatpush1.bf16.msra.mxu1 %v7641_v49  ;;  %v4655_v61 = vpop.eup %4654  ;;  %v7661_v15 = vld [vmem:[#allocation57_spill] sm:$0xff]  ;;  %v6004_v48 = vld [vmem:[#allocation8 + $0xe8] ss:$16 sps:$4 sm:$0xff]   ;;  %v6008_v49 = vld [vmem:[#allocation8 + $0xcc] ss:$16 sps:$4 sm:$0xff]  }
 0x264   :  { %v5962_v51 = vadd.f32 %v1702_v36, %v1700_v42  ;;  %v1695_v52 = vadd.f32 0.5, %v1693_v45  ;;  %v1703_v53 = vmul.f32 %v4653_v47, %v1691_v43  ;;  %1801 = vmatprep.subr.bf16.mxu0 %v7642_v54  ;;  %1844 = vmatprep.subr.bf16.mxu1 %v7643_v55  ;;  %v4657_v3 = vpop.eup %4656  ;;  %v1696_v31 = vmul.f32 0.5, %v4655_v61  ;;  %v7664_v42 = vld [vmem:[#allocation61_spill] sm:$0xff]  ;;  %v7665_v43 = vld [vmem:[#allocation62_spill] sm:$0xff] }
 0x265   :  { %v1697_v17 = vmul.f32 0.5, %v4657_v3  ;;  %v5995_v45 = vld [vmem:[#allocation8 + $0xe4] ss:$16 sps:$4 sm:$0xff]   ;;  %v5998_v47 = vld [vmem:[#allocation8 + $0xec] ss:$16 sps:$4 sm:$0xff]  }
 0x266   :  { %v1701_v57 = vmul.f32 %v1695_v52, %v5819_v8  ;;  %4658 = vtanh.f32 %v5962_v51  ;;  %v7651_v8 = vld [vmem:[#allocation47_spill] sm:$0xff]  ;;  %v1698_v6 = vadd.f32 0.5, %v1696_v31  ;;  %v6014_v52 = vld [vmem:[#allocation8 + $0xc8] ss:$16 sps:$4 sm:$0xff]   ;;  %v6026_v55 = vld [vmem:[#allocation8 + $0x8c] ss:$16 sps:$4 sm:$0xff]  }
 0x267   :  { %1802 = vmatpush1.bf16.msra.mxu0 %v7644_v58  ;;  %1845 = vmatpush1.bf16.msra.mxu1 %v7645_v18  ;;  %v1699_v33 = vadd.f32 0.5, %v1697_v17  ;;  %v6022_v54 = vld [vmem:[#allocation8 + $0xa8] ss:$16 sps:$4 sm:$0xff]   ;;  %v6034_v58 = vld [vmem:[#allocation8 + $0x6c] ss:$16 sps:$4 sm:$0xff]  }
 0x268   :  { %v5970_v60 = vadd.f32 %v1703_v53, %v1701_v57  ;;  %1803 = vmatprep.subr.bf16.mxu0 %v7646_v63  ;;  %1846 = vmatprep.subr.bf16.mxu1 %v7647_v2  ;;  %v6018_v53 = vld [vmem:[#allocation8 + $0xac] ss:$16 sps:$4 sm:$0xff]   ;;  %v6030_v57 = vld [vmem:[#allocation8 + $0x88] ss:$16 sps:$4 sm:$0xff]   ;;  %v6045_v2 = vld [vmem:[#allocation8 + $0x40] ss:$16 sps:$4 sm:$0xff]  }
 0x269   :  { %v6038_v18 = vld [vmem:[#allocation8 + $0x68] ss:$16 sps:$4 sm:$0xff]   ;;  %v6042_v63 = vld [vmem:[#allocation8 + $0x4c] ss:$16 sps:$4 sm:$0xff]   ;;  %7668 = vst [vmem:[#allocation18_spill] sm:$0xff] %v6045_v2 }
 0x26a   :  { %4660 = vtanh.f32 %v5970_v60  ;;  %7666 = vst [vmem:[#allocation16_spill] sm:$0xff] %v6038_v18  ;;  %7667 = vst [vmem:[#allocation15_spill] sm:$0xff] %v6042_v63  ;;  %v6060_v61 = vld [vmem:[#allocation8 + $0x28] ss:$16 sps:$4 sm:$0xff]   ;;  %v6063_v3 = vld [vmem:[#allocation8 + $0x4] ss:$16 sps:$4 sm:$0xff]  }
 0x26b   :  { %1804 = vmatpush1.bf16.msra.mxu0 %v7648_v62  ;;  %1847 = vmatpush1.bf16.msra.mxu1 %v7649_v59  ;;  %v6048_v62 = vld [vmem:[#allocation8 + $0x48] ss:$16 sps:$4 sm:$0xff]   ;;  %v6051_v59 = vld [vmem:[#allocation8 + $0x24] ss:$16 sps:$4 sm:$0xff]   ;;  %7673 = vst [vmem:[#allocation21_spill] sm:$0xff] %v6060_v61  ;;  %7674 = vst [vmem:[#allocation24_spill] sm:$0xff] %v6063_v3 }
 0x26c   :  { %1805 = vmatprep.subr.bf16.mxu0 %v7650_v56  ;;  %1848 = vmatprep.subr.bf16.mxu1 %v7651_v8  ;;  %7669 = vst [vmem:[#allocation17_spill] sm:$0xff] %v6048_v62  ;;  %7670 = vst [vmem:[#allocation20_spill] sm:$0xff] %v6051_v59  ;;  %v6054_v56 = vld [vmem:[#allocation8 + $0x2c] ss:$16 sps:$4 sm:$0xff]   ;;  %v6057_v8 = vld [vmem:[#allocation8 + $0x20] ss:$16 sps:$4 sm:$0xff]  }
 0x26d   :  { %7671 = vst [vmem:[#allocation19_spill] sm:$0xff] %v6054_v56  ;;  %7672 = vst [vmem:[#allocation22_spill] sm:$0xff] %v6057_v8  ;;  %v6078_v31 = vld [vmem:[#allocation12 + $0xec] ss:$16 sps:$4 sm:$0xff]   ;;  %v6083_v17 = vld [vmem:[#allocation12 + $0xe0] ss:$16 sps:$4 sm:$0xff]  }
 0x26e   :  { %7679 = vst [vmem:[#allocation27_spill] sm:$0xff] %v6078_v31  ;;  %7680 = vst [vmem:[#allocation29_spill] sm:$0xff] %v6083_v17 }
 0x26f   :  { %1806 = vmatpush1.bf16.msra.mxu0 %v7652_v4  ;;  %1849 = vmatpush1.bf16.msra.mxu1 %v7653_v29  ;;  %v6066_v4 = vld [vmem:[#allocation8 + $0xc] ss:$16 sps:$4 sm:$0xff]   ;;  %v6069_v29 = vld [vmem:[#allocation8] ss:$16 sps:$4 sm:$0xff]  }
 0x270   :  { %1807 = vmatprep.subr.bf16.mxu0 %v7654_v7  ;;  %1850 = vmatprep.subr.bf16.mxu1 %v7655_v9  ;;  %7675 = vst [vmem:[#allocation23_spill] sm:$0xff] %v6066_v4  ;;  %7676 = vst [vmem:[#allocation26_spill] sm:$0xff] %v6069_v29  ;;  %v6072_v7 = vld [vmem:[#allocation8 + $0x8] ss:$16 sps:$4 sm:$0xff]   ;;  %v6075_v9 = vld [vmem:[#allocation12 + $0xe4] ss:$16 sps:$4 sm:$0xff]  }
 0x271   :  { %7677 = vst [vmem:[#allocation25_spill] sm:$0xff] %v6072_v7  ;;  %7678 = vst [vmem:[#allocation28_spill] sm:$0xff] %v6075_v9 }
 0x273   :  { %1808 = vmatpush1.bf16.msra.mxu0 %v7656_v16  ;;  %1851 = vmatpush1.bf16.msra.mxu1 %v7657_v40  ;;  %v4659_v50 = vpop.eup %4658  ;;  %v6086_v16 = vld [vmem:[#allocation12 + $0xe8] ss:$16 sps:$4 sm:$0xff]   ;;  %v6089_v40 = vld [vmem:[#allocation12 + $0xc4] ss:$16 sps:$4 sm:$0xff]  }
 0x274   :  { %1809 = vmatprep.subr.bf16.mxu0 %v7658_v5  ;;  %1852 = vmatprep.subr.bf16.mxu1 %v7659_v10  ;;  %v1708_v36 = vmul.f32 %v4659_v50, %v1698_v6  ;;  %7681 = vst [vmem:[#allocation30_spill] sm:$0xff] %v6086_v16  ;;  %7682 = vst [vmem:[#allocation31_spill] sm:$0xff] %v6089_v40  ;;  %v6092_v5 = vld [vmem:[#allocation12 + $0xcc] ss:$16 sps:$4 sm:$0xff]   ;;  %v6097_v10 = vld [vmem:[#allocation12 + $0xc0] ss:$16 sps:$4 sm:$0xff]  }
 0x275   :  { %7683 = vst [vmem:[#allocation58_spill] sm:$0xff] %v6092_v5  ;;  %7684 = vst [vmem:[#allocation68_spill] sm:$0xff] %v6097_v10  ;;  %v6100_v50 = vld [vmem:[#allocation12 + $0xc8] ss:$16 sps:$4 sm:$0xff]   ;;  %v6103_v6 = vld [vmem:[#allocation12 + $0xa4] ss:$16 sps:$4 sm:$0xff]  }
 0x276   :  { %7685 = vst [vmem:[#allocation70_spill] sm:$0xff] %v6100_v50  ;;  %7686 = vst [vmem:[#allocation81_spill] sm:$0xff] %v6103_v6 }
 0x277   :  { %v4661_v34 = vpop.eup %4660  ;;  %1810 = vmatpush1.bf16.msra.mxu0 %v7660_v35  ;;  %1853 = vmatpush1.bf16.msra.mxu1 %v7661_v15  ;;  %v6112_v35 = vld [vmem:[#allocation12 + $0xa8] ss:$16 sps:$4 sm:$0xff]   ;;  %v6115_v15 = vld [vmem:[#allocation12 + $0x84] ss:$16 sps:$4 sm:$0xff]  }
 0x278   :  { %v1709_v37 = vmul.f32 %v4661_v34, %v1699_v33  ;;  %1811 = vmatprep.subr.bf16.mxu0 %v7662_v38  ;;  %1854 = vmatprep.subr.bf16.mxu1 %v7663_v39  ;;  %v6106_v33 = vld [vmem:[#allocation12 + $0xac] ss:$16 sps:$4 sm:$0xff]   ;;  %v6109_v34 = vld [vmem:[#allocation12 + $0xa0] ss:$16 sps:$4 sm:$0xff]   ;;  %7689 = vst [vmem:[#allocation85_spill] sm:$0xff] %v6112_v35  ;;  %7690 = vst [vmem:[#allocation86_spill] sm:$0xff] %v6115_v15 }
 0x279   :  { %7687 = vst [vmem:[#allocation74_spill] sm:$0xff] %v6106_v33  ;;  %7688 = vst [vmem:[#allocation72_spill] sm:$0xff] %v6109_v34  ;;  %v6124_v38 = vld [vmem:[#allocation12 + $0x88] ss:$16 sps:$4 sm:$0xff]   ;;  %v6127_v39 = vld [vmem:[#allocation12 + $0x64] ss:$16 sps:$4 sm:$0xff]  }
 0x27a   :  { %v5991_v41 = vpack.c.bf16 %v1709_v37, %v1708_v36  ;;  %v6118_v36 = vld [vmem:[#allocation12 + $0x8c] ss:$16 sps:$4 sm:$0xff]   ;;  %v6121_v37 = vld [vmem:[#allocation12 + $0x80] ss:$16 sps:$4 sm:$0xff]   ;;  %7693 = vst [vmem:[#allocation33_spill] sm:$0xff] %v6124_v38  ;;  %7694 = vst [vmem:[#allocation34_spill] sm:$0xff] %v6127_v39 }
 0x27b   :  { %1812 = vmatpush1.bf16.msra.mxu0 %v7664_v42  ;;  %1855 = vmatpush1.bf16.msra.mxu1 %v7665_v43  ;;  %7691 = vst [vmem:[#allocation83_spill] sm:$0xff] %v6118_v36  ;;  %7692 = vst [vmem:[#allocation32_spill] sm:$0xff] %v6121_v37  ;;  %v6133_v42 = vld [vmem:[#allocation12 + $0x60] ss:$16 sps:$4 sm:$0xff]   ;;  %v6136_v43 = vld [vmem:[#allocation12 + $0x68] ss:$16 sps:$4 sm:$0xff]  }
 0x27c   :  { %1939 = vmatprep.subr.bf16.mxu0 %v5995_v45  ;;  %1982 = vmatprep.subr.bf16.mxu1 %v5998_v47  ;;  %7696 = vst [vmem:[#allocation36_spill] sm:$0xff] %v6133_v42  ;;  %7697 = vst [vmem:[#allocation37_spill] sm:$0xff] %v6136_v43 }
 0x27e   :  { %1830 = vmatmul.mubr.bf16.vlgmr.msra.gmra.mxu0 %v5991_v41  ;;  %1873 = vmatmul.mubr.bf16.vlgmr.msra.gmra.mxu1 %v5991_v41 }
 0x27f   :  { %1940 = vmatpush1.bf16.msra.mxu0 %v5822_v19  ;;  %1983 = vmatpush1.bf16.msra.mxu1 %v6004_v48 }
 0x280   :  { %1941 = vmatprep.subr.bf16.mxu0 %v5826_v11  ;;  %1984 = vmatprep.subr.bf16.mxu1 %v6008_v49 }
 0x281   :  { %1971 = vmatprep.mubr.bf16.mxu0 %v7605_v26  ;;  %2014 = vmatprep.mubr.bf16.mxu1 %v7605_v26 }
 0x283   :  { %1942 = vmatpush1.bf16.msra.mxu0 %v5832_v20  ;;  %1985 = vmatpush1.bf16.msra.mxu1 %v6014_v52 }
 0x284   :  { %1943 = vmatprep.subr.bf16.mxu0 %v5836_v14  ;;  %1986 = vmatprep.subr.bf16.mxu1 %v6018_v53 }
 0x287   :  { %1944 = vmatpush1.bf16.msra.mxu0 %v5840_v24  ;;  %1987 = vmatpush1.bf16.msra.mxu1 %v6022_v54 }
 0x288   :  { %1945 = vmatprep.subr.bf16.mxu0 %v5844_v25  ;;  %1988 = vmatprep.subr.bf16.mxu1 %v6026_v55 }
 0x28b   :  { %1946 = vmatpush1.bf16.msra.mxu0 %v5848_v1  ;;  %1989 = vmatpush1.bf16.msra.mxu1 %v6030_v57 }
 0x28c   :  { %1947 = vmatprep.subr.bf16.mxu0 %v5852_v28  ;;  %1990 = vmatprep.subr.bf16.mxu1 %v6034_v58 }
 0x28f   :  { %1948 = vmatpush1.bf16.msra.mxu0 %v5856_v30  ;;  %1991 = vmatpush1.bf16.msra.mxu1 %v6038_v18 }
 0x290   :  { %1949 = vmatprep.subr.bf16.mxu0 %v5860_v32  ;;  %1992 = vmatprep.subr.bf16.mxu1 %v6042_v63 }
 0x293   :  { %1950 = vmatpush1.bf16.msra.mxu0 %v6045_v2  ;;  %1993 = vmatpush1.bf16.msra.mxu1 %v6048_v62 }
 0x294   :  { %1951 = vmatprep.subr.bf16.mxu0 %v6051_v59  ;;  %1994 = vmatprep.subr.bf16.mxu1 %v6054_v56 }
 0x297   :  { %1952 = vmatpush1.bf16.msra.mxu0 %v6057_v8  ;;  %1995 = vmatpush1.bf16.msra.mxu1 %v6060_v61 }
 0x298   :  { %1953 = vmatprep.subr.bf16.mxu0 %v6063_v3  ;;  %1996 = vmatprep.subr.bf16.mxu1 %v6066_v4 }
 0x29b   :  { %1954 = vmatpush1.bf16.msra.mxu0 %v6069_v29  ;;  %1997 = vmatpush1.bf16.msra.mxu1 %v6072_v7 }
 0x29c   :  { %2072 = vmatprep.subr.bf16.mxu0 %v6075_v9  ;;  %2115 = vmatprep.subr.bf16.mxu1 %v6078_v31 }
 0x29e   :  { %1972 = vmatmul.mubr.bf16.vlgmr.msra.gmra.mxu0 %v5991_v41  ;;  %2015 = vmatmul.mubr.bf16.vlgmr.msra.gmra.mxu1 %v5991_v41  ;;  %v6130_v41 = vld [vmem:[#allocation12 + $0x6c] ss:$16 sps:$4 sm:$0xff]  }
 0x29f   :  { %2073 = vmatpush1.bf16.msra.mxu0 %v6083_v17  ;;  %2116 = vmatpush1.bf16.msra.mxu1 %v6086_v16  ;;  %7695 = vst [vmem:[#allocation35_spill] sm:$0xff] %v6130_v41 }
 0x2a0   :  { %2074 = vmatprep.subr.bf16.mxu0 %v6089_v40  ;;  %2117 = vmatprep.subr.bf16.mxu1 %v6092_v5 }
 0x2a1   :  { %2104 = vmatprep.mubr.bf16.mxu0 %v7605_v26  ;;  %2147 = vmatprep.mubr.bf16.mxu1 %v7605_v26 }
 0x2a3   :  { %2075 = vmatpush1.bf16.msra.mxu0 %v6097_v10  ;;  %2118 = vmatpush1.bf16.msra.mxu1 %v6100_v50 }
 0x2a4   :  { %2076 = vmatprep.subr.bf16.mxu0 %v6103_v6  ;;  %2119 = vmatprep.subr.bf16.mxu1 %v6106_v33 }
 0x2a7   :  { %2077 = vmatpush1.bf16.msra.mxu0 %v6109_v34  ;;  %2120 = vmatpush1.bf16.msra.mxu1 %v6112_v35 }
 0x2a8   :  { %2078 = vmatprep.subr.bf16.mxu0 %v6115_v15  ;;  %2121 = vmatprep.subr.bf16.mxu1 %v6118_v36 }
 0x2ab   :  { %2079 = vmatpush1.bf16.msra.mxu0 %v6121_v37  ;;  %2122 = vmatpush1.bf16.msra.mxu1 %v6124_v38  ;;  %v6142_v38 = vld [vmem:[#allocation12 + $0x4c] ss:$16 sps:$4 sm:$0xff]  }
 0x2ac   :  { %2080 = vmatprep.subr.bf16.mxu0 %v6127_v39  ;;  %2123 = vmatprep.subr.bf16.mxu1 %v6130_v41  ;;  %7699 = vst [vmem:[#allocation39_spill] sm:$0xff] %v6142_v38  ;;  %v6145_v39 = vld [vmem:[#allocation12 + $0x40] ss:$16 sps:$4 sm:$0xff]   ;;  %v6148_v41 = vld [vmem:[#allocation12 + $0x48] ss:$16 sps:$4 sm:$0xff]  }
 0x2ad   :  { %7700 = vst [vmem:[#allocation40_spill] sm:$0xff] %v6145_v39  ;;  %7701 = vst [vmem:[#allocation41_spill] sm:$0xff] %v6148_v41 }
 0x2af   :  { %2081 = vmatpush1.bf16.msra.mxu0 %v6133_v42  ;;  %2124 = vmatpush1.bf16.msra.mxu1 %v6136_v43  ;;  %v6151_v42 = vld [vmem:[#allocation12 + $0x24] ss:$16 sps:$4 sm:$0xff]   ;;  %v6154_v43 = vld [vmem:[#allocation12 + $0x2c] ss:$16 sps:$4 sm:$0xff]  }
 0x2b0   :  { %2082 = vmatprep.subr.bf16.mxu0 %v6139_v21  ;;  %2125 = vmatprep.subr.bf16.mxu1 %v6142_v38  ;;  %7702 = vst [vmem:[#allocation42_spill] sm:$0xff] %v6151_v42  ;;  %7703 = vst [vmem:[#allocation43_spill] sm:$0xff] %v6154_v43  ;;  %v6157_v21 = vld [vmem:[#allocation12 + $0x20] ss:$16 sps:$4 sm:$0xff]   ;;  %v6160_v38 = vld [vmem:[#allocation12 + $0x28] ss:$16 sps:$4 sm:$0xff]  }
 0x2b1   :  { %7704 = vst [vmem:[#allocation44_spill] sm:$0xff] %v6157_v21  ;;  %7705 = vst [vmem:[#allocation45_spill] sm:$0xff] %v6160_v38 }
 0x2b3   :  { %2083 = vmatpush1.bf16.msra.mxu0 %v6145_v39  ;;  %2126 = vmatpush1.bf16.msra.mxu1 %v6148_v41  ;;  %v6163_v39 = vld [vmem:[#allocation12 + $0x4] ss:$16 sps:$4 sm:$0xff]   ;;  %v6166_v41 = vld [vmem:[#allocation12 + $0xc] ss:$16 sps:$4 sm:$0xff]  }
 0x2b4   :  { %2084 = vmatprep.subr.bf16.mxu0 %v6151_v42  ;;  %2127 = vmatprep.subr.bf16.mxu1 %v6154_v43  ;;  %7706 = vst [vmem:[#allocation46_spill] sm:$0xff] %v6163_v39  ;;  %7707 = vst [vmem:[#allocation47_spill] sm:$0xff] %v6166_v41  ;;  %v6169_v42 = vld [vmem:[#allocation12] ss:$16 sps:$4 sm:$0xff]   ;;  %v6172_v43 = vld [vmem:[#allocation12 + $0x8] ss:$16 sps:$4 sm:$0xff]  }
 0x2b5   :  { %7708 = vst [vmem:[#allocation48_spill] sm:$0xff] %v6169_v42  ;;  %7709 = vst [vmem:[#allocation49_spill] sm:$0xff] %v6172_v43 }
 0x2b7   :  { %2085 = vmatpush1.bf16.msra.mxu0 %v6157_v21  ;;  %2128 = vmatpush1.bf16.msra.mxu1 %v6160_v38  ;;  %v6175_v21 = vld [vmem:[#allocation10 + $0xe4] ss:$16 sps:$4 sm:$0xff]   ;;  %v6178_v38 = vld [vmem:[#allocation10 + $0xec] ss:$16 sps:$4 sm:$0xff]  }
 0x2b8   :  { %2086 = vmatprep.subr.bf16.mxu0 %v6163_v39  ;;  %2129 = vmatprep.subr.bf16.mxu1 %v6166_v41  ;;  %7710 = vst [vmem:[#allocation50_spill] sm:$0xff] %v6175_v21  ;;  %7711 = vst [vmem:[#allocation51_spill] sm:$0xff] %v6178_v38 }
 0x2bb   :  { %2087 = vmatpush1.bf16.msra.mxu0 %v6169_v42  ;;  %2130 = vmatpush1.bf16.msra.mxu1 %v6172_v43 }
 0x2bc   :  { %2158 = vmatprep.subr.bf16.mxu0 %v6175_v21  ;;  %2201 = vmatprep.subr.bf16.mxu1 %v6178_v38 }
 0x31e   :  { %v1745_v39 = vpop.f32.mrf.mxu0  ;;  %v1788_v37 = vpop.f32.mrf.mxu1 }
 0x320   :  { %v1747_v36 = vpop.f32.mrf.mxu0  ;;  %v1790_v41 = vpop.f32.mrf.mxu1 }
 0x322   :  { %v1749_v15 = vpop.f32.mrf.mxu0  ;;  %v1792_v35 = vpop.f32.mrf.mxu1 }
 0x324   :  { %v1751_v34 = vpop.f32.mrf.mxu0  ;;  %v1794_v42 = vpop.f32.mrf.mxu1 }
 0x33e   :  { %v1831_v33 = vpop.f32.mrf.mxu0  ;;  %v1874_v6 = vpop.f32.mrf.mxu1 }
 0x33f   :  { %v1832_v50 = vadd.f32 %v1831_v33, %v1745_v39  ;;  %v1875_v21 = vadd.f32 %v1874_v6, %v1788_v37 }
 0x340   :  { %v1833_v43 = vpop.f32.mrf.mxu0  ;;  %v1876_v10 = vpop.f32.mrf.mxu1 }
 0x341   :  { %v1883_v5 = vadd.f32 %v1832_v50, %v5915_v0  ;;  %v1834_v40 = vadd.f32 %v1833_v43, %v1747_v36  ;;  %v1885_v29 = vadd.f32 %v1875_v21, %v5924_v23 }
 0x342   :  { %v1835_v16 = vpop.f32.mrf.mxu0  ;;  %v1878_v9 = vpop.f32.mrf.mxu1 }
 0x343   :  { %v1891_v17 = vmul.f32 0.5, %v1883_v5  ;;  %v1884_v38 = vadd.f32 %v1834_v40, %v5919_v12  ;;  %v1836_v31 = vadd.f32 %v1835_v16, %v1749_v15  ;;  %v1879_v39 = vadd.f32 %v1878_v9, %v1792_v35 }
 0x344   :  { %v1837_v7 = vpop.f32.mrf.mxu0  ;;  %v1880_v5 = vpop.f32.mrf.mxu1  ;;  %v1877_v40 = vadd.f32 %v1876_v10, %v1790_v41 }
 0x345   :  { %4662 = vtanh.f32 %v1891_v17  ;;  %v1892_v4 = vmul.f32 0.5, %v1884_v38  ;;  %v1838_v3 = vadd.f32 %v1837_v7, %v1751_v34  ;;  %v1887_v33 = vadd.f32 %v1836_v31, %v5915_v0 }
 0x346   :  { %v1889_v16 = vadd.f32 %v1879_v39, %v5924_v23  ;;  %v1881_v17 = vadd.f32 %v1880_v5, %v1794_v42  ;;  %v1886_v21 = vadd.f32 %v1877_v40, %v5933_v44 }
 0x347   :  { %4664 = vtanh.f32 %v1892_v4  ;;  %v1888_v50 = vadd.f32 %v1838_v3, %v5919_v12  ;;  %v1895_v6 = vmul.f32 0.5, %v1887_v33 }
 0x348   :  { %4666 = vtanh.f32 %v1885_v29  ;;  %v1890_v7 = vadd.f32 %v1881_v17, %v5933_v44  ;;  %v1894_v34 = vmul.f32 0.5, %v1886_v21 }
 0x349   :  { %v1896_v36 = vmul.f32 0.5, %v1888_v50  ;;  %4668 = vtanh.f32 %v1895_v6 }
 0x34a   :  { %v1898_v29 = vmul.f32 0.5, %v1890_v7  ;;  %v7712_v7 = vld [vmem:[#allocation76_spill] sm:$0xff] }
 0x34b   :  { %4670 = vtanh.f32 %v1896_v36 }
 0x34c   :  { %4672 = vtanh.f32 %v1889_v16 }
 0x34d   :  { %4674 = vtanh.f32 %v1894_v34  ;;  %v7713_v34 = vld [vmem:[#allocation77_spill] sm:$0xff] }
 0x34e   :  { %4676 = vtanh.f32 %v1898_v29 }
 0x352   :  { %v4663_v31 = vpop.eup %4662 }
 0x353   :  { %v1907_v4 = vmul.f32 0.5, %v4663_v31 }
 0x354   :  { %v4665_v9 = vpop.eup %4664 }
 0x355   :  { %v1909_v3 = vadd.f32 0.5, %v1907_v4  ;;  %v1911_v35 = vmul.f32 0.5, %v4665_v9  ;;  %v4667_v15 = vpop.eup %4666 }
 0x356   :  { %v4669_v37 = vpop.eup %4668 }
 0x357   :  { %v1913_v38 = vadd.f32 0.5, %v1911_v35  ;;  %v1908_v33 = vmul.f32 0.5, %v4669_v37  ;;  %v1921_v41 = vmul.f32 %v4667_v15, %v1909_v3  ;;  %v7714_v35 = vld [vmem:[#allocation89_spill] sm:$0xff] }
 0x358   :  { %v4671_v43 = vpop.eup %4670 }
 0x359   :  { %v1919_v10 = vmul.f32 %v1913_v38, %v5937_v27  ;;  %v1912_v42 = vmul.f32 0.5, %v4671_v43  ;;  %v1910_v39 = vadd.f32 0.5, %v1908_v33  ;;  %v4673_v36 = vpop.eup %4672  ;;  %v7716_v43 = vld [vmem:[#allocation78_spill] sm:$0xff] }
 0x35b   :  { %v6190_v50 = vadd.f32 %v1921_v41, %v1919_v10  ;;  %v1914_v6 = vadd.f32 0.5, %v1912_v42  ;;  %v1922_v16 = vmul.f32 %v4673_v36, %v1910_v39  ;;  %v4675_v42 = vpop.eup %4674 }
 0x35c   :  { %v4677_v36 = vpop.eup %4676 }
 0x35d   :  { %v1920_v5 = vmul.f32 %v1914_v6, %v5940_v22  ;;  %4678 = vtanh.f32 %v6190_v50  ;;  %v7715_v22 = vld [vmem:[#allocation79_spill] sm:$0xff] }
 0x35e   :  { %v1973_v40 = vpop.f32.mrf.mxu0  ;;  %v2016_v17 = vpop.f32.mrf.mxu1  ;;  %v463_v37 = vadd.f32 %v5611_v46, %v7715_v22  ;;  %v7719_v22 = vld [vmem:[#allocation91_spill] sm:$0xff]  ;;  %v6280_v46 = vld [vmem:[#allocation10 + $0x48] ss:$16 sps:$4 sm:$0xff]  }
 0x35f   :  { %v6194_v21 = vadd.f32 %v1922_v16, %v1920_v5  ;;  %v2025_v31 = vadd.f32 %v1973_v40, %v7712_v7  ;;  %v2027_v29 = vadd.f32 %v2016_v17, %v7714_v35  ;;  %v7717_v5 = vld [vmem:[#allocation93_spill] sm:$0xff]  ;;  %v1915_v17 = vmul.f32 0.5, %v4675_v42  ;;  %7728 = vst [vmem:[#allocation61_spill] sm:$0xff] %v6280_v46 }
 0x360   :  { %v1975_v27 = vpop.f32.mrf.mxu0  ;;  %v2018_v4 = vpop.f32.mrf.mxu1  ;;  %v1916_v7 = vmul.f32 0.5, %v4677_v36 }
 0x361   :  { %4680 = vtanh.f32 %v6194_v21  ;;  %v2033_v9 = vmul.f32 0.5, %v2025_v31  ;;  %v2026_v3 = vadd.f32 %v1975_v27, %v7713_v34 }
 0x362   :  { %v1977_v15 = vpop.f32.mrf.mxu0  ;;  %v2020_v10 = vpop.f32.mrf.mxu1  ;;  %v1918_v35 = vadd.f32 0.5, %v1916_v7 }
 0x363   :  { %4682 = vtanh.f32 %v2033_v9  ;;  %v2034_v38 = vmul.f32 0.5, %v2026_v3  ;;  %v2029_v33 = vadd.f32 %v1977_v15, %v7716_v43  ;;  %v2031_v16 = vadd.f32 %v2020_v10, %v7717_v5  ;;  %v7718_v9 = vld [vmem:[#allocation94_spill] sm:$0xff] }
 0x364   :  { %v1979_v41 = vpop.f32.mrf.mxu0  ;;  %v2022_v27 = vpop.f32.mrf.mxu1  ;;  %v465_v34 = vadd.f32 %v5681_v13, %v7718_v9  ;;  %v1917_v3 = vadd.f32 0.5, %v1915_v17  ;;  %v6207_v17 = vld [vmem:[#allocation10 + $0xe0] ss:$16 sps:$4 sm:$0xff]   ;;  %v6213_v9 = vld [vmem:[#allocation10 + $0xc4] ss:$16 sps:$4 sm:$0xff]  }
 0x365   :  { %4684 = vtanh.f32 %v2034_v38  ;;  %v2037_v39 = vmul.f32 0.5, %v2029_v33  ;;  %v2030_v6 = vadd.f32 %v1979_v41, %v463_v37  ;;  %v2028_v37 = vadd.f32 %v2018_v4, %v7719_v22  ;;  %v6210_v4 = vld [vmem:[#allocation10 + $0xe8] ss:$16 sps:$4 sm:$0xff]  }
 0x366   :  { %4686 = vtanh.f32 %v2027_v29  ;;  %v2032_v38 = vadd.f32 %v2022_v27, %v465_v34  ;;  %v6216_v34 = vld [vmem:[#allocation10 + $0xcc] ss:$16 sps:$4 sm:$0xff]  }
 0x367   :  { %4688 = vtanh.f32 %v2037_v39  ;;  %v2038_v40 = vmul.f32 0.5, %v2030_v6  ;;  %v2036_v39 = vmul.f32 0.5, %v2028_v37 }
 0x369   :  { %4690 = vtanh.f32 %v2038_v40 }
 0x36a   :  { %4692 = vtanh.f32 %v2031_v16  ;;  %v4679_v31 = vpop.eup %4678  ;;  %v2040_v16 = vmul.f32 0.5, %v2032_v38  ;;  %v6222_v38 = vld [vmem:[#allocation10 + $0xc0] ss:$16 sps:$4 sm:$0xff]  }
 0x36b   :  { %v1927_v29 = vmul.f32 %v4679_v31, %v1917_v3  ;;  %4694 = vtanh.f32 %v2036_v39  ;;  %v6237_v39 = vld [vmem:[#allocation10 + $0xa0] ss:$16 sps:$4 sm:$0xff]  }
 0x36c   :  { %4696 = vtanh.f32 %v2040_v16  ;;  %v6249_v16 = vld [vmem:[#allocation10 + $0x8c] ss:$16 sps:$4 sm:$0xff]  }
 0x36e   :  { %v4681_v15 = vpop.eup %4680 }
 0x36f   :  { %v1928_v43 = vmul.f32 %v4681_v15, %v1918_v35 }
 0x370   :  { %v4683_v33 = vpop.eup %4682 }
 0x371   :  { %v2049_v10 = vmul.f32 0.5, %v4683_v33  ;;  %v1929_v41 = vpack.c.bf16 %v1928_v43, %v1927_v29  ;;  %v6225_v29 = vld [vmem:[#allocation10 + $0xc8] ss:$16 sps:$4 sm:$0xff]  }
 0x372   :  { %v4685_v42 = vpop.eup %4684 }
 0x373   :  { %v4687_v6 = vpop.eup %4686  ;;  %v2051_v36 = vadd.f32 0.5, %v2049_v10  ;;  %v2053_v5 = vmul.f32 0.5, %v4685_v42  ;;  %2105 = vmatmul.mubr.bf16.vlgmr.msra.gmra.mxu0 %v1929_v41  ;;  %2148 = vmatmul.mubr.bf16.vlgmr.msra.gmra.mxu1 %v1929_v41  ;;  %v6230_v41 = vld [vmem:[#allocation10 + $0xa4] ss:$16 sps:$4 sm:$0xff]  }
 0x374   :  { %v4689_v40 = vpop.eup %4688  ;;  %2159 = vmatpush1.bf16.msra.mxu0 %v6207_v17  ;;  %2202 = vmatpush1.bf16.msra.mxu1 %v6210_v4 }
 0x375   :  { %v2055_v7 = vadd.f32 0.5, %v2053_v5  ;;  %v2063_v31 = vmul.f32 %v4687_v6, %v2051_v36  ;;  %v2050_v27 = vmul.f32 0.5, %v4689_v40  ;;  %2160 = vmatprep.subr.bf16.mxu0 %v6213_v9  ;;  %2203 = vmatprep.subr.bf16.mxu1 %v6216_v34  ;;  %v6240_v6 = vld [vmem:[#allocation10 + $0xa8] ss:$16 sps:$4 sm:$0xff]   ;;  %v6246_v5 = vld [vmem:[#allocation10 + $0x84] ss:$16 sps:$4 sm:$0xff]  }
 0x376   :  { %v4691_v3 = vpop.eup %4690  ;;  %2190 = vmatprep.mubr.bf16.mxu0 %v7605_v26  ;;  %2233 = vmatprep.mubr.bf16.mxu1 %v7605_v26  ;;  %v6256_v40 = vld [vmem:[#allocation10 + $0x88] ss:$16 sps:$4 sm:$0xff]  }
 0x377   :  { %v2061_v35 = vmul.f32 %v2055_v7, %v5962_v51  ;;  %v2052_v15 = vadd.f32 0.5, %v2050_v27  ;;  %v2054_v22 = vmul.f32 0.5, %v4691_v3  ;;  %v4693_v37 = vpop.eup %4692  ;;  %v6233_v51 = vld [vmem:[#allocation10 + $0xac] ss:$16 sps:$4 sm:$0xff]   ;;  %7720 = vst [vmem:[#allocation52_spill] sm:$0xff] %v6256_v40 }
 0x378   :  { %2161 = vmatpush1.bf16.msra.mxu0 %v6222_v38  ;;  %2204 = vmatpush1.bf16.msra.mxu1 %v6225_v29  ;;  %v6259_v7 = vld [vmem:[#allocation10 + $0x64] ss:$16 sps:$4 sm:$0xff]   ;;  %v4695_v27 = vpop.eup %4694 }
 0x379   :  { %v6228_v43 = vadd.f32 %v2063_v31, %v2061_v35  ;;  %v2056_v33 = vadd.f32 0.5, %v2054_v22  ;;  %v2064_v10 = vmul.f32 %v4693_v37, %v2052_v15  ;;  %2162 = vmatprep.subr.bf16.mxu0 %v6230_v41  ;;  %2205 = vmatprep.subr.bf16.mxu1 %v6233_v51  ;;  %7721 = vst [vmem:[#allocation53_spill] sm:$0xff] %v6259_v7  ;;  %v6262_v31 = vld [vmem:[#allocation10 + $0x6c] ss:$16 sps:$4 sm:$0xff]   ;;  %v4697_v3 = vpop.eup %4696  ;;  %v6265_v35 = vld [vmem:[#allocation10 + $0x60] ss:$16 sps:$4 sm:$0xff]  }
 0x37a   :  { %7722 = vst [vmem:[#allocation54_spill] sm:$0xff] %v6262_v31  ;;  %7723 = vst [vmem:[#allocation55_spill] sm:$0xff] %v6265_v35  ;;  %v6268_v15 = vld [vmem:[#allocation10 + $0x68] ss:$16 sps:$4 sm:$0xff]   ;;  %v6271_v22 = vld [vmem:[#allocation10 + $0x44] ss:$16 sps:$4 sm:$0xff]  }
 0x37b   :  { %v2062_v42 = vmul.f32 %v2056_v33, %v5970_v60  ;;  %4698 = vtanh.f32 %v6228_v43  ;;  %v6253_v60 = vld [vmem:[#allocation10 + $0x80] ss:$16 sps:$4 sm:$0xff]   ;;  %7724 = vst [vmem:[#allocation56_spill] sm:$0xff] %v6268_v15  ;;  %7725 = vst [vmem:[#allocation57_spill] sm:$0xff] %v6271_v22  ;;  %v6274_v37 = vld [vmem:[#allocation10 + $0x4c] ss:$16 sps:$4 sm:$0xff]  }
 0x37c   :  { %2163 = vmatpush1.bf16.msra.mxu0 %v6237_v39  ;;  %2206 = vmatpush1.bf16.msra.mxu1 %v6240_v6  ;;  %7726 = vst [vmem:[#allocation59_spill] sm:$0xff] %v6274_v37  ;;  %v2057_v33 = vmul.f32 0.5, %v4695_v27 }
 0x37d   :  { %v6244_v36 = vadd.f32 %v2064_v10, %v2062_v42  ;;  %2164 = vmatprep.subr.bf16.mxu0 %v6246_v5  ;;  %2207 = vmatprep.subr.bf16.mxu1 %v6249_v16  ;;  %v2058_v10 = vmul.f32 0.5, %v4697_v3  ;;  %v6277_v42 = vld [vmem:[#allocation10 + $0x40] ss:$16 sps:$4 sm:$0xff]  }
 0x37e   :  { %7727 = vst [vmem:[#allocation60_spill] sm:$0xff] %v6277_v42 }
 0x37f   :  { %4700 = vtanh.f32 %v6244_v36  ;;  %v2060_v27 = vadd.f32 0.5, %v2058_v10  ;;  %v6301_v10 = vld [vmem:[#allocation10] ss:$16 sps:$4 sm:$0xff]  }
 0x380   :  { %2165 = vmatpush1.bf16.msra.mxu0 %v6253_v60  ;;  %2208 = vmatpush1.bf16.msra.mxu1 %v6256_v40  ;;  %v6295_v40 = vld [vmem:[#allocation10 + $0x4] ss:$16 sps:$4 sm:$0xff]  }
 0x381   :  { %2166 = vmatprep.subr.bf16.mxu0 %v6259_v7  ;;  %2209 = vmatprep.subr.bf16.mxu1 %v6262_v31  ;;  %v6289_v31 = vld [vmem:[#allocation10 + $0x20] ss:$16 sps:$4 sm:$0xff]  }
 0x382   :  { %7730 = vst [vmem:[#allocation76_spill] sm:$0xff] %v6289_v31 }
 0x384   :  { %2167 = vmatpush1.bf16.msra.mxu0 %v6265_v35  ;;  %2210 = vmatpush1.bf16.msra.mxu1 %v6268_v15  ;;  %v6283_v35 = vld [vmem:[#allocation10 + $0x24] ss:$16 sps:$4 sm:$0xff]   ;;  %v6286_v15 = vld [vmem:[#allocation10 + $0x2c] ss:$16 sps:$4 sm:$0xff]  }
 0x385   :  { %2168 = vmatprep.subr.bf16.mxu0 %v6271_v22  ;;  %2211 = vmatprep.subr.bf16.mxu1 %v6274_v37  ;;  %7729 = vst [vmem:[#allocation62_spill] sm:$0xff] %v6283_v35  ;;  %v2059_v37 = vadd.f32 0.5, %v2057_v33 }
 0x388   :  { %2169 = vmatpush1.bf16.msra.mxu0 %v6277_v42  ;;  %2212 = vmatpush1.bf16.msra.mxu1 %v6280_v46  ;;  %v4699_v22 = vpop.eup %4698  ;;  %v6292_v42 = vld [vmem:[#allocation10 + $0x28] ss:$16 sps:$4 sm:$0xff]  }
 0x389   :  { %2170 = vmatprep.subr.bf16.mxu0 %v6283_v35  ;;  %2213 = vmatprep.subr.bf16.mxu1 %v6286_v15  ;;  %v2069_v46 = vmul.f32 %v4699_v22, %v2059_v37  ;;  %v6298_v35 = vld [vmem:[#allocation10 + $0xc] ss:$16 sps:$4 sm:$0xff]   ;;  %v7743_v22 = vld [vmem:[#allocation81_spill] sm:$0xff] }
 0x38a   :  { %v7744_v37 = vld [vmem:[#allocation74_spill] sm:$0xff] }
 0x38c   :  { %v4701_v3 = vpop.eup %4700  ;;  %2171 = vmatpush1.bf16.msra.mxu0 %v6289_v31  ;;  %2214 = vmatpush1.bf16.msra.mxu1 %v6292_v42  ;;  %v6304_v31 = vld [vmem:[#allocation10 + $0x8] ss:$16 sps:$4 sm:$0xff]  }
 0x38d   :  { %v2070_v7 = vmul.f32 %v4701_v3, %v2060_v27  ;;  %2172 = vmatprep.subr.bf16.mxu0 %v6295_v40  ;;  %2215 = vmatprep.subr.bf16.mxu1 %v6298_v35  ;;  %v7745_v27 = vld [vmem:[#allocation72_spill] sm:$0xff]  ;;  %v7746_v3 = vld [vmem:[#allocation85_spill] sm:$0xff] }
 0x38f   :  { %v2071_v33 = vpack.c.bf16 %v2070_v7, %v2069_v46  ;;  %v7731_v46 = vld [vmem:[#allocation24_spill] sm:$0xff]  ;;  %v7742_v7 = vld [vmem:[#allocation70_spill] sm:$0xff] }
 0x390   :  { %2173 = vmatpush1.bf16.msra.mxu0 %v6301_v10  ;;  %2216 = vmatpush1.bf16.msra.mxu1 %v6304_v31 }
 0x391   :  { %2300 = vmatprep.subr.bf16.mxu0 %v5995_v45  ;;  %2343 = vmatprep.subr.bf16.mxu1 %v5998_v47 }
 0x393   :  { %2191 = vmatmul.mubr.bf16.vlgmr.msra.gmra.mxu0 %v2071_v33  ;;  %2234 = vmatmul.mubr.bf16.vlgmr.msra.gmra.mxu1 %v2071_v33 }
 0x394   :  { %2301 = vmatpush1.bf16.msra.mxu0 %v5822_v19  ;;  %2344 = vmatpush1.bf16.msra.mxu1 %v6004_v48  ;;  %v7732_v19 = vld [vmem:[#allocation23_spill] sm:$0xff] }
 0x395   :  { %2302 = vmatprep.subr.bf16.mxu0 %v5826_v11  ;;  %2345 = vmatprep.subr.bf16.mxu1 %v6008_v49  ;;  %v7733_v11 = vld [vmem:[#allocation26_spill] sm:$0xff] }
 0x396   :  { %2332 = vmatprep.mubr.bf16.mxu0 %v7605_v26  ;;  %2375 = vmatprep.mubr.bf16.mxu1 %v7605_v26 }
 0x398   :  { %2303 = vmatpush1.bf16.msra.mxu0 %v5832_v20  ;;  %2346 = vmatpush1.bf16.msra.mxu1 %v6014_v52  ;;  %v7734_v20 = vld [vmem:[#allocation25_spill] sm:$0xff] }
 0x399   :  { %2304 = vmatprep.subr.bf16.mxu0 %v5836_v14  ;;  %2347 = vmatprep.subr.bf16.mxu1 %v6018_v53  ;;  %v7735_v14 = vld [vmem:[#allocation28_spill] sm:$0xff] }
 0x39c   :  { %2305 = vmatpush1.bf16.msra.mxu0 %v5840_v24  ;;  %2348 = vmatpush1.bf16.msra.mxu1 %v6022_v54  ;;  %v7736_v24 = vld [vmem:[#allocation27_spill] sm:$0xff] }
 0x39d   :  { %2306 = vmatprep.subr.bf16.mxu0 %v5844_v25  ;;  %2349 = vmatprep.subr.bf16.mxu1 %v6026_v55  ;;  %v7737_v25 = vld [vmem:[#allocation29_spill] sm:$0xff] }
 0x3a0   :  { %2307 = vmatpush1.bf16.msra.mxu0 %v5848_v1  ;;  %2350 = vmatpush1.bf16.msra.mxu1 %v6030_v57  ;;  %v7738_v1 = vld [vmem:[#allocation30_spill] sm:$0xff] }
 0x3a1   :  { %2308 = vmatprep.subr.bf16.mxu0 %v5852_v28  ;;  %2351 = vmatprep.subr.bf16.mxu1 %v6034_v58  ;;  %v7739_v28 = vld [vmem:[#allocation31_spill] sm:$0xff] }
 0x3a4   :  { %2309 = vmatpush1.bf16.msra.mxu0 %v5856_v30  ;;  %2352 = vmatpush1.bf16.msra.mxu1 %v6038_v18  ;;  %v7740_v30 = vld [vmem:[#allocation58_spill] sm:$0xff] }
 0x3a5   :  { %2310 = vmatprep.subr.bf16.mxu0 %v5860_v32  ;;  %2353 = vmatprep.subr.bf16.mxu1 %v6042_v63  ;;  %v7741_v32 = vld [vmem:[#allocation68_spill] sm:$0xff] }
 0x3a8   :  { %2311 = vmatpush1.bf16.msra.mxu0 %v6045_v2  ;;  %2354 = vmatpush1.bf16.msra.mxu1 %v6048_v62 }
 0x3a9   :  { %2312 = vmatprep.subr.bf16.mxu0 %v6051_v59  ;;  %2355 = vmatprep.subr.bf16.mxu1 %v6054_v56 }
 0x3ac   :  { %2313 = vmatpush1.bf16.msra.mxu0 %v6057_v8  ;;  %2356 = vmatpush1.bf16.msra.mxu1 %v6060_v61 }
 0x3ad   :  { %2314 = vmatprep.subr.bf16.mxu0 %v7731_v46  ;;  %2357 = vmatprep.subr.bf16.mxu1 %v7732_v19 }
 0x3b0   :  { %2315 = vmatpush1.bf16.msra.mxu0 %v7733_v11  ;;  %2358 = vmatpush1.bf16.msra.mxu1 %v7734_v20 }
 0x3b1   :  { %2433 = vmatprep.subr.bf16.mxu0 %v7735_v14  ;;  %2476 = vmatprep.subr.bf16.mxu1 %v7736_v24 }
 0x3b3   :  { %2333 = vmatmul.mubr.bf16.vlgmr.msra.gmra.mxu0 %v2071_v33  ;;  %2376 = vmatmul.mubr.bf16.vlgmr.msra.gmra.mxu1 %v2071_v33  ;;  %v7747_v33 = vld [vmem:[#allocation86_spill] sm:$0xff] }
 0x3b4   :  { %2434 = vmatpush1.bf16.msra.mxu0 %v7737_v25  ;;  %2477 = vmatpush1.bf16.msra.mxu1 %v7738_v1  ;;  %v7750_v1 = vld [vmem:[#allocation33_spill] sm:$0xff]  ;;  %v7751_v25 = vld [vmem:[#allocation34_spill] sm:$0xff] }
 0x3b5   :  { %2435 = vmatprep.subr.bf16.mxu0 %v7739_v28  ;;  %2478 = vmatprep.subr.bf16.mxu1 %v7740_v30  ;;  %v7748_v28 = vld [vmem:[#allocation83_spill] sm:$0xff]  ;;  %v7749_v30 = vld [vmem:[#allocation32_spill] sm:$0xff] }
 0x3b6   :  { %2465 = vmatprep.mubr.bf16.mxu0 %v7605_v26  ;;  %2508 = vmatprep.mubr.bf16.mxu1 %v7605_v26 }
 0x3b8   :  { %2436 = vmatpush1.bf16.msra.mxu0 %v7741_v32  ;;  %2479 = vmatpush1.bf16.msra.mxu1 %v7742_v7  ;;  %v7752_v32 = vld [vmem:[#allocation35_spill] sm:$0xff]  ;;  %v7753_v7 = vld [vmem:[#allocation36_spill] sm:$0xff] }
 0x3b9   :  { %2437 = vmatprep.subr.bf16.mxu0 %v7743_v22  ;;  %2480 = vmatprep.subr.bf16.mxu1 %v7744_v37  ;;  %v7754_v22 = vld [vmem:[#allocation37_spill] sm:$0xff]  ;;  %v7755_v37 = vld [vmem:[#allocation38_spill] sm:$0xff] }
 0x3bc   :  { %2438 = vmatpush1.bf16.msra.mxu0 %v7745_v27  ;;  %2481 = vmatpush1.bf16.msra.mxu1 %v7746_v3  ;;  %v7756_v27 = vld [vmem:[#allocation39_spill] sm:$0xff]  ;;  %v7757_v3 = vld [vmem:[#allocation40_spill] sm:$0xff] }
 0x3bd   :  { %2439 = vmatprep.subr.bf16.mxu0 %v7747_v33  ;;  %2482 = vmatprep.subr.bf16.mxu1 %v7748_v28  ;;  %v7758_v33 = vld [vmem:[#allocation41_spill] sm:$0xff]  ;;  %v7759_v28 = vld [vmem:[#allocation42_spill] sm:$0xff] }
 0x3c0   :  { %2440 = vmatpush1.bf16.msra.mxu0 %v7749_v30  ;;  %2483 = vmatpush1.bf16.msra.mxu1 %v7750_v1  ;;  %v7760_v30 = vld [vmem:[#allocation43_spill] sm:$0xff]  ;;  %v7761_v1 = vld [vmem:[#allocation44_spill] sm:$0xff] }
 0x3c1   :  { %2441 = vmatprep.subr.bf16.mxu0 %v7751_v25  ;;  %2484 = vmatprep.subr.bf16.mxu1 %v7752_v32  ;;  %v7762_v25 = vld [vmem:[#allocation45_spill] sm:$0xff]  ;;  %v7763_v32 = vld [vmem:[#allocation46_spill] sm:$0xff] }
 0x3c4   :  { %2442 = vmatpush1.bf16.msra.mxu0 %v7753_v7  ;;  %2485 = vmatpush1.bf16.msra.mxu1 %v7754_v22  ;;  %v7764_v7 = vld [vmem:[#allocation47_spill] sm:$0xff]  ;;  %v7765_v22 = vld [vmem:[#allocation48_spill] sm:$0xff] }
 0x3c5   :  { %2443 = vmatprep.subr.bf16.mxu0 %v7755_v37  ;;  %2486 = vmatprep.subr.bf16.mxu1 %v7756_v27  ;;  %v7766_v37 = vld [vmem:[#allocation49_spill] sm:$0xff]  ;;  %v7767_v27 = vld [vmem:[#allocation50_spill] sm:$0xff] }
 0x3c8   :  { %2444 = vmatpush1.bf16.msra.mxu0 %v7757_v3  ;;  %2487 = vmatpush1.bf16.msra.mxu1 %v7758_v33  ;;  %v7768_v3 = vld [vmem:[#allocation51_spill] sm:$0xff] }
 0x3c9   :  { %2445 = vmatprep.subr.bf16.mxu0 %v7759_v28  ;;  %2488 = vmatprep.subr.bf16.mxu1 %v7760_v30 }
 0x3cc   :  { %2446 = vmatpush1.bf16.msra.mxu0 %v7761_v1  ;;  %2489 = vmatpush1.bf16.msra.mxu1 %v7762_v25 }
 0x3cd   :  { %2447 = vmatprep.subr.bf16.mxu0 %v7763_v32  ;;  %2490 = vmatprep.subr.bf16.mxu1 %v7764_v7 }
 0x3d0   :  { %2448 = vmatpush1.bf16.msra.mxu0 %v7765_v22  ;;  %2491 = vmatpush1.bf16.msra.mxu1 %v7766_v37 }
 0x3d1   :  { %2519 = vmatprep.subr.bf16.mxu0 %v7767_v27  ;;  %2562 = vmatprep.subr.bf16.mxu1 %v7768_v3 }
 0x433   :  { %v2106_v33 = vpop.f32.mrf.mxu0  ;;  %v2149_v28 = vpop.f32.mrf.mxu1 }
 0x435   :  { %v2108_v24 = vpop.f32.mrf.mxu0  ;;  %v2151_v30 = vpop.f32.mrf.mxu1 }
 0x437   :  { %v2110_v14 = vpop.f32.mrf.mxu0  ;;  %v2153_v1 = vpop.f32.mrf.mxu1 }
 0x439   :  { %v2112_v20 = vpop.f32.mrf.mxu0  ;;  %v2155_v25 = vpop.f32.mrf.mxu1 }
 0x453   :  { %v2192_v11 = vpop.f32.mrf.mxu0  ;;  %v2235_v32 = vpop.f32.mrf.mxu1 }
 0x454   :  { %v2193_v19 = vadd.f32 %v2192_v11, %v2106_v33  ;;  %v2236_v37 = vadd.f32 %v2235_v32, %v2149_v28 }
 0x455   :  { %v2194_v7 = vpop.f32.mrf.mxu0  ;;  %v2237_v46 = vpop.f32.mrf.mxu1 }
 0x456   :  { %v2244_v22 = vadd.f32 %v2193_v19, %v5915_v0  ;;  %v2195_v61 = vadd.f32 %v2194_v7, %v2108_v24  ;;  %v2246_v2 = vadd.f32 %v2236_v37, %v5924_v23 }
 0x457   :  { %v2196_v27 = vpop.f32.mrf.mxu0  ;;  %v2239_v59 = vpop.f32.mrf.mxu1 }
 0x458   :  { %v2252_v8 = vmul.f32 0.5, %v2244_v22  ;;  %v2245_v3 = vadd.f32 %v2195_v61, %v5919_v12  ;;  %v2197_v56 = vadd.f32 %v2196_v27, %v2110_v14  ;;  %v2240_v33 = vadd.f32 %v2239_v59, %v2153_v1 }
 0x459   :  { %v2198_v62 = vpop.f32.mrf.mxu0  ;;  %v2241_v32 = vpop.f32.mrf.mxu1  ;;  %v2238_v14 = vadd.f32 %v2237_v46, %v2151_v30 }
 0x45a   :  { %4702 = vtanh.f32 %v2252_v8  ;;  %v2253_v63 = vmul.f32 0.5, %v2245_v3  ;;  %v2199_v18 = vadd.f32 %v2198_v62, %v2112_v20  ;;  %v2248_v11 = vadd.f32 %v2197_v56, %v5915_v0 }
 0x45b   :  { %v2250_v61 = vadd.f32 %v2240_v33, %v5924_v23  ;;  %v2242_v8 = vadd.f32 %v2241_v32, %v2155_v25  ;;  %v2247_v7 = vadd.f32 %v2238_v14, %v5933_v44 }
 0x45c   :  { %4704 = vtanh.f32 %v2253_v63  ;;  %v2249_v19 = vadd.f32 %v2199_v18, %v5919_v12  ;;  %v2256_v28 = vmul.f32 0.5, %v2248_v11 }
 0x45d   :  { %4706 = vtanh.f32 %v2246_v2  ;;  %v2251_v62 = vadd.f32 %v2242_v8, %v5933_v44  ;;  %v2255_v20 = vmul.f32 0.5, %v2247_v7 }
 0x45e   :  { %v2257_v24 = vmul.f32 0.5, %v2249_v19  ;;  %4708 = vtanh.f32 %v2256_v28 }
 0x45f   :  { %v2259_v2 = vmul.f32 0.5, %v2251_v62  ;;  %v7769_v62 = vld [vmem:[#allocation80_spill] sm:$0xff] }
 0x460   :  { %4710 = vtanh.f32 %v2257_v24 }
 0x461   :  { %4712 = vtanh.f32 %v2250_v61 }
 0x462   :  { %4714 = vtanh.f32 %v2255_v20  ;;  %v7770_v20 = vld [vmem:[#allocation82_spill] sm:$0xff] }
 0x463   :  { %4716 = vtanh.f32 %v2259_v2 }
 0x467   :  { %v4703_v56 = vpop.eup %4702 }
 0x468   :  { %v2268_v63 = vmul.f32 0.5, %v4703_v56 }
 0x469   :  { %v4705_v59 = vpop.eup %4704 }
 0x46a   :  { %v2270_v18 = vadd.f32 0.5, %v2268_v63  ;;  %v2272_v1 = vmul.f32 0.5, %v4705_v59  ;;  %v4707_v22 = vpop.eup %4706 }
 0x46b   :  { %v4709_v37 = vpop.eup %4708 }
 0x46c   :  { %v2274_v27 = vadd.f32 0.5, %v2272_v1  ;;  %v2269_v11 = vmul.f32 0.5, %v4709_v37  ;;  %v2282_v25 = vmul.f32 %v4707_v22, %v2270_v18  ;;  %v7771_v1 = vld [vmem:[#allocation97_spill] sm:$0xff]  ;;  %v7772_v37 = vld [vmem:[#allocation84_spill] sm:$0xff] }
 0x46d   :  { %v4711_v3 = vpop.eup %4710 }
 0x46e   :  { %v2280_v46 = vmul.f32 %v2274_v27, %v6190_v50  ;;  %v2273_v30 = vmul.f32 0.5, %v4711_v3  ;;  %v2271_v33 = vadd.f32 0.5, %v2269_v11  ;;  %v4713_v24 = vpop.eup %4712 }
 0x470   :  { %v6386_v19 = vadd.f32 %v2282_v25, %v2280_v46  ;;  %v2275_v28 = vadd.f32 0.5, %v2273_v30  ;;  %v2283_v61 = vmul.f32 %v4713_v24, %v2271_v33  ;;  %v4715_v46 = vpop.eup %4714  ;;  %v7773_v30 = vld [vmem:[#allocation87_spill] sm:$0xff]  ;;  %v7774_v24 = vld [vmem:[#allocation101_spill] sm:$0xff] }
 0x472   :  { %v2281_v32 = vmul.f32 %v2275_v28, %v6194_v21  ;;  %4718 = vtanh.f32 %v6386_v19  ;;  %v4717_v28 = vpop.eup %4716 }
 0x473   :  { %v2334_v14 = vpop.f32.mrf.mxu0  ;;  %v2377_v8 = vpop.f32.mrf.mxu1 }
 0x474   :  { %v6390_v7 = vadd.f32 %v2283_v61, %v2281_v32  ;;  %v2386_v56 = vadd.f32 %v2334_v14, %v7769_v62  ;;  %v2388_v2 = vadd.f32 %v2377_v8, %v7771_v1  ;;  %v2276_v14 = vmul.f32 0.5, %v4715_v46 }
 0x475   :  { %v2336_v50 = vpop.f32.mrf.mxu0  ;;  %v2379_v63 = vpop.f32.mrf.mxu1  ;;  %v2277_v8 = vmul.f32 0.5, %v4717_v28 }
 0x476   :  { %4720 = vtanh.f32 %v6390_v7  ;;  %v2394_v59 = vmul.f32 0.5, %v2386_v56  ;;  %v2387_v18 = vadd.f32 %v2336_v50, %v7770_v20  ;;  %v7775_v50 = vld [vmem:[#allocation102_spill] sm:$0xff]  ;;  %v2278_v20 = vadd.f32 0.5, %v2276_v14 }
 0x477   :  { %v2338_v22 = vpop.f32.mrf.mxu0  ;;  %v2381_v3 = vpop.f32.mrf.mxu1 }
 0x478   :  { %4722 = vtanh.f32 %v2394_v59  ;;  %v2395_v21 = vmul.f32 0.5, %v2387_v18  ;;  %v2390_v27 = vadd.f32 %v2338_v22, %v7772_v37  ;;  %v2392_v32 = vadd.f32 %v2381_v3, %v7774_v24  ;;  %v7776_v22 = vld [vmem:[#allocation99_spill] sm:$0xff] }
 0x479   :  { %v2340_v11 = vpop.f32.mrf.mxu0  ;;  %v2383_v56 = vpop.f32.mrf.mxu1  ;;  %v473_v59 = vadd.f32 %v5681_v13, %v7775_v50  ;;  %v2279_v18 = vadd.f32 0.5, %v2277_v8 }
 0x47a   :  { %4724 = vtanh.f32 %v2395_v21  ;;  %v2398_v25 = vmul.f32 0.5, %v2390_v27  ;;  %v2391_v33 = vadd.f32 %v2340_v11, %v7773_v30  ;;  %v2389_v21 = vadd.f32 %v2379_v63, %v7776_v22 }
 0x47b   :  { %4726 = vtanh.f32 %v2388_v2  ;;  %v2393_v37 = vadd.f32 %v2383_v56, %v473_v59 }
 0x47c   :  { %4728 = vtanh.f32 %v2398_v25  ;;  %v2399_v61 = vmul.f32 0.5, %v2391_v33  ;;  %v2397_v30 = vmul.f32 0.5, %v2389_v21  ;;  %v7777_v21 = vld [vmem:[#allocation52_spill] sm:$0xff] }
 0x47e   :  { %4730 = vtanh.f32 %v2399_v61 }
 0x47f   :  { %4732 = vtanh.f32 %v2392_v32  ;;  %v4719_v62 = vpop.eup %4718  ;;  %v2401_v32 = vmul.f32 0.5, %v2393_v37  ;;  %v7778_v37 = vld [vmem:[#allocation53_spill] sm:$0xff] }
 0x480   :  { %v2288_v2 = vmul.f32 %v4719_v62, %v2278_v20  ;;  %4734 = vtanh.f32 %v2397_v30 }
 0x481   :  { %4736 = vtanh.f32 %v2401_v32  ;;  %v7786_v32 = vld [vmem:[#allocation62_spill] sm:$0xff] }
 0x483   :  { %v4721_v1 = vpop.eup %4720 }
 0x484   :  { %v2289_v27 = vmul.f32 %v4721_v1, %v2279_v18 }
 0x485   :  { %v4723_v11 = vpop.eup %4722 }
 0x486   :  { %v2410_v3 = vmul.f32 0.5, %v4723_v11  ;;  %v2290_v25 = vpack.c.bf16 %v2289_v27, %v2288_v2  ;;  %v7780_v11 = vld [vmem:[#allocation55_spill] sm:$0xff] }
 0x487   :  { %v4725_v46 = vpop.eup %4724 }
 0x488   :  { %v4727_v33 = vpop.eup %4726  ;;  %v2412_v28 = vadd.f32 0.5, %v2410_v3  ;;  %v2414_v24 = vmul.f32 0.5, %v4725_v46  ;;  %2466 = vmatmul.mubr.bf16.vlgmr.msra.gmra.mxu0 %v2290_v25  ;;  %2509 = vmatmul.mubr.bf16.vlgmr.msra.gmra.mxu1 %v2290_v25  ;;  %v7781_v3 = vld [vmem:[#allocation56_spill] sm:$0xff]  ;;  %v7782_v25 = vld [vmem:[#allocation57_spill] sm:$0xff]  ;;  %v7783_v46 = vld [vmem:[#allocation59_spill] sm:$0xff] }
 0x489   :  { %v4729_v13 = vpop.eup %4728  ;;  %2520 = vmatpush1.bf16.msra.mxu0 %v6207_v17  ;;  %2563 = vmatpush1.bf16.msra.mxu1 %v6210_v4 }
 0x48a   :  { %v2416_v63 = vadd.f32 0.5, %v2414_v24  ;;  %v2424_v61 = vmul.f32 %v4727_v33, %v2412_v28  ;;  %v2411_v14 = vmul.f32 0.5, %v4729_v13  ;;  %2521 = vmatprep.subr.bf16.mxu0 %v6213_v9  ;;  %2564 = vmatprep.subr.bf16.mxu1 %v6216_v34  ;;  %v7784_v28 = vld [vmem:[#allocation60_spill] sm:$0xff]  ;;  %v7785_v24 = vld [vmem:[#allocation61_spill] sm:$0xff] }
 0x48b   :  { %v4731_v8 = vpop.eup %4730  ;;  %2551 = vmatprep.mubr.bf16.mxu0 %v7605_v26  ;;  %2594 = vmatprep.mubr.bf16.mxu1 %v7605_v26 }
 0x48c   :  { %v2422_v62 = vmul.f32 %v2416_v63, %v6228_v43  ;;  %v2413_v56 = vadd.f32 0.5, %v2411_v14  ;;  %v2415_v50 = vmul.f32 0.5, %v4731_v8  ;;  %v4733_v59 = vpop.eup %4732  ;;  %v7787_v8 = vld [vmem:[#allocation76_spill] sm:$0xff] }
 0x48d   :  { %2522 = vmatpush1.bf16.msra.mxu0 %v6222_v38  ;;  %2565 = vmatpush1.bf16.msra.mxu1 %v6225_v29  ;;  %v4735_v2 = vpop.eup %4734 }
 0x48e   :  { %v6411_v20 = vadd.f32 %v2424_v61, %v2422_v62  ;;  %v2417_v18 = vadd.f32 0.5, %v2415_v50  ;;  %v2425_v1 = vmul.f32 %v4733_v59, %v2413_v56  ;;  %2523 = vmatprep.subr.bf16.mxu0 %v6230_v41  ;;  %2566 = vmatprep.subr.bf16.mxu1 %v6233_v51  ;;  %v4737_v27 = vpop.eup %4736  ;;  %v2418_v30 = vmul.f32 0.5, %v4735_v2  ;;  %v6444_v59 = vld [vmem:[#allocation8 + $0xe0] ss:$16 sps:$4 sm:$0xff]   ;;  %v7800_v2 = vld [vmem:[#allocation18_spill] sm:$0xff] }
 0x48f   :  { %v2419_v33 = vmul.f32 0.5, %v4737_v27  ;;  %7788 = vst [vmem:[#allocation77_spill] sm:$0xff] %v6444_v59  ;;  %v7802_v27 = vld [vmem:[#allocation20_spill] sm:$0xff] }
 0x490   :  { %v2423_v22 = vmul.f32 %v2417_v18, %v6244_v36  ;;  %4738 = vtanh.f32 %v6411_v20  ;;  %v7779_v36 = vld [vmem:[#allocation54_spill] sm:$0xff]  ;;  %v2420_v63 = vadd.f32 0.5, %v2418_v30  ;;  %v6448_v18 = vld [vmem:[#allocation8 + $0xc4] ss:$16 sps:$4 sm:$0xff]  }
 0x491   :  { %2524 = vmatpush1.bf16.msra.mxu0 %v6237_v39  ;;  %2567 = vmatpush1.bf16.msra.mxu1 %v6240_v6  ;;  %v2421_v61 = vadd.f32 0.5, %v2419_v33  ;;  %7789 = vst [vmem:[#allocation89_spill] sm:$0xff] %v6448_v18  ;;  %v7803_v30 = vld [vmem:[#allocation19_spill] sm:$0xff]  ;;  %v7805_v33 = vld [vmem:[#allocation21_spill] sm:$0xff] }
 0x492   :  { %v6419_v43 = vadd.f32 %v2425_v1, %v2423_v22  ;;  %2525 = vmatprep.subr.bf16.mxu0 %v6246_v5  ;;  %2568 = vmatprep.subr.bf16.mxu1 %v6249_v16  ;;  %v6470_v1 = vld [vmem:[#allocation8 + $0x80] ss:$16 sps:$4 sm:$0xff]   ;;  %v6482_v22 = vld [vmem:[#allocation8 + $0x44] ss:$16 sps:$4 sm:$0xff]  }
 0x493   :  { %7794 = vst [vmem:[#allocation91_spill] sm:$0xff] %v6470_v1  ;;  %7798 = vst [vmem:[#allocation97_spill] sm:$0xff] %v6482_v22 }
 0x494   :  { %4740 = vtanh.f32 %v6419_v43 }
 0x495   :  { %2526 = vmatpush1.bf16.msra.mxu0 %v6253_v60  ;;  %2569 = vmatpush1.bf16.msra.mxu1 %v7777_v21 }
 0x496   :  { %2527 = vmatprep.subr.bf16.mxu0 %v7778_v37  ;;  %2570 = vmatprep.subr.bf16.mxu1 %v7779_v36 }
 0x499   :  { %2528 = vmatpush1.bf16.msra.mxu0 %v7780_v11  ;;  %2571 = vmatpush1.bf16.msra.mxu1 %v7781_v3 }
 0x49a   :  { %2529 = vmatprep.subr.bf16.mxu0 %v7782_v25  ;;  %2572 = vmatprep.subr.bf16.mxu1 %v7783_v46 }
 0x49d   :  { %2530 = vmatpush1.bf16.msra.mxu0 %v7784_v28  ;;  %2573 = vmatpush1.bf16.msra.mxu1 %v7785_v24  ;;  %v4739_v13 = vpop.eup %4738 }
 0x49e   :  { %2531 = vmatprep.subr.bf16.mxu0 %v7786_v32  ;;  %2574 = vmatprep.subr.bf16.mxu1 %v6286_v15  ;;  %v2430_v62 = vmul.f32 %v4739_v13, %v2420_v63  ;;  %v7806_v13 = vld [vmem:[#allocation24_spill] sm:$0xff]  ;;  %v7807_v63 = vld [vmem:[#allocation23_spill] sm:$0xff] }
 0x4a1   :  { %v4741_v14 = vpop.eup %4740  ;;  %2532 = vmatpush1.bf16.msra.mxu0 %v7787_v8  ;;  %2575 = vmatpush1.bf16.msra.mxu1 %v6292_v42 }
 0x4a2   :  { %v2431_v56 = vmul.f32 %v4741_v14, %v2421_v61  ;;  %2533 = vmatprep.subr.bf16.mxu0 %v6295_v40  ;;  %2576 = vmatprep.subr.bf16.mxu1 %v6298_v35  ;;  %v7808_v61 = vld [vmem:[#allocation26_spill] sm:$0xff]  ;;  %v7809_v14 = vld [vmem:[#allocation25_spill] sm:$0xff] }
 0x4a4   :  { %v2432_v50 = vpack.c.bf16 %v2431_v56, %v2430_v62  ;;  %v7810_v62 = vld [vmem:[#allocation28_spill] sm:$0xff]  ;;  %v7811_v56 = vld [vmem:[#allocation27_spill] sm:$0xff] }
 0x4a5   :  { %2534 = vmatpush1.bf16.msra.mxu0 %v6301_v10  ;;  %2577 = vmatpush1.bf16.msra.mxu1 %v6304_v31 }
 0x4a6   :  { %2661 = vmatprep.subr.bf16.mxu0 %v5995_v45  ;;  %2704 = vmatprep.subr.bf16.mxu1 %v5998_v47  ;;  %v6454_v45 = vld [vmem:[#allocation8 + $0xc0] ss:$16 sps:$4 sm:$0xff]   ;;  %v6458_v47 = vld [vmem:[#allocation8 + $0xa4] ss:$16 sps:$4 sm:$0xff]  }
 0x4a7   :  { %7790 = vst [vmem:[#allocation79_spill] sm:$0xff] %v6454_v45  ;;  %7791 = vst [vmem:[#allocation78_spill] sm:$0xff] %v6458_v47 }
 0x4a8   :  { %2552 = vmatmul.mubr.bf16.vlgmr.msra.gmra.mxu0 %v2432_v50  ;;  %2595 = vmatmul.mubr.bf16.vlgmr.msra.gmra.mxu1 %v2432_v50 }
 0x4a9   :  { %2662 = vmatpush1.bf16.msra.mxu0 %v6444_v59  ;;  %2705 = vmatpush1.bf16.msra.mxu1 %v6004_v48  ;;  %v6462_v48 = vld [vmem:[#allocation8 + $0xa0] ss:$16 sps:$4 sm:$0xff]  }
 0x4aa   :  { %2663 = vmatprep.subr.bf16.mxu0 %v6448_v18  ;;  %2706 = vmatprep.subr.bf16.mxu1 %v6008_v49  ;;  %7792 = vst [vmem:[#allocation93_spill] sm:$0xff] %v6462_v48  ;;  %v6466_v49 = vld [vmem:[#allocation8 + $0x84] ss:$16 sps:$4 sm:$0xff]  }
 0x4ab   :  { %2693 = vmatprep.mubr.bf16.mxu0 %v7605_v26  ;;  %2736 = vmatprep.mubr.bf16.mxu1 %v7605_v26  ;;  %7793 = vst [vmem:[#allocation94_spill] sm:$0xff] %v6466_v49 }
 0x4ad   :  { %2664 = vmatpush1.bf16.msra.mxu0 %v6454_v45  ;;  %2707 = vmatpush1.bf16.msra.mxu1 %v6014_v52  ;;  %v6474_v52 = vld [vmem:[#allocation8 + $0x64] ss:$16 sps:$4 sm:$0xff]  }
 0x4ae   :  { %2665 = vmatprep.subr.bf16.mxu0 %v6458_v47  ;;  %2708 = vmatprep.subr.bf16.mxu1 %v6018_v53  ;;  %7795 = vst [vmem:[#allocation80_spill] sm:$0xff] %v6474_v52  ;;  %v6478_v53 = vld [vmem:[#allocation8 + $0x60] ss:$16 sps:$4 sm:$0xff]  }
 0x4af   :  { %7796 = vst [vmem:[#allocation82_spill] sm:$0xff] %v6478_v53 }
 0x4b1   :  { %2666 = vmatpush1.bf16.msra.mxu0 %v6462_v48  ;;  %2709 = vmatpush1.bf16.msra.mxu1 %v6022_v54  ;;  %v7797_v54 = vld [vmem:[#allocation16_spill] sm:$0xff] }
 0x4b2   :  { %2667 = vmatprep.subr.bf16.mxu0 %v6466_v49  ;;  %2710 = vmatprep.subr.bf16.mxu1 %v6026_v55  ;;  %v7799_v55 = vld [vmem:[#allocation15_spill] sm:$0xff] }
 0x4b5   :  { %2668 = vmatpush1.bf16.msra.mxu0 %v6470_v1  ;;  %2711 = vmatpush1.bf16.msra.mxu1 %v6030_v57  ;;  %v7801_v57 = vld [vmem:[#allocation17_spill] sm:$0xff] }
 0x4b6   :  { %2669 = vmatprep.subr.bf16.mxu0 %v6474_v52  ;;  %2712 = vmatprep.subr.bf16.mxu1 %v6034_v58  ;;  %v7804_v58 = vld [vmem:[#allocation22_spill] sm:$0xff] }
 0x4b9   :  { %2670 = vmatpush1.bf16.msra.mxu0 %v6478_v53  ;;  %2713 = vmatpush1.bf16.msra.mxu1 %v7797_v54  ;;  %v7812_v54 = vld [vmem:[#allocation29_spill] sm:$0xff] }
 0x4ba   :  { %2671 = vmatprep.subr.bf16.mxu0 %v6482_v22  ;;  %2714 = vmatprep.subr.bf16.mxu1 %v7799_v55  ;;  %v7813_v55 = vld [vmem:[#allocation30_spill] sm:$0xff] }
 0x4bd   :  { %2672 = vmatpush1.bf16.msra.mxu0 %v7800_v2  ;;  %2715 = vmatpush1.bf16.msra.mxu1 %v7801_v57  ;;  %v7814_v2 = vld [vmem:[#allocation31_spill] sm:$0xff]  ;;  %v7815_v57 = vld [vmem:[#allocation58_spill] sm:$0xff] }
 0x4be   :  { %2673 = vmatprep.subr.bf16.mxu0 %v7802_v27  ;;  %2716 = vmatprep.subr.bf16.mxu1 %v7803_v30  ;;  %v7816_v27 = vld [vmem:[#allocation68_spill] sm:$0xff]  ;;  %v7817_v30 = vld [vmem:[#allocation70_spill] sm:$0xff] }
 0x4c1   :  { %2674 = vmatpush1.bf16.msra.mxu0 %v7804_v58  ;;  %2717 = vmatpush1.bf16.msra.mxu1 %v7805_v33  ;;  %v7818_v58 = vld [vmem:[#allocation81_spill] sm:$0xff]  ;;  %v7819_v33 = vld [vmem:[#allocation74_spill] sm:$0xff] }
 0x4c2   :  { %2675 = vmatprep.subr.bf16.mxu0 %v7806_v13  ;;  %2718 = vmatprep.subr.bf16.mxu1 %v7807_v63  ;;  %v7821_v13 = vld [vmem:[#allocation85_spill] sm:$0xff]  ;;  %v7822_v63 = vld [vmem:[#allocation86_spill] sm:$0xff] }
 0x4c5   :  { %2676 = vmatpush1.bf16.msra.mxu0 %v7808_v61  ;;  %2719 = vmatpush1.bf16.msra.mxu1 %v7809_v14  ;;  %v7823_v61 = vld [vmem:[#allocation83_spill] sm:$0xff]  ;;  %v7824_v14 = vld [vmem:[#allocation32_spill] sm:$0xff] }
 0x4c6   :  { %2794 = vmatprep.subr.bf16.mxu0 %v7810_v62  ;;  %2837 = vmatprep.subr.bf16.mxu1 %v7811_v56  ;;  %v7825_v62 = vld [vmem:[#allocation33_spill] sm:$0xff]  ;;  %v7826_v56 = vld [vmem:[#allocation34_spill] sm:$0xff] }
 0x4c8   :  { %2694 = vmatmul.mubr.bf16.vlgmr.msra.gmra.mxu0 %v2432_v50  ;;  %2737 = vmatmul.mubr.bf16.vlgmr.msra.gmra.mxu1 %v2432_v50  ;;  %v7820_v50 = vld [vmem:[#allocation72_spill] sm:$0xff] }
 0x4c9   :  { %2795 = vmatpush1.bf16.msra.mxu0 %v7812_v54  ;;  %2838 = vmatpush1.bf16.msra.mxu1 %v7813_v55  ;;  %v7827_v54 = vld [vmem:[#allocation35_spill] sm:$0xff]  ;;  %v7828_v55 = vld [vmem:[#allocation36_spill] sm:$0xff] }
 0x4ca   :  { %2796 = vmatprep.subr.bf16.mxu0 %v7814_v2  ;;  %2839 = vmatprep.subr.bf16.mxu1 %v7815_v57  ;;  %v7829_v2 = vld [vmem:[#allocation37_spill] sm:$0xff]  ;;  %v7830_v57 = vld [vmem:[#allocation38_spill] sm:$0xff] }
 0x4cb   :  { %2826 = vmatprep.mubr.bf16.mxu0 %v7605_v26  ;;  %2869 = vmatprep.mubr.bf16.mxu1 %v7605_v26 }
 0x4cd   :  { %2797 = vmatpush1.bf16.msra.mxu0 %v7816_v27  ;;  %2840 = vmatpush1.bf16.msra.mxu1 %v7817_v30  ;;  %v7831_v27 = vld [vmem:[#allocation39_spill] sm:$0xff]  ;;  %v7832_v30 = vld [vmem:[#allocation40_spill] sm:$0xff] }
 0x4ce   :  { %2798 = vmatprep.subr.bf16.mxu0 %v7818_v58  ;;  %2841 = vmatprep.subr.bf16.mxu1 %v7819_v33  ;;  %v7833_v58 = vld [vmem:[#allocation41_spill] sm:$0xff]  ;;  %v7834_v33 = vld [vmem:[#allocation42_spill] sm:$0xff] }
 0x4d1   :  { %2799 = vmatpush1.bf16.msra.mxu0 %v7820_v50  ;;  %2842 = vmatpush1.bf16.msra.mxu1 %v7821_v13  ;;  %v7835_v50 = vld [vmem:[#allocation43_spill] sm:$0xff]  ;;  %v7836_v13 = vld [vmem:[#allocation44_spill] sm:$0xff] }
 0x4d2   :  { %2800 = vmatprep.subr.bf16.mxu0 %v7822_v63  ;;  %2843 = vmatprep.subr.bf16.mxu1 %v7823_v61  ;;  %v7837_v63 = vld [vmem:[#allocation45_spill] sm:$0xff]  ;;  %v7838_v61 = vld [vmem:[#allocation46_spill] sm:$0xff] }
 0x4d5   :  { %2801 = vmatpush1.bf16.msra.mxu0 %v7824_v14  ;;  %2844 = vmatpush1.bf16.msra.mxu1 %v7825_v62  ;;  %v7839_v14 = vld [vmem:[#allocation47_spill] sm:$0xff]  ;;  %v7840_v62 = vld [vmem:[#allocation48_spill] sm:$0xff] }
 0x4d6   :  { %2802 = vmatprep.subr.bf16.mxu0 %v7826_v56  ;;  %2845 = vmatprep.subr.bf16.mxu1 %v7827_v54  ;;  %v7841_v56 = vld [vmem:[#allocation49_spill] sm:$0xff]  ;;  %v7842_v54 = vld [vmem:[#allocation50_spill] sm:$0xff] }
 0x4d9   :  { %2803 = vmatpush1.bf16.msra.mxu0 %v7828_v55  ;;  %2846 = vmatpush1.bf16.msra.mxu1 %v7829_v2  ;;  %v7843_v55 = vld [vmem:[#allocation51_spill] sm:$0xff] }
 0x4da   :  { %2804 = vmatprep.subr.bf16.mxu0 %v7830_v57  ;;  %2847 = vmatprep.subr.bf16.mxu1 %v7831_v27 }
 0x4dd   :  { %2805 = vmatpush1.bf16.msra.mxu0 %v7832_v30  ;;  %2848 = vmatpush1.bf16.msra.mxu1 %v7833_v58 }
 0x4de   :  { %2806 = vmatprep.subr.bf16.mxu0 %v7834_v33  ;;  %2849 = vmatprep.subr.bf16.mxu1 %v7835_v50 }
 0x4e1   :  { %2807 = vmatpush1.bf16.msra.mxu0 %v7836_v13  ;;  %2850 = vmatpush1.bf16.msra.mxu1 %v7837_v63 }
 0x4e2   :  { %2808 = vmatprep.subr.bf16.mxu0 %v7838_v61  ;;  %2851 = vmatprep.subr.bf16.mxu1 %v7839_v14 }
 0x4e5   :  { %2809 = vmatpush1.bf16.msra.mxu0 %v7840_v62  ;;  %2852 = vmatpush1.bf16.msra.mxu1 %v7841_v56 }
 0x4e6   :  { %2880 = vmatprep.subr.bf16.mxu0 %v7842_v54  ;;  %2923 = vmatprep.subr.bf16.mxu1 %v7843_v55 }
 0x548   :  { %v2467_v2 = vpop.f32.mrf.mxu0  ;;  %v2510_v57 = vpop.f32.mrf.mxu1 }
 0x54a   :  { %v2469_v27 = vpop.f32.mrf.mxu0  ;;  %v2512_v30 = vpop.f32.mrf.mxu1 }
 0x54c   :  { %v2471_v58 = vpop.f32.mrf.mxu0  ;;  %v2514_v33 = vpop.f32.mrf.mxu1 }
 0x54e   :  { %v2473_v50 = vpop.f32.mrf.mxu0  ;;  %v2516_v13 = vpop.f32.mrf.mxu1 }
 0x568   :  { %v2553_v63 = vpop.f32.mrf.mxu0  ;;  %v2596_v61 = vpop.f32.mrf.mxu1 }
 0x569   :  { %v2554_v22 = vadd.f32 %v2553_v63, %v2467_v2  ;;  %v2597_v56 = vadd.f32 %v2596_v61, %v2510_v57 }
 0x56a   :  { %v2555_v14 = vpop.f32.mrf.mxu0  ;;  %v2598_v53 = vpop.f32.mrf.mxu1 }
 0x56b   :  { %v2605_v62 = vadd.f32 %v2554_v22, %v5915_v0  ;;  %v2556_v52 = vadd.f32 %v2555_v14, %v2469_v27  ;;  %v2607_v45 = vadd.f32 %v2597_v56, %v5924_v23 }
 0x56c   :  { %v2557_v54 = vpop.f32.mrf.mxu0  ;;  %v2600_v48 = vpop.f32.mrf.mxu1 }
 0x56d   :  { %v2613_v1 = vmul.f32 0.5, %v2605_v62  ;;  %v2606_v55 = vadd.f32 %v2556_v52, %v5919_v12  ;;  %v2558_v49 = vadd.f32 %v2557_v54, %v2471_v58  ;;  %v2601_v63 = vadd.f32 %v2600_v48, %v2514_v33 }
 0x56e   :  { %v2559_v47 = vpop.f32.mrf.mxu0  ;;  %v2602_v61 = vpop.f32.mrf.mxu1  ;;  %v2599_v58 = vadd.f32 %v2598_v53, %v2512_v30 }
 0x56f   :  { %4742 = vtanh.f32 %v2613_v1  ;;  %v2614_v18 = vmul.f32 0.5, %v2606_v55  ;;  %v2560_v59 = vadd.f32 %v2559_v47, %v2473_v50  ;;  %v2609_v2 = vadd.f32 %v2558_v49, %v5915_v0 }
 0x570   :  { %v2611_v52 = vadd.f32 %v2601_v63, %v5924_v23  ;;  %v2603_v1 = vadd.f32 %v2602_v61, %v2516_v13  ;;  %v2608_v14 = vadd.f32 %v2599_v58, %v5933_v44 }
 0x571   :  { %4744 = vtanh.f32 %v2614_v18  ;;  %v2610_v22 = vadd.f32 %v2560_v59, %v5919_v12  ;;  %v2617_v57 = vmul.f32 0.5, %v2609_v2 }
 0x572   :  { %4746 = vtanh.f32 %v2607_v45  ;;  %v2612_v47 = vadd.f32 %v2603_v1, %v5933_v44  ;;  %v2616_v33 = vmul.f32 0.5, %v2608_v14 }
 0x573   :  { %v2618_v27 = vmul.f32 0.5, %v2610_v22  ;;  %4748 = vtanh.f32 %v2617_v57 }
 0x574   :  { %v2620_v45 = vmul.f32 0.5, %v2612_v47  ;;  %v7844_v47 = vld [vmem:[#allocation88_spill] sm:$0xff] }
 0x575   :  { %4750 = vtanh.f32 %v2618_v27 }
 0x576   :  { %4752 = vtanh.f32 %v2611_v52 }
 0x577   :  { %4754 = vtanh.f32 %v2616_v33  ;;  %v7845_v33 = vld [vmem:[#allocation90_spill] sm:$0xff] }
 0x578   :  { %4756 = vtanh.f32 %v2620_v45 }
 0x57c   :  { %v4743_v49 = vpop.eup %4742 }
 0x57d   :  { %v2629_v18 = vmul.f32 0.5, %v4743_v49 }
 0x57e   :  { %v4745_v48 = vpop.eup %4744 }
 0x57f   :  { %v2631_v59 = vadd.f32 0.5, %v2629_v18  ;;  %v2633_v50 = vmul.f32 0.5, %v4745_v48  ;;  %v4747_v62 = vpop.eup %4746 }
 0x580   :  { %v4749_v56 = vpop.eup %4748 }
 0x581   :  { %v2635_v54 = vadd.f32 0.5, %v2633_v50  ;;  %v2630_v2 = vmul.f32 0.5, %v4749_v56  ;;  %v2643_v30 = vmul.f32 %v4747_v62, %v2631_v59  ;;  %v7846_v50 = vld [vmem:[#allocation104_spill] sm:$0xff] }
 0x582   :  { %v4751_v55 = vpop.eup %4750  ;;  %v7847_v56 = vld [vmem:[#allocation92_spill] sm:$0xff] }
 0x583   :  { %v2641_v53 = vmul.f32 %v2635_v54, %v6386_v19  ;;  %v2634_v13 = vmul.f32 0.5, %v4751_v55  ;;  %v2632_v63 = vadd.f32 0.5, %v2630_v2  ;;  %v4753_v27 = vpop.eup %4752 }
 0x585   :  { %v6541_v22 = vadd.f32 %v2643_v30, %v2641_v53  ;;  %v2636_v57 = vadd.f32 0.5, %v2634_v13  ;;  %v2644_v52 = vmul.f32 %v4753_v27, %v2632_v63  ;;  %v4755_v53 = vpop.eup %4754  ;;  %v7848_v13 = vld [vmem:[#allocation95_spill] sm:$0xff]  ;;  %v7849_v27 = vld [vmem:[#allocation106_spill] sm:$0xff] }
 0x587   :  { %v2642_v61 = vmul.f32 %v2636_v57, %v6390_v7  ;;  %4758 = vtanh.f32 %v6541_v22  ;;  %v4757_v57 = vpop.eup %4756 }
 0x588   :  { %v2695_v58 = vpop.f32.mrf.mxu0  ;;  %v2738_v1 = vpop.f32.mrf.mxu1 }
 0x589   :  { %v6545_v14 = vadd.f32 %v2644_v52, %v2642_v61  ;;  %v2747_v49 = vadd.f32 %v2695_v58, %v7844_v47  ;;  %v2749_v45 = vadd.f32 %v2738_v1, %v7846_v50  ;;  %v2637_v58 = vmul.f32 0.5, %v4755_v53 }
 0x58a   :  { %v2697_v19 = vpop.f32.mrf.mxu0  ;;  %v2740_v18 = vpop.f32.mrf.mxu1  ;;  %v2638_v1 = vmul.f32 0.5, %v4757_v57 }
 0x58b   :  { %4760 = vtanh.f32 %v6545_v14  ;;  %v2755_v48 = vmul.f32 0.5, %v2747_v49  ;;  %v2748_v59 = vadd.f32 %v2697_v19, %v7845_v33  ;;  %v2639_v19 = vadd.f32 0.5, %v2637_v58 }
 0x58c   :  { %v2699_v62 = vpop.f32.mrf.mxu0  ;;  %v2742_v55 = vpop.f32.mrf.mxu1 }
 0x58d   :  { %4762 = vtanh.f32 %v2755_v48  ;;  %v2756_v7 = vmul.f32 0.5, %v2748_v59  ;;  %v2751_v54 = vadd.f32 %v2699_v62, %v7847_v56  ;;  %v2753_v61 = vadd.f32 %v2742_v55, %v7849_v27  ;;  %v7850_v59 = vld [vmem:[#allocation105_spill] sm:$0xff]  ;;  %v7851_v62 = vld [vmem:[#allocation107_spill] sm:$0xff] }
 0x58e   :  { %v2701_v2 = vpop.f32.mrf.mxu0  ;;  %v2744_v49 = vpop.f32.mrf.mxu1  ;;  %v2640_v48 = vadd.f32 0.5, %v2638_v1  ;;  %v2750_v50 = vadd.f32 %v2740_v18, %v7850_v59  ;;  %v6637_v59 = vld [vmem:[#allocation8 + $0x6c] ss:$16 sps:$4 sm:$0xff]  }
 0x58f   :  { %4764 = vtanh.f32 %v2756_v7  ;;  %v2759_v30 = vmul.f32 0.5, %v2751_v54  ;;  %v2752_v63 = vadd.f32 %v2701_v2, %v7848_v13  ;;  %v2754_v7 = vadd.f32 %v2744_v49, %v7851_v62  ;;  %v6641_v62 = vld [vmem:[#allocation8 + $0x68] ss:$16 sps:$4 sm:$0xff]  }
 0x590   :  { %4766 = vtanh.f32 %v2749_v45  ;;  %v2758_v13 = vmul.f32 0.5, %v2750_v50  ;;  %v7860_v50 = vld [vmem:[#allocation82_spill] sm:$0xff] }
 0x591   :  { %4768 = vtanh.f32 %v2759_v30  ;;  %v2760_v52 = vmul.f32 0.5, %v2752_v63  ;;  %v2762_v27 = vmul.f32 0.5, %v2754_v7  ;;  %v7861_v7 = vld [vmem:[#allocation97_spill] sm:$0xff] }
 0x593   :  { %4770 = vtanh.f32 %v2760_v52 }
 0x594   :  { %4772 = vtanh.f32 %v2753_v61  ;;  %v4759_v47 = vpop.eup %4758 }
 0x595   :  { %v2649_v56 = vmul.f32 %v4759_v47, %v2639_v19  ;;  %4774 = vtanh.f32 %v2758_v13  ;;  %v6663_v13 = vld [vmem:[#allocation8 + $0x28] ss:$16 sps:$4 sm:$0xff]  }
 0x596   :  { %4776 = vtanh.f32 %v2762_v27  ;;  %7867 = vst [vmem:[#allocation52_spill] sm:$0xff] %v6663_v13  ;;  %v6675_v27 = vld [vmem:[#allocation8 + $0x8] ss:$16 sps:$4 sm:$0xff]  }
 0x597   :  { %7871 = vst [vmem:[#allocation56_spill] sm:$0xff] %v6675_v27 }
 0x598   :  { %v4761_v33 = vpop.eup %4760 }
 0x599   :  { %v2650_v54 = vmul.f32 %v4761_v33, %v2640_v48  ;;  %v7859_v33 = vld [vmem:[#allocation80_spill] sm:$0xff] }
 0x59a   :  { %v4763_v45 = vpop.eup %4762 }
 0x59b   :  { %v2771_v2 = vmul.f32 0.5, %v4763_v45  ;;  %v2651_v30 = vpack.c.bf16 %v2650_v54, %v2649_v56  ;;  %v6645_v56 = vld [vmem:[#allocation8 + $0x4c] ss:$16 sps:$4 sm:$0xff]   ;;  %v6648_v54 = vld [vmem:[#allocation8 + $0x40] ss:$16 sps:$4 sm:$0xff]  }
 0x59c   :  { %v4765_v55 = vpop.eup %4764  ;;  %7862 = vst [vmem:[#allocation84_spill] sm:$0xff] %v6648_v54  ;;  %v6651_v45 = vld [vmem:[#allocation8 + $0x48] ss:$16 sps:$4 sm:$0xff]  }
 0x59d   :  { %v4767_v53 = vpop.eup %4766  ;;  %v2773_v63 = vadd.f32 0.5, %v2771_v2  ;;  %v2775_v57 = vmul.f32 0.5, %v4765_v55  ;;  %2827 = vmatmul.mubr.bf16.vlgmr.msra.gmra.mxu0 %v2651_v30  ;;  %2870 = vmatmul.mubr.bf16.vlgmr.msra.gmra.mxu1 %v2651_v30  ;;  %7863 = vst [vmem:[#allocation87_spill] sm:$0xff] %v6651_v45  ;;  %v6654_v2 = vld [vmem:[#allocation8 + $0x24] ss:$16 sps:$4 sm:$0xff]  }
 0x59e   :  { %v4769_v61 = vpop.eup %4768  ;;  %2881 = vmatpush1.bf16.msra.mxu0 %v6207_v17  ;;  %2924 = vmatpush1.bf16.msra.mxu1 %v6210_v4  ;;  %7864 = vst [vmem:[#allocation101_spill] sm:$0xff] %v6654_v2  ;;  %v6657_v30 = vld [vmem:[#allocation8 + $0x2c] ss:$16 sps:$4 sm:$0xff]   ;;  %v6660_v55 = vld [vmem:[#allocation8 + $0x20] ss:$16 sps:$4 sm:$0xff]  }
 0x59f   :  { %v2777_v18 = vadd.f32 0.5, %v2775_v57  ;;  %v2785_v52 = vmul.f32 %v4767_v53, %v2773_v63  ;;  %v2772_v58 = vmul.f32 0.5, %v4769_v61  ;;  %2882 = vmatprep.subr.bf16.mxu0 %v6213_v9  ;;  %2925 = vmatprep.subr.bf16.mxu1 %v6216_v34  ;;  %7865 = vst [vmem:[#allocation102_spill] sm:$0xff] %v6657_v30  ;;  %7866 = vst [vmem:[#allocation99_spill] sm:$0xff] %v6660_v55  ;;  %v6666_v53 = vld [vmem:[#allocation8 + $0x4] ss:$16 sps:$4 sm:$0xff]  }
 0x5a0   :  { %v4771_v1 = vpop.eup %4770  ;;  %2912 = vmatprep.mubr.bf16.mxu0 %v7605_v26  ;;  %2955 = vmatprep.mubr.bf16.mxu1 %v7605_v26  ;;  %7868 = vst [vmem:[#allocation53_spill] sm:$0xff] %v6666_v53  ;;  %v6669_v63 = vld [vmem:[#allocation8 + $0xc] ss:$16 sps:$4 sm:$0xff]   ;;  %v6672_v57 = vld [vmem:[#allocation8] ss:$16 sps:$4 sm:$0xff]  }
 0x5a1   :  { %v2783_v47 = vmul.f32 %v2777_v18, %v6411_v20  ;;  %v2774_v49 = vadd.f32 0.5, %v2772_v58  ;;  %v2776_v19 = vmul.f32 0.5, %v4771_v1  ;;  %v4773_v17 = vpop.eup %4772  ;;  %7869 = vst [vmem:[#allocation54_spill] sm:$0xff] %v6669_v63  ;;  %7870 = vst [vmem:[#allocation55_spill] sm:$0xff] %v6672_v57  ;;  %v6678_v61 = vld [vmem:[#allocation12 + $0xe4] ss:$16 sps:$4 sm:$0xff]  }
 0x5a2   :  { %2883 = vmatpush1.bf16.msra.mxu0 %v6222_v38  ;;  %2926 = vmatpush1.bf16.msra.mxu1 %v6225_v29  ;;  %v4775_v38 = vpop.eup %4774  ;;  %7872 = vst [vmem:[#allocation57_spill] sm:$0xff] %v6678_v61  ;;  %v6681_v18 = vld [vmem:[#allocation12 + $0xec] ss:$16 sps:$4 sm:$0xff]   ;;  %v6689_v58 = vld [vmem:[#allocation12 + $0xe8] ss:$16 sps:$4 sm:$0xff]  }
 0x5a3   :  { %v6565_v4 = vadd.f32 %v2785_v52, %v2783_v47  ;;  %v2778_v9 = vadd.f32 0.5, %v2776_v19  ;;  %v2786_v34 = vmul.f32 %v4773_v17, %v2774_v49  ;;  %2884 = vmatprep.subr.bf16.mxu0 %v6230_v41  ;;  %2927 = vmatprep.subr.bf16.mxu1 %v6233_v51  ;;  %v4777_v29 = vpop.eup %4776  ;;  %v2779_v41 = vmul.f32 0.5, %v4775_v38  ;;  %7873 = vst [vmem:[#allocation59_spill] sm:$0xff] %v6681_v18  ;;  %v6686_v52 = vld [vmem:[#allocation12 + $0xe0] ss:$16 sps:$4 sm:$0xff]  }
 0x5a4   :  { %v2780_v51 = vmul.f32 0.5, %v4777_v29  ;;  %7874 = vst [vmem:[#allocation60_spill] sm:$0xff] %v6686_v52  ;;  %7875 = vst [vmem:[#allocation61_spill] sm:$0xff] %v6689_v58  ;;  %v6692_v1 = vld [vmem:[#allocation12 + $0xc4] ss:$16 sps:$4 sm:$0xff]  }
 0x5a5   :  { %v2784_v48 = vmul.f32 %v2778_v9, %v6419_v43  ;;  %4778 = vtanh.f32 %v6565_v4  ;;  %7876 = vst [vmem:[#allocation62_spill] sm:$0xff] %v6692_v1  ;;  %v6695_v47 = vld [vmem:[#allocation12 + $0xcc] ss:$16 sps:$4 sm:$0xff]   ;;  %v6700_v49 = vld [vmem:[#allocation12 + $0xc0] ss:$16 sps:$4 sm:$0xff]  }
 0x5a6   :  { %2885 = vmatpush1.bf16.msra.mxu0 %v6237_v39  ;;  %2928 = vmatpush1.bf16.msra.mxu1 %v6240_v6  ;;  %v2781_v6 = vadd.f32 0.5, %v2779_v41  ;;  %7877 = vst [vmem:[#allocation76_spill] sm:$0xff] %v6695_v47  ;;  %7878 = vst [vmem:[#allocation16_spill] sm:$0xff] %v6700_v49  ;;  %v6703_v19 = vld [vmem:[#allocation12 + $0xc8] ss:$16 sps:$4 sm:$0xff]  }
 0x5a7   :  { %v6573_v20 = vadd.f32 %v2786_v34, %v2784_v48  ;;  %2886 = vmatprep.subr.bf16.mxu0 %v6246_v5  ;;  %2929 = vmatprep.subr.bf16.mxu1 %v6249_v16  ;;  %v2782_v5 = vadd.f32 0.5, %v2780_v51  ;;  %7879 = vst [vmem:[#allocation15_spill] sm:$0xff] %v6703_v19  ;;  %v6706_v17 = vld [vmem:[#allocation12 + $0xa4] ss:$16 sps:$4 sm:$0xff]   ;;  %v6709_v9 = vld [vmem:[#allocation12 + $0xac] ss:$16 sps:$4 sm:$0xff]  }
 0x5a8   :  { %7880 = vst [vmem:[#allocation18_spill] sm:$0xff] %v6706_v17  ;;  %7881 = vst [vmem:[#allocation17_spill] sm:$0xff] %v6709_v9  ;;  %v6712_v34 = vld [vmem:[#allocation12 + $0xa0] ss:$16 sps:$4 sm:$0xff]   ;;  %v6715_v48 = vld [vmem:[#allocation12 + $0xa8] ss:$16 sps:$4 sm:$0xff]  }
 0x5a9   :  { %4780 = vtanh.f32 %v6573_v20  ;;  %7882 = vst [vmem:[#allocation20_spill] sm:$0xff] %v6712_v34  ;;  %7883 = vst [vmem:[#allocation19_spill] sm:$0xff] %v6715_v48  ;;  %v6718_v38 = vld [vmem:[#allocation12 + $0x84] ss:$16 sps:$4 sm:$0xff]   ;;  %v6721_v29 = vld [vmem:[#allocation12 + $0x8c] ss:$16 sps:$4 sm:$0xff]  }
 0x5aa   :  { %2887 = vmatpush1.bf16.msra.mxu0 %v6253_v60  ;;  %2930 = vmatpush1.bf16.msra.mxu1 %v7777_v21  ;;  %7884 = vst [vmem:[#allocation22_spill] sm:$0xff] %v6718_v38  ;;  %7885 = vst [vmem:[#allocation21_spill] sm:$0xff] %v6721_v29  ;;  %v6724_v41 = vld [vmem:[#allocation12 + $0x80] ss:$16 sps:$4 sm:$0xff]   ;;  %v6727_v51 = vld [vmem:[#allocation12 + $0x88] ss:$16 sps:$4 sm:$0xff]  }
 0x5ab   :  { %2888 = vmatprep.subr.bf16.mxu0 %v7778_v37  ;;  %2931 = vmatprep.subr.bf16.mxu1 %v7779_v36  ;;  %v6601_v37 = vld [vmem:[#allocation8 + $0xec] ss:$16 sps:$4 sm:$0xff]   ;;  %v6617_v36 = vld [vmem:[#allocation8 + $0xc8] ss:$16 sps:$4 sm:$0xff]   ;;  %7886 = vst [vmem:[#allocation24_spill] sm:$0xff] %v6724_v41  ;;  %7887 = vst [vmem:[#allocation23_spill] sm:$0xff] %v6727_v51 }
 0x5ae   :  { %2889 = vmatpush1.bf16.msra.mxu0 %v7780_v11  ;;  %2932 = vmatpush1.bf16.msra.mxu1 %v7781_v3  ;;  %v7855_v11 = vld [vmem:[#allocation78_spill] sm:$0xff] }
 0x5af   :  { %2890 = vmatprep.subr.bf16.mxu0 %v7782_v25  ;;  %2933 = vmatprep.subr.bf16.mxu1 %v7783_v46  ;;  %v6621_v3 = vld [vmem:[#allocation8 + $0xac] ss:$16 sps:$4 sm:$0xff]   ;;  %v7856_v25 = vld [vmem:[#allocation93_spill] sm:$0xff]  ;;  %v6625_v46 = vld [vmem:[#allocation8 + $0xa8] ss:$16 sps:$4 sm:$0xff]  }
 0x5b2   :  { %2891 = vmatpush1.bf16.msra.mxu0 %v7784_v28  ;;  %2934 = vmatpush1.bf16.msra.mxu1 %v7785_v24  ;;  %v4779_v39 = vpop.eup %4778  ;;  %v7857_v28 = vld [vmem:[#allocation94_spill] sm:$0xff] }
 0x5b3   :  { %2892 = vmatprep.subr.bf16.mxu0 %v7786_v32  ;;  %2935 = vmatprep.subr.bf16.mxu1 %v6286_v15  ;;  %v2791_v60 = vmul.f32 %v4779_v39, %v2781_v6  ;;  %v6598_v15 = vld [vmem:[#allocation8 + $0xe4] ss:$16 sps:$4 sm:$0xff]   ;;  %v6629_v24 = vld [vmem:[#allocation8 + $0x8c] ss:$16 sps:$4 sm:$0xff]  }
 0x5b4   :  { %v7858_v32 = vld [vmem:[#allocation91_spill] sm:$0xff]  ;;  %v6733_v6 = vld [vmem:[#allocation12 + $0x6c] ss:$16 sps:$4 sm:$0xff]  }
 0x5b5   :  { %v6730_v39 = vld [vmem:[#allocation12 + $0x64] ss:$16 sps:$4 sm:$0xff]   ;;  %7889 = vst [vmem:[#allocation25_spill] sm:$0xff] %v6733_v6 }
 0x5b6   :  { %v4781_v16 = vpop.eup %4780  ;;  %2893 = vmatpush1.bf16.msra.mxu0 %v7787_v8  ;;  %2936 = vmatpush1.bf16.msra.mxu1 %v6292_v42  ;;  %v7853_v42 = vld [vmem:[#allocation89_spill] sm:$0xff]  ;;  %v6633_v8 = vld [vmem:[#allocation8 + $0x88] ss:$16 sps:$4 sm:$0xff]   ;;  %7888 = vst [vmem:[#allocation26_spill] sm:$0xff] %v6730_v39 }
 0x5b7   :  { %v2792_v43 = vmul.f32 %v4781_v16, %v2782_v5  ;;  %2894 = vmatprep.subr.bf16.mxu0 %v6295_v40  ;;  %2937 = vmatprep.subr.bf16.mxu1 %v6298_v35  ;;  %v7852_v40 = vld [vmem:[#allocation77_spill] sm:$0xff]  ;;  %v6607_v35 = vld [vmem:[#allocation8 + $0xe8] ss:$16 sps:$4 sm:$0xff]  }
 0x5b8   :  { %v6736_v5 = vld [vmem:[#allocation12 + $0x60] ss:$16 sps:$4 sm:$0xff]   ;;  %v6739_v16 = vld [vmem:[#allocation12 + $0x68] ss:$16 sps:$4 sm:$0xff]  }
 0x5b9   :  { %v6594_v21 = vpack.c.bf16 %v2792_v43, %v2791_v60  ;;  %7890 = vst [vmem:[#allocation28_spill] sm:$0xff] %v6736_v5  ;;  %7891 = vst [vmem:[#allocation27_spill] sm:$0xff] %v6739_v16  ;;  %v6742_v60 = vld [vmem:[#allocation12 + $0x44] ss:$16 sps:$4 sm:$0xff]   ;;  %v6745_v43 = vld [vmem:[#allocation12 + $0x4c] ss:$16 sps:$4 sm:$0xff]  }
 0x5ba   :  { %2895 = vmatpush1.bf16.msra.mxu0 %v6301_v10  ;;  %2938 = vmatpush1.bf16.msra.mxu1 %v6304_v31  ;;  %v6611_v31 = vld [vmem:[#allocation8 + $0xcc] ss:$16 sps:$4 sm:$0xff]   ;;  %v7854_v10 = vld [vmem:[#allocation79_spill] sm:$0xff]  ;;  %7892 = vst [vmem:[#allocation29_spill] sm:$0xff] %v6742_v60  ;;  %7893 = vst [vmem:[#allocation30_spill] sm:$0xff] %v6745_v43 }
 0x5bb   :  { %3022 = vmatprep.subr.bf16.mxu0 %v6598_v15  ;;  %3065 = vmatprep.subr.bf16.mxu1 %v6601_v37 }
 0x5bd   :  { %2913 = vmatmul.mubr.bf16.vlgmr.msra.gmra.mxu0 %v6594_v21  ;;  %2956 = vmatmul.mubr.bf16.vlgmr.msra.gmra.mxu1 %v6594_v21 }
 0x5be   :  { %3023 = vmatpush1.bf16.msra.mxu0 %v7852_v40  ;;  %3066 = vmatpush1.bf16.msra.mxu1 %v6607_v35 }
 0x5bf   :  { %3024 = vmatprep.subr.bf16.mxu0 %v7853_v42  ;;  %3067 = vmatprep.subr.bf16.mxu1 %v6611_v31 }
 0x5c0   :  { %3054 = vmatprep.mubr.bf16.mxu0 %v7605_v26  ;;  %3097 = vmatprep.mubr.bf16.mxu1 %v7605_v26 }
 0x5c2   :  { %3025 = vmatpush1.bf16.msra.mxu0 %v7854_v10  ;;  %3068 = vmatpush1.bf16.msra.mxu1 %v6617_v36 }
 0x5c3   :  { %3026 = vmatprep.subr.bf16.mxu0 %v7855_v11  ;;  %3069 = vmatprep.subr.bf16.mxu1 %v6621_v3 }
 0x5c6   :  { %3027 = vmatpush1.bf16.msra.mxu0 %v7856_v25  ;;  %3070 = vmatpush1.bf16.msra.mxu1 %v6625_v46 }
 0x5c7   :  { %3028 = vmatprep.subr.bf16.mxu0 %v7857_v28  ;;  %3071 = vmatprep.subr.bf16.mxu1 %v6629_v24 }
 0x5ca   :  { %3029 = vmatpush1.bf16.msra.mxu0 %v7858_v32  ;;  %3072 = vmatpush1.bf16.msra.mxu1 %v6633_v8 }
 0x5cb   :  { %3030 = vmatprep.subr.bf16.mxu0 %v7859_v33  ;;  %3073 = vmatprep.subr.bf16.mxu1 %v6637_v59 }
 0x5ce   :  { %3031 = vmatpush1.bf16.msra.mxu0 %v7860_v50  ;;  %3074 = vmatpush1.bf16.msra.mxu1 %v6641_v62 }
 0x5cf   :  { %3032 = vmatprep.subr.bf16.mxu0 %v7861_v7  ;;  %3075 = vmatprep.subr.bf16.mxu1 %v6645_v56 }
 0x5d2   :  { %3033 = vmatpush1.bf16.msra.mxu0 %v6648_v54  ;;  %3076 = vmatpush1.bf16.msra.mxu1 %v6651_v45 }
 0x5d3   :  { %3034 = vmatprep.subr.bf16.mxu0 %v6654_v2  ;;  %3077 = vmatprep.subr.bf16.mxu1 %v6657_v30 }
 0x5d6   :  { %3035 = vmatpush1.bf16.msra.mxu0 %v6660_v55  ;;  %3078 = vmatpush1.bf16.msra.mxu1 %v6663_v13 }
 0x5d7   :  { %3036 = vmatprep.subr.bf16.mxu0 %v6666_v53  ;;  %3079 = vmatprep.subr.bf16.mxu1 %v6669_v63 }
 0x5da   :  { %3037 = vmatpush1.bf16.msra.mxu0 %v6672_v57  ;;  %3080 = vmatpush1.bf16.msra.mxu1 %v6675_v27 }
 0x5db   :  { %3155 = vmatprep.subr.bf16.mxu0 %v6678_v61  ;;  %3198 = vmatprep.subr.bf16.mxu1 %v6681_v18 }
 0x5dd   :  { %3055 = vmatmul.mubr.bf16.vlgmr.msra.gmra.mxu0 %v6594_v21  ;;  %3098 = vmatmul.mubr.bf16.vlgmr.msra.gmra.mxu1 %v6594_v21  ;;  %v6748_v21 = vld [vmem:[#allocation12 + $0x40] ss:$16 sps:$4 sm:$0xff]  }
 0x5de   :  { %3156 = vmatpush1.bf16.msra.mxu0 %v6686_v52  ;;  %3199 = vmatpush1.bf16.msra.mxu1 %v6689_v58  ;;  %7894 = vst [vmem:[#allocation31_spill] sm:$0xff] %v6748_v21 }
 0x5df   :  { %3157 = vmatprep.subr.bf16.mxu0 %v6692_v1  ;;  %3200 = vmatprep.subr.bf16.mxu1 %v6695_v47 }
 0x5e0   :  { %3187 = vmatprep.mubr.bf16.mxu0 %v7605_v26  ;;  %3230 = vmatprep.mubr.bf16.mxu1 %v7605_v26 }
 0x5e2   :  { %3158 = vmatpush1.bf16.msra.mxu0 %v6700_v49  ;;  %3201 = vmatpush1.bf16.msra.mxu1 %v6703_v19 }
 0x5e3   :  { %3159 = vmatprep.subr.bf16.mxu0 %v6706_v17  ;;  %3202 = vmatprep.subr.bf16.mxu1 %v6709_v9 }
 0x5e6   :  { %3160 = vmatpush1.bf16.msra.mxu0 %v6712_v34  ;;  %3203 = vmatpush1.bf16.msra.mxu1 %v6715_v48 }
 0x5e7   :  { %3161 = vmatprep.subr.bf16.mxu0 %v6718_v38  ;;  %3204 = vmatprep.subr.bf16.mxu1 %v6721_v29 }
 0x5ea   :  { %3162 = vmatpush1.bf16.msra.mxu0 %v6724_v41  ;;  %3205 = vmatpush1.bf16.msra.mxu1 %v6727_v51 }
 0x5eb   :  { %3163 = vmatprep.subr.bf16.mxu0 %v6730_v39  ;;  %3206 = vmatprep.subr.bf16.mxu1 %v6733_v6  ;;  %v6751_v6 = vld [vmem:[#allocation12 + $0x48] ss:$16 sps:$4 sm:$0xff]  }
 0x5ec   :  { %7895 = vst [vmem:[#allocation58_spill] sm:$0xff] %v6751_v6 }
 0x5ee   :  { %3164 = vmatpush1.bf16.msra.mxu0 %v6736_v5  ;;  %3207 = vmatpush1.bf16.msra.mxu1 %v6739_v16  ;;  %v6754_v5 = vld [vmem:[#allocation12 + $0x24] ss:$16 sps:$4 sm:$0xff]   ;;  %v6757_v16 = vld [vmem:[#allocation12 + $0x2c] ss:$16 sps:$4 sm:$0xff]  }
 0x5ef   :  { %3165 = vmatprep.subr.bf16.mxu0 %v6742_v60  ;;  %3208 = vmatprep.subr.bf16.mxu1 %v6745_v43  ;;  %7896 = vst [vmem:[#allocation68_spill] sm:$0xff] %v6754_v5  ;;  %7897 = vst [vmem:[#allocation70_spill] sm:$0xff] %v6757_v16  ;;  %v6760_v60 = vld [vmem:[#allocation12 + $0x20] ss:$16 sps:$4 sm:$0xff]   ;;  %v6763_v43 = vld [vmem:[#allocation12 + $0x28] ss:$16 sps:$4 sm:$0xff]  }
 0x5f0   :  { %7898 = vst [vmem:[#allocation81_spill] sm:$0xff] %v6760_v60  ;;  %7899 = vst [vmem:[#allocation74_spill] sm:$0xff] %v6763_v43 }
 0x5f2   :  { %3166 = vmatpush1.bf16.msra.mxu0 %v6748_v21  ;;  %3209 = vmatpush1.bf16.msra.mxu1 %v6751_v6  ;;  %v6766_v21 = vld [vmem:[#allocation12 + $0x4] ss:$16 sps:$4 sm:$0xff]   ;;  %v6769_v6 = vld [vmem:[#allocation12 + $0xc] ss:$16 sps:$4 sm:$0xff]  }
 0x5f3   :  { %3167 = vmatprep.subr.bf16.mxu0 %v6754_v5  ;;  %3210 = vmatprep.subr.bf16.mxu1 %v6757_v16  ;;  %7900 = vst [vmem:[#allocation72_spill] sm:$0xff] %v6766_v21  ;;  %7901 = vst [vmem:[#allocation85_spill] sm:$0xff] %v6769_v6  ;;  %v6772_v5 = vld [vmem:[#allocation12] ss:$16 sps:$4 sm:$0xff]   ;;  %v6775_v16 = vld [vmem:[#allocation12 + $0x8] ss:$16 sps:$4 sm:$0xff]  }
 0x5f4   :  { %7902 = vst [vmem:[#allocation86_spill] sm:$0xff] %v6772_v5  ;;  %7903 = vst [vmem:[#allocation83_spill] sm:$0xff] %v6775_v16 }
 0x5f6   :  { %3168 = vmatpush1.bf16.msra.mxu0 %v6760_v60  ;;  %3211 = vmatpush1.bf16.msra.mxu1 %v6763_v43  ;;  %v6778_v60 = vld [vmem:[#allocation10 + $0xe4] ss:$16 sps:$4 sm:$0xff]   ;;  %v6781_v43 = vld [vmem:[#allocation10 + $0xec] ss:$16 sps:$4 sm:$0xff]  }
 0x5f7   :  { %3169 = vmatprep.subr.bf16.mxu0 %v6766_v21  ;;  %3212 = vmatprep.subr.bf16.mxu1 %v6769_v6  ;;  %7904 = vst [vmem:[#allocation32_spill] sm:$0xff] %v6778_v60  ;;  %7905 = vst [vmem:[#allocation33_spill] sm:$0xff] %v6781_v43 }
 0x5fa   :  { %3170 = vmatpush1.bf16.msra.mxu0 %v6772_v5  ;;  %3213 = vmatpush1.bf16.msra.mxu1 %v6775_v16 }
 0x5fb   :  { %3241 = vmatprep.subr.bf16.mxu0 %v6778_v60  ;;  %3284 = vmatprep.subr.bf16.mxu1 %v6781_v43 }
 0x65d   :  { %v2828_v21 = vpop.f32.mrf.mxu0  ;;  %v2871_v39 = vpop.f32.mrf.mxu1 }
 0x65f   :  { %v2830_v51 = vpop.f32.mrf.mxu0  ;;  %v2873_v6 = vpop.f32.mrf.mxu1 }
 0x661   :  { %v2832_v41 = vpop.f32.mrf.mxu0  ;;  %v2875_v29 = vpop.f32.mrf.mxu1 }
 0x663   :  { %v2834_v38 = vpop.f32.mrf.mxu0  ;;  %v2877_v5 = vpop.f32.mrf.mxu1 }
 0x67d   :  { %v2914_v48 = vpop.f32.mrf.mxu0  ;;  %v2957_v34 = vpop.f32.mrf.mxu1 }
 0x67e   :  { %v2915_v9 = vadd.f32 %v2914_v48, %v2828_v21  ;;  %v2958_v60 = vadd.f32 %v2957_v34, %v2871_v39 }
 0x67f   :  { %v2916_v16 = vpop.f32.mrf.mxu0  ;;  %v2959_v17 = vpop.f32.mrf.mxu1 }
 0x680   :  { %v2966_v19 = vadd.f32 %v2915_v9, %v5915_v0  ;;  %v2917_v49 = vadd.f32 %v2916_v16, %v2830_v51  ;;  %v2968_v61 = vadd.f32 %v2958_v60, %v5924_v23 }
 0x681   :  { %v2918_v47 = vpop.f32.mrf.mxu0  ;;  %v2961_v52 = vpop.f32.mrf.mxu1 }
 0x682   :  { %v2974_v1 = vmul.f32 0.5, %v2966_v19  ;;  %v2967_v43 = vadd.f32 %v2917_v49, %v5919_v12  ;;  %v2919_v58 = vadd.f32 %v2918_v47, %v2832_v41  ;;  %v2962_v21 = vadd.f32 %v2961_v52, %v2875_v29 }
 0x683   :  { %v2920_v18 = vpop.f32.mrf.mxu0  ;;  %v2963_v19 = vpop.f32.mrf.mxu1  ;;  %v2960_v49 = vadd.f32 %v2959_v17, %v2873_v6 }
 0x684   :  { %4782 = vtanh.f32 %v2974_v1  ;;  %v2975_v27 = vmul.f32 0.5, %v2967_v43  ;;  %v2921_v57 = vadd.f32 %v2920_v18, %v2834_v38  ;;  %v2970_v48 = vadd.f32 %v2919_v58, %v5915_v0 }
 0x685   :  { %v2972_v47 = vadd.f32 %v2962_v21, %v5924_v23  ;;  %v2964_v1 = vadd.f32 %v2963_v19, %v2877_v5  ;;  %v2969_v41 = vadd.f32 %v2960_v49, %v5933_v44 }
 0x686   :  { %4784 = vtanh.f32 %v2975_v27  ;;  %v2971_v9 = vadd.f32 %v2921_v57, %v5919_v12  ;;  %v2978_v34 = vmul.f32 0.5, %v2970_v48 }
 0x687   :  { %4786 = vtanh.f32 %v2968_v61  ;;  %v2973_v18 = vadd.f32 %v2964_v1, %v5933_v44  ;;  %v2977_v38 = vmul.f32 0.5, %v2969_v41 }
 0x688   :  { %v2979_v51 = vmul.f32 0.5, %v2971_v9  ;;  %4788 = vtanh.f32 %v2978_v34 }
 0x689   :  { %v2981_v61 = vmul.f32 0.5, %v2973_v18  ;;  %v7906_v18 = vld [vmem:[#allocation96_spill] sm:$0xff] }
 0x68a   :  { %4790 = vtanh.f32 %v2979_v51 }
 0x68b   :  { %4792 = vtanh.f32 %v2972_v47 }
 0x68c   :  { %4794 = vtanh.f32 %v2977_v38  ;;  %v7907_v38 = vld [vmem:[#allocation98_spill] sm:$0xff] }
 0x68d   :  { %4796 = vtanh.f32 %v2981_v61 }
 0x691   :  { %v4783_v58 = vpop.eup %4782 }
 0x692   :  { %v2990_v27 = vmul.f32 0.5, %v4783_v58 }
 0x693   :  { %v4785_v52 = vpop.eup %4784 }
 0x694   :  { %v2992_v57 = vadd.f32 0.5, %v2990_v27  ;;  %v2994_v29 = vmul.f32 0.5, %v4785_v52  ;;  %v4787_v39 = vpop.eup %4786 }
 0x695   :  { %v4789_v16 = vpop.eup %4788 }
 0x696   :  { %v2996_v60 = vadd.f32 0.5, %v2994_v29  ;;  %v2991_v48 = vmul.f32 0.5, %v4789_v16  ;;  %v3004_v6 = vmul.f32 %v4787_v39, %v2992_v57  ;;  %v7908_v29 = vld [vmem:[#allocation108_spill] sm:$0xff] }
 0x697   :  { %v4791_v43 = vpop.eup %4790  ;;  %v7909_v16 = vld [vmem:[#allocation100_spill] sm:$0xff] }
 0x698   :  { %v3002_v17 = vmul.f32 %v2996_v60, %v6541_v22  ;;  %v2995_v5 = vmul.f32 0.5, %v4791_v43  ;;  %v2993_v21 = vadd.f32 0.5, %v2991_v48  ;;  %v4793_v51 = vpop.eup %4792 }
 0x69a   :  { %v6793_v9 = vadd.f32 %v3004_v6, %v3002_v17  ;;  %v2997_v34 = vadd.f32 0.5, %v2995_v5  ;;  %v3005_v47 = vmul.f32 %v4793_v51, %v2993_v21  ;;  %v4795_v17 = vpop.eup %4794  ;;  %v7910_v5 = vld [vmem:[#allocation103_spill] sm:$0xff]  ;;  %v7911_v51 = vld [vmem:[#allocation110_spill] sm:$0xff] }
 0x69c   :  { %v3003_v19 = vmul.f32 %v2997_v34, %v6545_v14  ;;  %4798 = vtanh.f32 %v6793_v9  ;;  %v4797_v34 = vpop.eup %4796 }
 0x69d   :  { %v3056_v49 = vpop.f32.mrf.mxu0  ;;  %v3099_v1 = vpop.f32.mrf.mxu1 }
 0x69e   :  { %v6797_v41 = vadd.f32 %v3005_v47, %v3003_v19  ;;  %v3108_v58 = vadd.f32 %v3056_v49, %v7906_v18  ;;  %v3110_v61 = vadd.f32 %v3099_v1, %v7908_v29  ;;  %v2998_v49 = vmul.f32 0.5, %v4795_v17 }
 0x69f   :  { %v3058_v22 = vpop.f32.mrf.mxu0  ;;  %v3101_v27 = vpop.f32.mrf.mxu1  ;;  %v2999_v1 = vmul.f32 0.5, %v4797_v34 }
 0x6a0   :  { %4800 = vtanh.f32 %v6797_v41  ;;  %v3116_v52 = vmul.f32 0.5, %v3108_v58  ;;  %v3109_v57 = vadd.f32 %v3058_v22, %v7907_v38  ;;  %v3000_v22 = vadd.f32 0.5, %v2998_v49 }
 0x6a1   :  { %v3060_v39 = vpop.f32.mrf.mxu0  ;;  %v3103_v43 = vpop.f32.mrf.mxu1 }
 0x6a2   :  { %4802 = vtanh.f32 %v3116_v52  ;;  %v3117_v14 = vmul.f32 0.5, %v3109_v57  ;;  %v3112_v60 = vadd.f32 %v3060_v39, %v7909_v16  ;;  %v3114_v19 = vadd.f32 %v3103_v43, %v7911_v51  ;;  %v7912_v57 = vld [vmem:[#allocation109_spill] sm:$0xff]  ;;  %v7913_v39 = vld [vmem:[#allocation111_spill] sm:$0xff] }
 0x6a3   :  { %v3062_v48 = vpop.f32.mrf.mxu0  ;;  %v3105_v58 = vpop.f32.mrf.mxu1  ;;  %v3001_v52 = vadd.f32 0.5, %v2999_v1  ;;  %v3111_v29 = vadd.f32 %v3101_v27, %v7912_v57  ;;  %v6811_v27 = vld [vmem:[#allocation10 + $0xe8] ss:$16 sps:$4 sm:$0xff]  }
 0x6a4   :  { %4804 = vtanh.f32 %v3117_v14  ;;  %v3120_v6 = vmul.f32 0.5, %v3112_v60  ;;  %v3113_v21 = vadd.f32 %v3062_v48, %v7910_v5  ;;  %v3115_v14 = vadd.f32 %v3105_v58, %v7913_v39  ;;  %v6814_v58 = vld [vmem:[#allocation10 + $0xc4] ss:$16 sps:$4 sm:$0xff]  }
 0x6a5   :  { %4806 = vtanh.f32 %v3110_v61  ;;  %v3119_v5 = vmul.f32 0.5, %v3111_v29 }
 0x6a6   :  { %4808 = vtanh.f32 %v3120_v6  ;;  %v3121_v47 = vmul.f32 0.5, %v3113_v21  ;;  %v3123_v51 = vmul.f32 0.5, %v3115_v14  ;;  %v6823_v14 = vld [vmem:[#allocation10 + $0xc0] ss:$16 sps:$4 sm:$0xff]  }
 0x6a8   :  { %4810 = vtanh.f32 %v3121_v47  ;;  %v6808_v47 = vld [vmem:[#allocation10 + $0xe0] ss:$16 sps:$4 sm:$0xff]  }
 0x6a9   :  { %4812 = vtanh.f32 %v3114_v19  ;;  %v4799_v18 = vpop.eup %4798 }
 0x6aa   :  { %v3010_v16 = vmul.f32 %v4799_v18, %v3000_v22  ;;  %v6817_v22 = vld [vmem:[#allocation10 + $0xcc] ss:$16 sps:$4 sm:$0xff]   ;;  %4814 = vtanh.f32 %v3119_v5  ;;  %v6838_v5 = vld [vmem:[#allocation10 + $0xa0] ss:$16 sps:$4 sm:$0xff]  }
 0x6ab   :  { %4816 = vtanh.f32 %v3123_v51  ;;  %v6850_v51 = vld [vmem:[#allocation10 + $0x8c] ss:$16 sps:$4 sm:$0xff]  }
 0x6ad   :  { %v4801_v38 = vpop.eup %4800 }
 0x6ae   :  { %v3011_v60 = vmul.f32 %v4801_v38, %v3001_v52 }
 0x6af   :  { %v4803_v61 = vpop.eup %4802 }
 0x6b0   :  { %v3132_v48 = vmul.f32 0.5, %v4803_v61  ;;  %v3012_v6 = vpack.c.bf16 %v3011_v60, %v3010_v16  ;;  %v6826_v16 = vld [vmem:[#allocation10 + $0xc8] ss:$16 sps:$4 sm:$0xff]  }
 0x6b1   :  { %v4805_v43 = vpop.eup %4804 }
 0x6b2   :  { %v4807_v17 = vpop.eup %4806  ;;  %v3134_v21 = vadd.f32 0.5, %v3132_v48  ;;  %v3136_v34 = vmul.f32 0.5, %v4805_v43  ;;  %3188 = vmatmul.mubr.bf16.vlgmr.msra.gmra.mxu0 %v3012_v6  ;;  %3231 = vmatmul.mubr.bf16.vlgmr.msra.gmra.mxu1 %v3012_v6  ;;  %v6831_v6 = vld [vmem:[#allocation10 + $0xa4] ss:$16 sps:$4 sm:$0xff]  }
 0x6b3   :  { %v4809_v19 = vpop.eup %4808  ;;  %3242 = vmatpush1.bf16.msra.mxu0 %v6808_v47  ;;  %3285 = vmatpush1.bf16.msra.mxu1 %v6811_v27 }
 0x6b4   :  { %v3138_v49 = vadd.f32 0.5, %v3136_v34  ;;  %v3146_v1 = vmul.f32 %v4807_v17, %v3134_v21  ;;  %v3133_v18 = vmul.f32 0.5, %v4809_v19  ;;  %3243 = vmatprep.subr.bf16.mxu0 %v6814_v58  ;;  %3286 = vmatprep.subr.bf16.mxu1 %v6817_v22  ;;  %v6841_v17 = vld [vmem:[#allocation10 + $0xa8] ss:$16 sps:$4 sm:$0xff]   ;;  %v6847_v34 = vld [vmem:[#allocation10 + $0x84] ss:$16 sps:$4 sm:$0xff]  }
 0x6b5   :  { %v4811_v52 = vpop.eup %4810  ;;  %3273 = vmatprep.mubr.bf16.mxu0 %v7605_v26  ;;  %3316 = vmatprep.mubr.bf16.mxu1 %v7605_v26  ;;  %v6857_v19 = vld [vmem:[#allocation10 + $0x88] ss:$16 sps:$4 sm:$0xff]  }
 0x6b6   :  { %v3144_v38 = vmul.f32 %v3138_v49, %v6565_v4  ;;  %v3135_v57 = vadd.f32 0.5, %v3133_v18  ;;  %v3137_v29 = vmul.f32 0.5, %v4811_v52  ;;  %v4813_v39 = vpop.eup %4812  ;;  %v6834_v4 = vld [vmem:[#allocation10 + $0xac] ss:$16 sps:$4 sm:$0xff]   ;;  %7915 = vst [vmem:[#allocation35_spill] sm:$0xff] %v6857_v19 }
 0x6b7   :  { %3244 = vmatpush1.bf16.msra.mxu0 %v6823_v14  ;;  %3287 = vmatpush1.bf16.msra.mxu1 %v6826_v16  ;;  %v6860_v49 = vld [vmem:[#allocation10 + $0x64] ss:$16 sps:$4 sm:$0xff]   ;;  %v4815_v18 = vpop.eup %4814 }
 0x6b8   :  { %v6829_v60 = vadd.f32 %v3146_v1, %v3144_v38  ;;  %v3139_v61 = vadd.f32 0.5, %v3137_v29  ;;  %v3147_v48 = vmul.f32 %v4813_v39, %v3135_v57  ;;  %3245 = vmatprep.subr.bf16.mxu0 %v6831_v6  ;;  %3288 = vmatprep.subr.bf16.mxu1 %v6834_v4  ;;  %7916 = vst [vmem:[#allocation36_spill] sm:$0xff] %v6860_v49  ;;  %v6863_v1 = vld [vmem:[#allocation10 + $0x6c] ss:$16 sps:$4 sm:$0xff]   ;;  %v4817_v52 = vpop.eup %4816  ;;  %v6866_v38 = vld [vmem:[#allocation10 + $0x60] ss:$16 sps:$4 sm:$0xff]  }
 0x6b9   :  { %7917 = vst [vmem:[#allocation37_spill] sm:$0xff] %v6863_v1  ;;  %7918 = vst [vmem:[#allocation38_spill] sm:$0xff] %v6866_v38  ;;  %v6869_v57 = vld [vmem:[#allocation10 + $0x68] ss:$16 sps:$4 sm:$0xff]   ;;  %v6872_v29 = vld [vmem:[#allocation10 + $0x44] ss:$16 sps:$4 sm:$0xff]  }
 0x6ba   :  { %v3145_v43 = vmul.f32 %v3139_v61, %v6573_v20  ;;  %4818 = vtanh.f32 %v6829_v60  ;;  %v6854_v20 = vld [vmem:[#allocation10 + $0x80] ss:$16 sps:$4 sm:$0xff]   ;;  %7919 = vst [vmem:[#allocation39_spill] sm:$0xff] %v6869_v57  ;;  %7920 = vst [vmem:[#allocation40_spill] sm:$0xff] %v6872_v29  ;;  %v6875_v39 = vld [vmem:[#allocation10 + $0x4c] ss:$16 sps:$4 sm:$0xff]  }
 0x6bb   :  { %3246 = vmatpush1.bf16.msra.mxu0 %v6838_v5  ;;  %3289 = vmatpush1.bf16.msra.mxu1 %v6841_v17  ;;  %7914 = vst [vmem:[#allocation34_spill] sm:$0xff] %v6854_v20  ;;  %7921 = vst [vmem:[#allocation41_spill] sm:$0xff] %v6875_v39  ;;  %v3140_v61 = vmul.f32 0.5, %v4815_v18 }
 0x6bc   :  { %v6845_v21 = vadd.f32 %v3147_v48, %v3145_v43  ;;  %3247 = vmatprep.subr.bf16.mxu0 %v6847_v34  ;;  %3290 = vmatprep.subr.bf16.mxu1 %v6850_v51  ;;  %v3141_v48 = vmul.f32 0.5, %v4817_v52  ;;  %v6878_v43 = vld [vmem:[#allocation10 + $0x40] ss:$16 sps:$4 sm:$0xff]  }
 0x6bd   :  { %7922 = vst [vmem:[#allocation42_spill] sm:$0xff] %v6878_v43 }
 0x6be   :  { %4820 = vtanh.f32 %v6845_v21  ;;  %v3143_v18 = vadd.f32 0.5, %v3141_v48  ;;  %v6902_v48 = vld [vmem:[#allocation10] ss:$16 sps:$4 sm:$0xff]  }
 0x6bf   :  { %3248 = vmatpush1.bf16.msra.mxu0 %v6854_v20  ;;  %3291 = vmatpush1.bf16.msra.mxu1 %v6857_v19  ;;  %v6896_v20 = vld [vmem:[#allocation10 + $0x4] ss:$16 sps:$4 sm:$0xff]  }
 0x6c0   :  { %3249 = vmatprep.subr.bf16.mxu0 %v6860_v49  ;;  %3292 = vmatprep.subr.bf16.mxu1 %v6863_v1  ;;  %v6881_v1 = vld [vmem:[#allocation10 + $0x48] ss:$16 sps:$4 sm:$0xff]   ;;  %v6890_v49 = vld [vmem:[#allocation10 + $0x20] ss:$16 sps:$4 sm:$0xff]  }
 0x6c1   :  { %7923 = vst [vmem:[#allocation43_spill] sm:$0xff] %v6881_v1  ;;  %7925 = vst [vmem:[#allocation45_spill] sm:$0xff] %v6890_v49 }
 0x6c3   :  { %3250 = vmatpush1.bf16.msra.mxu0 %v6866_v38  ;;  %3293 = vmatpush1.bf16.msra.mxu1 %v6869_v57  ;;  %v6884_v38 = vld [vmem:[#allocation10 + $0x24] ss:$16 sps:$4 sm:$0xff]   ;;  %v6887_v57 = vld [vmem:[#allocation10 + $0x2c] ss:$16 sps:$4 sm:$0xff]  }
 0x6c4   :  { %3251 = vmatprep.subr.bf16.mxu0 %v6872_v29  ;;  %3294 = vmatprep.subr.bf16.mxu1 %v6875_v39  ;;  %7924 = vst [vmem:[#allocation44_spill] sm:$0xff] %v6884_v38  ;;  %v3142_v39 = vadd.f32 0.5, %v3140_v61 }
 0x6c7   :  { %3252 = vmatpush1.bf16.msra.mxu0 %v6878_v43  ;;  %3295 = vmatpush1.bf16.msra.mxu1 %v6881_v1  ;;  %v4819_v29 = vpop.eup %4818  ;;  %v6893_v43 = vld [vmem:[#allocation10 + $0x28] ss:$16 sps:$4 sm:$0xff]  }
 0x6c8   :  { %3253 = vmatprep.subr.bf16.mxu0 %v6884_v38  ;;  %3296 = vmatprep.subr.bf16.mxu1 %v6887_v57  ;;  %v3152_v1 = vmul.f32 %v4819_v29, %v3142_v39  ;;  %v6899_v38 = vld [vmem:[#allocation10 + $0xc] ss:$16 sps:$4 sm:$0xff]   ;;  %v7940_v39 = vld [vmem:[#allocation19_spill] sm:$0xff] }
 0x6c9   :  { %v7939_v29 = vld [vmem:[#allocation20_spill] sm:$0xff] }
 0x6cb   :  { %v4821_v52 = vpop.eup %4820  ;;  %3254 = vmatpush1.bf16.msra.mxu0 %v6890_v49  ;;  %3297 = vmatpush1.bf16.msra.mxu1 %v6893_v43  ;;  %v6905_v49 = vld [vmem:[#allocation10 + $0x8] ss:$16 sps:$4 sm:$0xff]  }
 0x6cc   :  { %v3153_v19 = vmul.f32 %v4821_v52, %v3143_v18  ;;  %3255 = vmatprep.subr.bf16.mxu0 %v6896_v20  ;;  %3298 = vmatprep.subr.bf16.mxu1 %v6899_v38  ;;  %7926 = vst [vmem:[#allocation46_spill] sm:$0xff] %v6905_v49  ;;  %v7941_v18 = vld [vmem:[#allocation22_spill] sm:$0xff]  ;;  %v7942_v52 = vld [vmem:[#allocation21_spill] sm:$0xff] }
 0x6ce   :  { %v3154_v61 = vpack.c.bf16 %v3153_v19, %v3152_v1  ;;  %v7937_v19 = vld [vmem:[#allocation18_spill] sm:$0xff]  ;;  %v7938_v1 = vld [vmem:[#allocation17_spill] sm:$0xff] }
 0x6cf   :  { %3256 = vmatpush1.bf16.msra.mxu0 %v6902_v48  ;;  %3299 = vmatpush1.bf16.msra.mxu1 %v6905_v49 }
 0x6d0   :  { %3383 = vmatprep.subr.bf16.mxu0 %v6598_v15  ;;  %3426 = vmatprep.subr.bf16.mxu1 %v6601_v37 }
 0x6d2   :  { %3274 = vmatmul.mubr.bf16.vlgmr.msra.gmra.mxu0 %v3154_v61  ;;  %3317 = vmatmul.mubr.bf16.vlgmr.msra.gmra.mxu1 %v3154_v61 }
 0x6d3   :  { %3384 = vmatpush1.bf16.msra.mxu0 %v7852_v40  ;;  %3427 = vmatpush1.bf16.msra.mxu1 %v6607_v35  ;;  %v7927_v40 = vld [vmem:[#allocation55_spill] sm:$0xff] }
 0x6d4   :  { %3385 = vmatprep.subr.bf16.mxu0 %v7853_v42  ;;  %3428 = vmatprep.subr.bf16.mxu1 %v6611_v31  ;;  %v7928_v42 = vld [vmem:[#allocation56_spill] sm:$0xff] }
 0x6d5   :  { %3415 = vmatprep.mubr.bf16.mxu0 %v7605_v26  ;;  %3458 = vmatprep.mubr.bf16.mxu1 %v7605_v26 }
 0x6d7   :  { %3386 = vmatpush1.bf16.msra.mxu0 %v7854_v10  ;;  %3429 = vmatpush1.bf16.msra.mxu1 %v6617_v36  ;;  %v7929_v10 = vld [vmem:[#allocation57_spill] sm:$0xff] }
 0x6d8   :  { %3387 = vmatprep.subr.bf16.mxu0 %v7855_v11  ;;  %3430 = vmatprep.subr.bf16.mxu1 %v6621_v3  ;;  %v7930_v11 = vld [vmem:[#allocation59_spill] sm:$0xff] }
 0x6db   :  { %3388 = vmatpush1.bf16.msra.mxu0 %v7856_v25  ;;  %3431 = vmatpush1.bf16.msra.mxu1 %v6625_v46  ;;  %v7931_v25 = vld [vmem:[#allocation60_spill] sm:$0xff] }
 0x6dc   :  { %3389 = vmatprep.subr.bf16.mxu0 %v7857_v28  ;;  %3432 = vmatprep.subr.bf16.mxu1 %v6629_v24  ;;  %v7932_v28 = vld [vmem:[#allocation61_spill] sm:$0xff] }
 0x6df   :  { %3390 = vmatpush1.bf16.msra.mxu0 %v7858_v32  ;;  %3433 = vmatpush1.bf16.msra.mxu1 %v6633_v8  ;;  %v7933_v32 = vld [vmem:[#allocation62_spill] sm:$0xff] }
 0x6e0   :  { %3391 = vmatprep.subr.bf16.mxu0 %v7859_v33  ;;  %3434 = vmatprep.subr.bf16.mxu1 %v6637_v59  ;;  %v7934_v33 = vld [vmem:[#allocation76_spill] sm:$0xff] }
 0x6e3   :  { %3392 = vmatpush1.bf16.msra.mxu0 %v7860_v50  ;;  %3435 = vmatpush1.bf16.msra.mxu1 %v6641_v62  ;;  %v7935_v50 = vld [vmem:[#allocation16_spill] sm:$0xff] }
 0x6e4   :  { %3393 = vmatprep.subr.bf16.mxu0 %v7861_v7  ;;  %3436 = vmatprep.subr.bf16.mxu1 %v6645_v56  ;;  %v7936_v7 = vld [vmem:[#allocation15_spill] sm:$0xff] }
 0x6e7   :  { %3394 = vmatpush1.bf16.msra.mxu0 %v6648_v54  ;;  %3437 = vmatpush1.bf16.msra.mxu1 %v6651_v45 }
 0x6e8   :  { %3395 = vmatprep.subr.bf16.mxu0 %v6654_v2  ;;  %3438 = vmatprep.subr.bf16.mxu1 %v6657_v30 }
 0x6eb   :  { %3396 = vmatpush1.bf16.msra.mxu0 %v6660_v55  ;;  %3439 = vmatpush1.bf16.msra.mxu1 %v6663_v13 }
 0x6ec   :  { %3397 = vmatprep.subr.bf16.mxu0 %v6666_v53  ;;  %3440 = vmatprep.subr.bf16.mxu1 %v6669_v63 }
 0x6ef   :  { %3398 = vmatpush1.bf16.msra.mxu0 %v7927_v40  ;;  %3441 = vmatpush1.bf16.msra.mxu1 %v7928_v42 }
 0x6f0   :  { %3516 = vmatprep.subr.bf16.mxu0 %v7929_v10  ;;  %3559 = vmatprep.subr.bf16.mxu1 %v7930_v11 }
 0x6f2   :  { %3416 = vmatmul.mubr.bf16.vlgmr.msra.gmra.mxu0 %v3154_v61  ;;  %3459 = vmatmul.mubr.bf16.vlgmr.msra.gmra.mxu1 %v3154_v61  ;;  %v7943_v61 = vld [vmem:[#allocation24_spill] sm:$0xff] }
 0x6f3   :  { %3517 = vmatpush1.bf16.msra.mxu0 %v7931_v25  ;;  %3560 = vmatpush1.bf16.msra.mxu1 %v7932_v28 }
 0x6f4   :  { %3518 = vmatprep.subr.bf16.mxu0 %v7933_v32  ;;  %3561 = vmatprep.subr.bf16.mxu1 %v7934_v33  ;;  %v7944_v33 = vld [vmem:[#allocation23_spill] sm:$0xff]  ;;  %v7945_v32 = vld [vmem:[#allocation26_spill] sm:$0xff] }
 0x6f5   :  { %3548 = vmatprep.mubr.bf16.mxu0 %v7605_v26  ;;  %3591 = vmatprep.mubr.bf16.mxu1 %v7605_v26 }
 0x6f7   :  { %3519 = vmatpush1.bf16.msra.mxu0 %v7935_v50  ;;  %3562 = vmatpush1.bf16.msra.mxu1 %v7936_v7  ;;  %v7946_v50 = vld [vmem:[#allocation25_spill] sm:$0xff]  ;;  %v7947_v7 = vld [vmem:[#allocation28_spill] sm:$0xff] }
 0x6f8   :  { %3520 = vmatprep.subr.bf16.mxu0 %v7937_v19  ;;  %3563 = vmatprep.subr.bf16.mxu1 %v7938_v1  ;;  %v7948_v19 = vld [vmem:[#allocation27_spill] sm:$0xff]  ;;  %v7949_v1 = vld [vmem:[#allocation29_spill] sm:$0xff] }
 0x6fb   :  { %3521 = vmatpush1.bf16.msra.mxu0 %v7939_v29  ;;  %3564 = vmatpush1.bf16.msra.mxu1 %v7940_v39  ;;  %v7950_v29 = vld [vmem:[#allocation30_spill] sm:$0xff]  ;;  %v7951_v39 = vld [vmem:[#allocation31_spill] sm:$0xff] }
 0x6fc   :  { %3522 = vmatprep.subr.bf16.mxu0 %v7941_v18  ;;  %3565 = vmatprep.subr.bf16.mxu1 %v7942_v52  ;;  %v7952_v18 = vld [vmem:[#allocation58_spill] sm:$0xff]  ;;  %v7953_v52 = vld [vmem:[#allocation68_spill] sm:$0xff] }
 0x6ff   :  { %3523 = vmatpush1.bf16.msra.mxu0 %v7943_v61  ;;  %3566 = vmatpush1.bf16.msra.mxu1 %v7944_v33  ;;  %v7954_v61 = vld [vmem:[#allocation70_spill] sm:$0xff]  ;;  %v7955_v33 = vld [vmem:[#allocation81_spill] sm:$0xff] }
 0x700   :  { %3524 = vmatprep.subr.bf16.mxu0 %v7945_v32  ;;  %3567 = vmatprep.subr.bf16.mxu1 %v7946_v50  ;;  %v7956_v32 = vld [vmem:[#allocation74_spill] sm:$0xff]  ;;  %v7957_v50 = vld [vmem:[#allocation72_spill] sm:$0xff] }
 0x703   :  { %3525 = vmatpush1.bf16.msra.mxu0 %v7947_v7  ;;  %3568 = vmatpush1.bf16.msra.mxu1 %v7948_v19  ;;  %v7958_v7 = vld [vmem:[#allocation85_spill] sm:$0xff]  ;;  %v7959_v19 = vld [vmem:[#allocation86_spill] sm:$0xff] }
 0x704   :  { %3526 = vmatprep.subr.bf16.mxu0 %v7949_v1  ;;  %3569 = vmatprep.subr.bf16.mxu1 %v7950_v29  ;;  %v7960_v1 = vld [vmem:[#allocation83_spill] sm:$0xff]  ;;  %v7961_v29 = vld [vmem:[#allocation32_spill] sm:$0xff] }
 0x707   :  { %3527 = vmatpush1.bf16.msra.mxu0 %v7951_v39  ;;  %3570 = vmatpush1.bf16.msra.mxu1 %v7952_v18  ;;  %v7962_v39 = vld [vmem:[#allocation33_spill] sm:$0xff] }
 0x708   :  { %3528 = vmatprep.subr.bf16.mxu0 %v7953_v52  ;;  %3571 = vmatprep.subr.bf16.mxu1 %v7954_v61 }
 0x70b   :  { %3529 = vmatpush1.bf16.msra.mxu0 %v7955_v33  ;;  %3572 = vmatpush1.bf16.msra.mxu1 %v7956_v32 }
 0x70c   :  { %3530 = vmatprep.subr.bf16.mxu0 %v7957_v50  ;;  %3573 = vmatprep.subr.bf16.mxu1 %v7958_v7 }
 0x70f   :  { %3531 = vmatpush1.bf16.msra.mxu0 %v7959_v19  ;;  %3574 = vmatpush1.bf16.msra.mxu1 %v7960_v1 }
 0x710   :  { %3602 = vmatprep.subr.bf16.mxu0 %v7961_v29  ;;  %3645 = vmatprep.subr.bf16.mxu1 %v7962_v39 }
 0x772   :  { %v3189_v18 = vpop.f32.mrf.mxu0  ;;  %v3232_v52 = vpop.f32.mrf.mxu1 }
 0x774   :  { %v3191_v28 = vpop.f32.mrf.mxu0  ;;  %v3234_v61 = vpop.f32.mrf.mxu1 }
 0x776   :  { %v3193_v25 = vpop.f32.mrf.mxu0  ;;  %v3236_v33 = vpop.f32.mrf.mxu1 }
 0x778   :  { %v3195_v11 = vpop.f32.mrf.mxu0  ;;  %v3238_v32 = vpop.f32.mrf.mxu1 }
 0x792   :  { %v3275_v10 = vpop.f32.mrf.mxu0  ;;  %v3318_v50 = vpop.f32.mrf.mxu1 }
 0x793   :  { %v3276_v42 = vadd.f32 %v3275_v10, %v3189_v18  ;;  %v3319_v1 = vadd.f32 %v3318_v50, %v3232_v52 }
 0x794   :  { %v3277_v7 = vpop.f32.mrf.mxu0  ;;  %v3320_v40 = vpop.f32.mrf.mxu1 }
 0x795   :  { %v3327_v19 = vadd.f32 %v3276_v42, %v5915_v0  ;;  %v3278_v63 = vadd.f32 %v3277_v7, %v3191_v28  ;;  %v3329_v2 = vadd.f32 %v3319_v1, %v5924_v23 }
 0x796   :  { %v3279_v29 = vpop.f32.mrf.mxu0  ;;  %v3322_v55 = vpop.f32.mrf.mxu1 }
 0x797   :  { %v3335_v53 = vmul.f32 0.5, %v3327_v19  ;;  %v3328_v39 = vadd.f32 %v3278_v63, %v5919_v12  ;;  %v3280_v13 = vadd.f32 %v3279_v29, %v3193_v25  ;;  %v3323_v18 = vadd.f32 %v3322_v55, %v3236_v33 }
 0x798   :  { %v3281_v30 = vpop.f32.mrf.mxu0  ;;  %v3324_v7 = vpop.f32.mrf.mxu1  ;;  %v3321_v25 = vadd.f32 %v3320_v40, %v3234_v61 }
 0x799   :  { %4822 = vtanh.f32 %v3335_v53  ;;  %v3336_v45 = vmul.f32 0.5, %v3328_v39  ;;  %v3282_v54 = vadd.f32 %v3281_v30, %v3195_v11  ;;  %v3331_v10 = vadd.f32 %v3280_v13, %v5915_v0 }
 0x79a   :  { %v3333_v63 = vadd.f32 %v3323_v18, %v5924_v23  ;;  %v3325_v53 = vadd.f32 %v3324_v7, %v3238_v32  ;;  %v3330_v19 = vadd.f32 %v3321_v25, %v5933_v44 }
 0x79b   :  { %4824 = vtanh.f32 %v3336_v45  ;;  %v3332_v42 = vadd.f32 %v3282_v54, %v5919_v12  ;;  %v3339_v50 = vmul.f32 0.5, %v3331_v10 }
 0x79c   :  { %4826 = vtanh.f32 %v3329_v2  ;;  %v3334_v30 = vadd.f32 %v3325_v53, %v5933_v44  ;;  %v3338_v11 = vmul.f32 0.5, %v3330_v19 }
 0x79d   :  { %v3340_v28 = vmul.f32 0.5, %v3332_v42  ;;  %4828 = vtanh.f32 %v3339_v50 }
 0x79e   :  { %v3342_v2 = vmul.f32 0.5, %v3334_v30  ;;  %v7963_v30 = vld [vmem:[#allocation64_spill] sm:$0xff] }
 0x79f   :  { %4830 = vtanh.f32 %v3340_v28 }
 0x7a0   :  { %4832 = vtanh.f32 %v3333_v63 }
 0x7a1   :  { %4834 = vtanh.f32 %v3338_v11  ;;  %v7964_v11 = vld [vmem:[#allocation65_spill] sm:$0xff] }
 0x7a2   :  { %4836 = vtanh.f32 %v3342_v2 }
 0x7a6   :  { %v4823_v13 = vpop.eup %4822 }
 0x7a7   :  { %v3351_v45 = vmul.f32 0.5, %v4823_v13 }
 0x7a8   :  { %v4825_v55 = vpop.eup %4824 }
 0x7a9   :  { %v3353_v54 = vadd.f32 0.5, %v3351_v45  ;;  %v3355_v33 = vmul.f32 0.5, %v4825_v55  ;;  %v4827_v1 = vpop.eup %4826 }
 0x7aa   :  { %v4829_v29 = vpop.eup %4828 }
 0x7ab   :  { %v3357_v39 = vadd.f32 0.5, %v3355_v33  ;;  %v3352_v10 = vmul.f32 0.5, %v4829_v29  ;;  %v3365_v32 = vmul.f32 %v4827_v1, %v3353_v54  ;;  %v7965_v33 = vld [vmem:[#allocation112_spill] sm:$0xff]  ;;  %v7967_v29 = vld [vmem:[#allocation63_spill] sm:$0xff] }
 0x7ac   :  { %v4831_v52 = vpop.eup %4830 }
 0x7ad   :  { %v3363_v40 = vmul.f32 %v3357_v39, %v6793_v9  ;;  %v3356_v61 = vmul.f32 0.5, %v4831_v52  ;;  %v3354_v18 = vadd.f32 0.5, %v3352_v10  ;;  %v4833_v28 = vpop.eup %4832  ;;  %v7968_v10 = vld [vmem:[#allocation66_spill] sm:$0xff] }
 0x7af   :  { %v6987_v42 = vadd.f32 %v3365_v32, %v3363_v40  ;;  %v3358_v50 = vadd.f32 0.5, %v3356_v61  ;;  %v3366_v63 = vmul.f32 %v4833_v28, %v3354_v18  ;;  %v4835_v18 = vpop.eup %4834 }
 0x7b1   :  { %v3364_v7 = vmul.f32 %v3358_v50, %v6797_v41  ;;  %4838 = vtanh.f32 %v6987_v42  ;;  %v7966_v41 = vld [vmem:[#allocation67_spill] sm:$0xff] }
 0x7b2   :  { %v3417_v25 = vpop.f32.mrf.mxu0  ;;  %v3460_v53 = vpop.f32.mrf.mxu1  ;;  %v495_v39 = vadd.f32 %v7967_v29, %v7966_v41 }
 0x7b3   :  { %v6991_v19 = vadd.f32 %v3366_v63, %v3364_v7  ;;  %v3469_v13 = vadd.f32 %v3417_v25, %v7963_v30  ;;  %v3471_v2 = vadd.f32 %v3460_v53, %v7965_v33  ;;  %v4837_v7 = vpop.eup %4836  ;;  %v7969_v63 = vld [vmem:[#allocation114_spill] sm:$0xff]  ;;  %v3359_v30 = vmul.f32 0.5, %v4835_v18 }
 0x7b4   :  { %v3419_v9 = vpop.f32.mrf.mxu0  ;;  %v3462_v45 = vpop.f32.mrf.mxu1 }
 0x7b5   :  { %4840 = vtanh.f32 %v6991_v19  ;;  %v3477_v55 = vmul.f32 0.5, %v3469_v13  ;;  %v3470_v54 = vadd.f32 %v3419_v9, %v7964_v11  ;;  %v3360_v13 = vmul.f32 0.5, %v4837_v7 }
 0x7b6   :  { %v3421_v1 = vpop.f32.mrf.mxu0  ;;  %v3464_v32 = vpop.f32.mrf.mxu1  ;;  %v3361_v11 = vadd.f32 0.5, %v3359_v30 }
 0x7b7   :  { %4842 = vtanh.f32 %v3477_v55  ;;  %v3478_v52 = vmul.f32 0.5, %v3470_v54  ;;  %v3473_v40 = vadd.f32 %v3421_v1, %v7968_v10  ;;  %v3475_v25 = vadd.f32 %v3464_v32, %v7969_v63  ;;  %v7970_v1 = vld [vmem:[#allocation113_spill] sm:$0xff] }
 0x7b8   :  { %v3423_v61 = vpop.f32.mrf.mxu0  ;;  %v3466_v55 = vpop.f32.mrf.mxu1  ;;  %v3362_v54 = vadd.f32 0.5, %v3360_v13  ;;  %v3472_v41 = vadd.f32 %v3462_v45, %v7970_v1 }
 0x7b9   :  { %4844 = vtanh.f32 %v3478_v52  ;;  %v3481_v50 = vmul.f32 0.5, %v3473_v40  ;;  %v3474_v28 = vadd.f32 %v3423_v61, %v495_v39  ;;  %v7971_v52 = vld [vmem:[#allocation115_spill] sm:$0xff] }
 0x7ba   :  { %4846 = vtanh.f32 %v3471_v2  ;;  %v3476_v10 = vadd.f32 %v3466_v55, %v7971_v52 }
 0x7bb   :  { %4848 = vtanh.f32 %v3481_v50  ;;  %v3482_v53 = vmul.f32 0.5, %v3474_v28  ;;  %v3480_v28 = vmul.f32 0.5, %v3472_v41 }
 0x7bd   :  { %4850 = vtanh.f32 %v3482_v53 }
 0x7be   :  { %4852 = vtanh.f32 %v3475_v25  ;;  %v4839_v9 = vpop.eup %4838  ;;  %v3484_v25 = vmul.f32 0.5, %v3476_v10 }
 0x7bf   :  { %v3371_v39 = vmul.f32 %v4839_v9, %v3361_v11  ;;  %4854 = vtanh.f32 %v3480_v28  ;;  %v7977_v28 = vld [vmem:[#allocation39_spill] sm:$0xff] }
 0x7c0   :  { %4856 = vtanh.f32 %v3484_v25 }
 0x7c2   :  { %v4841_v33 = vpop.eup %4840 }
 0x7c3   :  { %v3372_v40 = vmul.f32 %v4841_v33, %v3362_v54 }
 0x7c4   :  { %v4843_v2 = vpop.eup %4842 }
 0x7c5   :  { %v3493_v61 = vmul.f32 0.5, %v4843_v2  ;;  %v3373_v50 = vpack.c.bf16 %v3372_v40, %v3371_v39  ;;  %v7972_v39 = vld [vmem:[#allocation34_spill] sm:$0xff]  ;;  %v7973_v40 = vld [vmem:[#allocation35_spill] sm:$0xff]  ;;  %v7974_v2 = vld [vmem:[#allocation36_spill] sm:$0xff] }
 0x7c6   :  { %v4845_v32 = vpop.eup %4844 }
 0x7c7   :  { %v4847_v18 = vpop.eup %4846  ;;  %v3495_v7 = vadd.f32 0.5, %v3493_v61  ;;  %v3497_v63 = vmul.f32 0.5, %v4845_v32  ;;  %3549 = vmatmul.mubr.bf16.vlgmr.msra.gmra.mxu0 %v3373_v50  ;;  %3592 = vmatmul.mubr.bf16.vlgmr.msra.gmra.mxu1 %v3373_v50  ;;  %v7976_v32 = vld [vmem:[#allocation38_spill] sm:$0xff] }
 0x7c8   :  { %v4849_v53 = vpop.eup %4848  ;;  %3603 = vmatpush1.bf16.msra.mxu0 %v6808_v47  ;;  %3646 = vmatpush1.bf16.msra.mxu1 %v6811_v27 }
 0x7c9   :  { %v3499_v45 = vadd.f32 0.5, %v3497_v63  ;;  %v3507_v30 = vmul.f32 %v4847_v18, %v3495_v7  ;;  %v3494_v13 = vmul.f32 0.5, %v4849_v53  ;;  %3604 = vmatprep.subr.bf16.mxu0 %v6814_v58  ;;  %3647 = vmatprep.subr.bf16.mxu1 %v6817_v22  ;;  %v7978_v18 = vld [vmem:[#allocation40_spill] sm:$0xff]  ;;  %v7979_v7 = vld [vmem:[#allocation41_spill] sm:$0xff]  ;;  %v7980_v53 = vld [vmem:[#allocation42_spill] sm:$0xff] }
 0x7ca   :  { %v4851_v9 = vpop.eup %4850  ;;  %3634 = vmatprep.mubr.bf16.mxu0 %v7605_v26  ;;  %3677 = vmatprep.mubr.bf16.mxu1 %v7605_v26 }
 0x7cb   :  { %v3505_v55 = vmul.f32 %v3499_v45, %v6829_v60  ;;  %v3496_v11 = vadd.f32 0.5, %v3494_v13  ;;  %v3498_v54 = vmul.f32 0.5, %v4851_v9  ;;  %v4853_v33 = vpop.eup %4852  ;;  %v7981_v45 = vld [vmem:[#allocation43_spill] sm:$0xff] }
 0x7cc   :  { %3605 = vmatpush1.bf16.msra.mxu0 %v6823_v14  ;;  %3648 = vmatpush1.bf16.msra.mxu1 %v6826_v16  ;;  %v4855_v61 = vpop.eup %4854 }
 0x7cd   :  { %v7012_v1 = vadd.f32 %v3507_v30, %v3505_v55  ;;  %v3500_v41 = vadd.f32 0.5, %v3498_v54  ;;  %v3508_v52 = vmul.f32 %v4853_v33, %v3496_v11  ;;  %3606 = vmatprep.subr.bf16.mxu0 %v6831_v6  ;;  %3649 = vmatprep.subr.bf16.mxu1 %v6834_v4  ;;  %v4857_v50 = vpop.eup %4856  ;;  %v3501_v63 = vmul.f32 0.5, %v4855_v61  ;;  %v7982_v30 = vld [vmem:[#allocation44_spill] sm:$0xff]  ;;  %v7983_v54 = vld [vmem:[#allocation45_spill] sm:$0xff] }
 0x7ce   :  { %v3502_v25 = vmul.f32 0.5, %v4857_v50  ;;  %v5115_v61 = vld [vmem:[#allocation8 + $0xc4] ss:$16 sps:$4 sm:$0xff]   ;;  %v5116_v50 = vld [vmem:[#allocation8 + $0xc0] ss:$16 sps:$4 sm:$0xff]  }
 0x7cf   :  { %v3506_v10 = vmul.f32 %v3500_v41, %v6845_v21  ;;  %4858 = vtanh.f32 %v7012_v1  ;;  %v7975_v21 = vld [vmem:[#allocation37_spill] sm:$0xff]  ;;  %v3503_v9 = vadd.f32 0.5, %v3501_v63 }
 0x7d0   :  { %3607 = vmatpush1.bf16.msra.mxu0 %v6838_v5  ;;  %3650 = vmatpush1.bf16.msra.mxu1 %v6841_v17  ;;  %v3504_v55 = vadd.f32 0.5, %v3502_v25  ;;  %v5121_v63 = vld [vmem:[#allocation8 + $0x64] ss:$16 sps:$4 sm:$0xff]  }
 0x7d1   :  { %v7020_v60 = vadd.f32 %v3508_v52, %v3506_v10  ;;  %3608 = vmatprep.subr.bf16.mxu0 %v6847_v34  ;;  %3651 = vmatprep.subr.bf16.mxu1 %v6850_v51  ;;  %v5114_v10 = vld [vmem:[#allocation8 + $0xe0] ss:$16 sps:$4 sm:$0xff]  }
 0x7d2   :  { %v7985_v25 = vld [vmem:[#allocation87_spill] sm:$0xff] }
 0x7d3   :  { %4860 = vtanh.f32 %v7020_v60 }
 0x7d4   :  { %3609 = vmatpush1.bf16.msra.mxu0 %v7972_v39  ;;  %3652 = vmatpush1.bf16.msra.mxu1 %v7973_v40 }
 0x7d5   :  { %3610 = vmatprep.subr.bf16.mxu0 %v7974_v2  ;;  %3653 = vmatprep.subr.bf16.mxu1 %v7975_v21 }
 0x7d8   :  { %3611 = vmatpush1.bf16.msra.mxu0 %v7976_v32  ;;  %3654 = vmatpush1.bf16.msra.mxu1 %v7977_v28 }
 0x7d9   :  { %3612 = vmatprep.subr.bf16.mxu0 %v7978_v18  ;;  %3655 = vmatprep.subr.bf16.mxu1 %v7979_v7 }
 0x7dc   :  { %3613 = vmatpush1.bf16.msra.mxu0 %v7980_v53  ;;  %3656 = vmatpush1.bf16.msra.mxu1 %v7981_v45  ;;  %v4859_v13 = vpop.eup %4858 }
 0x7dd   :  { %3614 = vmatprep.subr.bf16.mxu0 %v7982_v30  ;;  %3657 = vmatprep.subr.bf16.mxu1 %v6887_v57  ;;  %v3513_v33 = vmul.f32 %v4859_v13, %v3503_v9  ;;  %v7987_v13 = vld [vmem:[#allocation102_spill] sm:$0xff]  ;;  %v7989_v9 = vld [vmem:[#allocation52_spill] sm:$0xff] }
 0x7e0   :  { %v4861_v11 = vpop.eup %4860  ;;  %3615 = vmatpush1.bf16.msra.mxu0 %v7983_v54  ;;  %3658 = vmatpush1.bf16.msra.mxu1 %v6893_v43 }
 0x7e1   :  { %v3514_v41 = vmul.f32 %v4861_v11, %v3504_v55  ;;  %3616 = vmatprep.subr.bf16.mxu0 %v6896_v20  ;;  %3659 = vmatprep.subr.bf16.mxu1 %v6899_v38  ;;  %v7991_v55 = vld [vmem:[#allocation54_spill] sm:$0xff]  ;;  %v7993_v11 = vld [vmem:[#allocation56_spill] sm:$0xff] }
 0x7e3   :  { %v3515_v52 = vpack.c.bf16 %v3514_v41, %v3513_v33  ;;  %v7995_v33 = vld [vmem:[#allocation59_spill] sm:$0xff]  ;;  %v7996_v41 = vld [vmem:[#allocation60_spill] sm:$0xff] }
 0x7e4   :  { %3617 = vmatpush1.bf16.msra.mxu0 %v6902_v48  ;;  %3660 = vmatpush1.bf16.msra.mxu1 %v6905_v49 }
 0x7e5   :  { %3744 = vmatprep.subr.bf16.mxu0 %v6598_v15  ;;  %3787 = vmatprep.subr.bf16.mxu1 %v6601_v37  ;;  %v5117_v15 = vld [vmem:[#allocation8 + $0xa4] ss:$16 sps:$4 sm:$0xff]   ;;  %v5118_v37 = vld [vmem:[#allocation8 + $0xa0] ss:$16 sps:$4 sm:$0xff]  }
 0x7e7   :  { %3635 = vmatmul.mubr.bf16.vlgmr.msra.gmra.mxu0 %v3515_v52  ;;  %3678 = vmatmul.mubr.bf16.vlgmr.msra.gmra.mxu1 %v3515_v52 }
 0x7e8   :  { %3745 = vmatpush1.bf16.msra.mxu0 %v5114_v10  ;;  %3788 = vmatpush1.bf16.msra.mxu1 %v6607_v35  ;;  %v5119_v35 = vld [vmem:[#allocation8 + $0x84] ss:$16 sps:$4 sm:$0xff]  }
 0x7e9   :  { %3746 = vmatprep.subr.bf16.mxu0 %v5115_v61  ;;  %3789 = vmatprep.subr.bf16.mxu1 %v6611_v31  ;;  %v5120_v31 = vld [vmem:[#allocation8 + $0x80] ss:$16 sps:$4 sm:$0xff]   ;;  %v7998_v61 = vld [vmem:[#allocation62_spill] sm:$0xff] }
 0x7ea   :  { %3776 = vmatprep.mubr.bf16.mxu0 %v7605_v26  ;;  %3819 = vmatprep.mubr.bf16.mxu1 %v7605_v26  ;;  %v7997_v10 = vld [vmem:[#allocation61_spill] sm:$0xff] }
 0x7ec   :  { %3747 = vmatpush1.bf16.msra.mxu0 %v5116_v50  ;;  %3790 = vmatpush1.bf16.msra.mxu1 %v6617_v36  ;;  %v5122_v36 = vld [vmem:[#allocation8 + $0x60] ss:$16 sps:$4 sm:$0xff]   ;;  %v7999_v50 = vld [vmem:[#allocation76_spill] sm:$0xff] }
 0x7ed   :  { %3748 = vmatprep.subr.bf16.mxu0 %v5117_v15  ;;  %3791 = vmatprep.subr.bf16.mxu1 %v6621_v3  ;;  %v5123_v3 = vld [vmem:[#allocation8 + $0x44] ss:$16 sps:$4 sm:$0xff]   ;;  %v8000_v15 = vld [vmem:[#allocation16_spill] sm:$0xff] }
 0x7f0   :  { %3749 = vmatpush1.bf16.msra.mxu0 %v5118_v37  ;;  %3792 = vmatpush1.bf16.msra.mxu1 %v6625_v46  ;;  %v7984_v46 = vld [vmem:[#allocation84_spill] sm:$0xff]  ;;  %v8001_v37 = vld [vmem:[#allocation15_spill] sm:$0xff] }
 0x7f1   :  { %3750 = vmatprep.subr.bf16.mxu0 %v5119_v35  ;;  %3793 = vmatprep.subr.bf16.mxu1 %v6629_v24  ;;  %v7986_v24 = vld [vmem:[#allocation101_spill] sm:$0xff]  ;;  %v8002_v35 = vld [vmem:[#allocation18_spill] sm:$0xff] }
 0x7f4   :  { %3751 = vmatpush1.bf16.msra.mxu0 %v5120_v31  ;;  %3794 = vmatpush1.bf16.msra.mxu1 %v6633_v8  ;;  %v7988_v8 = vld [vmem:[#allocation99_spill] sm:$0xff]  ;;  %v8003_v31 = vld [vmem:[#allocation17_spill] sm:$0xff] }
 0x7f5   :  { %3752 = vmatprep.subr.bf16.mxu0 %v5121_v63  ;;  %3795 = vmatprep.subr.bf16.mxu1 %v6637_v59  ;;  %v7990_v59 = vld [vmem:[#allocation53_spill] sm:$0xff]  ;;  %v8005_v63 = vld [vmem:[#allocation19_spill] sm:$0xff] }
 0x7f8   :  { %3753 = vmatpush1.bf16.msra.mxu0 %v5122_v36  ;;  %3796 = vmatpush1.bf16.msra.mxu1 %v6641_v62  ;;  %v7992_v62 = vld [vmem:[#allocation55_spill] sm:$0xff]  ;;  %v8006_v36 = vld [vmem:[#allocation22_spill] sm:$0xff] }
 0x7f9   :  { %3754 = vmatprep.subr.bf16.mxu0 %v5123_v3  ;;  %3797 = vmatprep.subr.bf16.mxu1 %v6645_v56  ;;  %v7994_v56 = vld [vmem:[#allocation57_spill] sm:$0xff] }
 0x7fa   :  { %v8007_v3 = vld [vmem:[#allocation21_spill] sm:$0xff] }
 0x7fc   :  { %3755 = vmatpush1.bf16.msra.mxu0 %v7984_v46  ;;  %3798 = vmatpush1.bf16.msra.mxu1 %v7985_v25  ;;  %v8008_v46 = vld [vmem:[#allocation24_spill] sm:$0xff]  ;;  %v8009_v25 = vld [vmem:[#allocation23_spill] sm:$0xff] }
 0x7fd   :  { %3756 = vmatprep.subr.bf16.mxu0 %v7986_v24  ;;  %3799 = vmatprep.subr.bf16.mxu1 %v7987_v13  ;;  %v8010_v24 = vld [vmem:[#allocation26_spill] sm:$0xff]  ;;  %v8011_v13 = vld [vmem:[#allocation25_spill] sm:$0xff] }
 0x800   :  { %3757 = vmatpush1.bf16.msra.mxu0 %v7988_v8  ;;  %3800 = vmatpush1.bf16.msra.mxu1 %v7989_v9  ;;  %v8012_v8 = vld [vmem:[#allocation28_spill] sm:$0xff]  ;;  %v8013_v9 = vld [vmem:[#allocation27_spill] sm:$0xff] }
 0x801   :  { %3758 = vmatprep.subr.bf16.mxu0 %v7990_v59  ;;  %3801 = vmatprep.subr.bf16.mxu1 %v7991_v55  ;;  %v8014_v59 = vld [vmem:[#allocation29_spill] sm:$0xff]  ;;  %v8015_v55 = vld [vmem:[#allocation30_spill] sm:$0xff] }
 0x804   :  { %3759 = vmatpush1.bf16.msra.mxu0 %v7992_v62  ;;  %3802 = vmatpush1.bf16.msra.mxu1 %v7993_v11  ;;  %v8016_v62 = vld [vmem:[#allocation31_spill] sm:$0xff]  ;;  %v8017_v11 = vld [vmem:[#allocation58_spill] sm:$0xff] }
 0x805   :  { %3877 = vmatprep.subr.bf16.mxu0 %v7994_v56  ;;  %3920 = vmatprep.subr.bf16.mxu1 %v7995_v33  ;;  %v8018_v56 = vld [vmem:[#allocation68_spill] sm:$0xff]  ;;  %v8019_v33 = vld [vmem:[#allocation70_spill] sm:$0xff] }
 0x807   :  { %3777 = vmatmul.mubr.bf16.vlgmr.msra.gmra.mxu0 %v3515_v52  ;;  %3820 = vmatmul.mubr.bf16.vlgmr.msra.gmra.mxu1 %v3515_v52  ;;  %v8004_v52 = vld [vmem:[#allocation20_spill] sm:$0xff] }
 0x808   :  { %3878 = vmatpush1.bf16.msra.mxu0 %v7996_v41  ;;  %3921 = vmatpush1.bf16.msra.mxu1 %v7997_v10  ;;  %v8020_v41 = vld [vmem:[#allocation81_spill] sm:$0xff]  ;;  %v8021_v10 = vld [vmem:[#allocation74_spill] sm:$0xff] }
 0x809   :  { %3879 = vmatprep.subr.bf16.mxu0 %v7998_v61  ;;  %3922 = vmatprep.subr.bf16.mxu1 %v7999_v50  ;;  %v8022_v61 = vld [vmem:[#allocation72_spill] sm:$0xff]  ;;  %v8023_v50 = vld [vmem:[#allocation85_spill] sm:$0xff] }
 0x80a   :  { %3909 = vmatprep.mubr.bf16.mxu0 %v7605_v26  ;;  %3952 = vmatprep.mubr.bf16.mxu1 %v7605_v26 }
 0x80c   :  { %3880 = vmatpush1.bf16.msra.mxu0 %v8000_v15  ;;  %3923 = vmatpush1.bf16.msra.mxu1 %v8001_v37  ;;  %v8024_v15 = vld [vmem:[#allocation86_spill] sm:$0xff]  ;;  %v8025_v37 = vld [vmem:[#allocation83_spill] sm:$0xff] }
 0x80d   :  { %3881 = vmatprep.subr.bf16.mxu0 %v8002_v35  ;;  %3924 = vmatprep.subr.bf16.mxu1 %v8003_v31  ;;  %v8026_v35 = vld [vmem:[#allocation32_spill] sm:$0xff]  ;;  %v8027_v31 = vld [vmem:[#allocation33_spill] sm:$0xff] }
 0x810   :  { %3882 = vmatpush1.bf16.msra.mxu0 %v8004_v52  ;;  %3925 = vmatpush1.bf16.msra.mxu1 %v8005_v63 }
 0x811   :  { %3883 = vmatprep.subr.bf16.mxu0 %v8006_v36  ;;  %3926 = vmatprep.subr.bf16.mxu1 %v8007_v3 }
 0x814   :  { %3884 = vmatpush1.bf16.msra.mxu0 %v8008_v46  ;;  %3927 = vmatpush1.bf16.msra.mxu1 %v8009_v25 }
 0x815   :  { %3885 = vmatprep.subr.bf16.mxu0 %v8010_v24  ;;  %3928 = vmatprep.subr.bf16.mxu1 %v8011_v13 }
 0x818   :  { %3886 = vmatpush1.bf16.msra.mxu0 %v8012_v8  ;;  %3929 = vmatpush1.bf16.msra.mxu1 %v8013_v9 }
 0x819   :  { %3887 = vmatprep.subr.bf16.mxu0 %v8014_v59  ;;  %3930 = vmatprep.subr.bf16.mxu1 %v8015_v55 }
 0x81c   :  { %3888 = vmatpush1.bf16.msra.mxu0 %v8016_v62  ;;  %3931 = vmatpush1.bf16.msra.mxu1 %v8017_v11 }
 0x81d   :  { %3889 = vmatprep.subr.bf16.mxu0 %v8018_v56  ;;  %3932 = vmatprep.subr.bf16.mxu1 %v8019_v33 }
 0x820   :  { %3890 = vmatpush1.bf16.msra.mxu0 %v8020_v41  ;;  %3933 = vmatpush1.bf16.msra.mxu1 %v8021_v10 }
 0x821   :  { %3891 = vmatprep.subr.bf16.mxu0 %v8022_v61  ;;  %3934 = vmatprep.subr.bf16.mxu1 %v8023_v50 }
 0x824   :  { %3892 = vmatpush1.bf16.msra.mxu0 %v8024_v15  ;;  %3935 = vmatpush1.bf16.msra.mxu1 %v8025_v37 }
 0x825   :  { %3963 = vmatprep.subr.bf16.mxu0 %v8026_v35  ;;  %4006 = vmatprep.subr.bf16.mxu1 %v8027_v31 }
 0x887   :  { %v3550_v52 = vpop.f32.mrf.mxu0  ;;  %v3593_v63 = vpop.f32.mrf.mxu1 }
 0x889   :  { %v3552_v36 = vpop.f32.mrf.mxu0  ;;  %v3595_v3 = vpop.f32.mrf.mxu1 }
 0x88b   :  { %v3554_v46 = vpop.f32.mrf.mxu0  ;;  %v3597_v25 = vpop.f32.mrf.mxu1 }
 0x88d   :  { %v3556_v24 = vpop.f32.mrf.mxu0  ;;  %v3599_v13 = vpop.f32.mrf.mxu1 }
 0x8a7   :  { %v3636_v8 = vpop.f32.mrf.mxu0  ;;  %v3679_v9 = vpop.f32.mrf.mxu1 }
 0x8a8   :  { %v3637_v59 = vadd.f32 %v3636_v8, %v3550_v52  ;;  %v3680_v56 = vadd.f32 %v3679_v9, %v3593_v63 }
 0x8a9   :  { %v3638_v55 = vpop.f32.mrf.mxu0  ;;  %v3681_v62 = vpop.f32.mrf.mxu1 }
 0x8aa   :  { %v3688_v11 = vadd.f32 %v3637_v59, %v5915_v0  ;;  %v3639_v33 = vadd.f32 %v3638_v55, %v3552_v36  ;;  %v3690_v35 = vadd.f32 %v3680_v56, %v5924_v23  ;;  %v3682_v55 = vadd.f32 %v3681_v62, %v3595_v3 }
 0x8ab   :  { %v3640_v41 = vpop.f32.mrf.mxu0  ;;  %v3683_v15 = vpop.f32.mrf.mxu1 }
 0x8ac   :  { %v3696_v10 = vmul.f32 0.5, %v3688_v11  ;;  %v3689_v61 = vadd.f32 %v3639_v33, %v5919_v12  ;;  %v3641_v50 = vadd.f32 %v3640_v41, %v3554_v46  ;;  %v3684_v8 = vadd.f32 %v3683_v15, %v3597_v25 }
 0x8ad   :  { %v3642_v37 = vpop.f32.mrf.mxu0  ;;  %v3685_v9 = vpop.f32.mrf.mxu1  ;;  %v3691_v56 = vadd.f32 %v3682_v55, %v5933_v44 }
 0x8ae   :  { %4862 = vtanh.f32 %v3696_v10  ;;  %v3697_v31 = vmul.f32 0.5, %v3689_v61  ;;  %v3643_v49 = vadd.f32 %v3642_v37, %v3556_v24  ;;  %v3692_v52 = vadd.f32 %v3641_v50, %v5915_v0 }
 0x8af   :  { %v3694_v46 = vadd.f32 %v3684_v8, %v5924_v23  ;;  %v3686_v11 = vadd.f32 %v3685_v9, %v3599_v13  ;;  %v3699_v10 = vmul.f32 0.5, %v3691_v56 }
 0x8b0   :  { %4864 = vtanh.f32 %v3697_v31  ;;  %v3693_v59 = vadd.f32 %v3643_v49, %v5919_v12  ;;  %v3700_v63 = vmul.f32 0.5, %v3692_v52 }
 0x8b1   :  { %4866 = vtanh.f32 %v3690_v35  ;;  %v3695_v24 = vadd.f32 %v3686_v11, %v5933_v44 }
 0x8b2   :  { %v3701_v36 = vmul.f32 0.5, %v3693_v59  ;;  %4868 = vtanh.f32 %v3700_v63 }
 0x8b3   :  { %v3703_v50 = vmul.f32 0.5, %v3695_v24  ;;  %v8028_v24 = vld [vmem:[#allocation69_spill] sm:$0xff] }
 0x8b4   :  { %4870 = vtanh.f32 %v3701_v36 }
 0x8b5   :  { %4872 = vtanh.f32 %v3694_v46 }
 0x8b6   :  { %4874 = vtanh.f32 %v3699_v10  ;;  %v8029_v10 = vld [vmem:[#allocation71_spill] sm:$0xff] }
 0x8b7   :  { %4876 = vtanh.f32 %v3703_v50 }
 0x8bb   :  { %v4863_v33 = vpop.eup %4862 }
 0x8bc   :  { %v3712_v41 = vmul.f32 0.5, %v4863_v33 }
 0x8bd   :  { %v4865_v25 = vpop.eup %4864 }
 0x8be   :  { %v3714_v49 = vadd.f32 0.5, %v3712_v41  ;;  %v3716_v61 = vmul.f32 0.5, %v4865_v25  ;;  %v4867_v15 = vpop.eup %4866 }
 0x8bf   :  { %v4869_v37 = vpop.eup %4868 }
 0x8c0   :  { %v3718_v35 = vadd.f32 0.5, %v3716_v61  ;;  %v3713_v52 = vmul.f32 0.5, %v4869_v37  ;;  %v3726_v13 = vmul.f32 %v4867_v15, %v3714_v49  ;;  %v8030_v61 = vld [vmem:[#allocation116_spill] sm:$0xff] }
 0x8c1   :  { %v4871_v31 = vpop.eup %4870 }
 0x8c2   :  { %v3724_v3 = vmul.f32 %v3718_v35, %v6987_v42  ;;  %v3717_v62 = vmul.f32 0.5, %v4871_v31  ;;  %v3715_v8 = vadd.f32 0.5, %v3713_v52  ;;  %v4873_v36 = vpop.eup %4872  ;;  %v8032_v31 = vld [vmem:[#allocation73_spill] sm:$0xff] }
 0x8c4   :  { %v7112_v59 = vadd.f32 %v3726_v13, %v3724_v3  ;;  %v3719_v63 = vadd.f32 0.5, %v3717_v62  ;;  %v3727_v46 = vmul.f32 %v4873_v36, %v3715_v8  ;;  %v4875_v62 = vpop.eup %4874 }
 0x8c5   :  { %v4877_v36 = vpop.eup %4876 }
 0x8c6   :  { %v3725_v9 = vmul.f32 %v3719_v63, %v6991_v19  ;;  %4878 = vtanh.f32 %v7112_v59  ;;  %v8031_v19 = vld [vmem:[#allocation75_spill] sm:$0xff] }
 0x8c7   :  { %v3778_v55 = vpop.f32.mrf.mxu0  ;;  %v3821_v11 = vpop.f32.mrf.mxu1  ;;  %v503_v37 = vadd.f32 %v7967_v29, %v8031_v19  ;;  %v8034_v29 = vld [vmem:[#allocation117_spill] sm:$0xff] }
 0x8c8   :  { %v7116_v56 = vadd.f32 %v3727_v46, %v3725_v9  ;;  %v3830_v33 = vadd.f32 %v3778_v55, %v8028_v24  ;;  %v3832_v50 = vadd.f32 %v3821_v11, %v8030_v61  ;;  %v8033_v9 = vld [vmem:[#allocation118_spill] sm:$0xff]  ;;  %v3720_v11 = vmul.f32 0.5, %v4875_v62 }
 0x8c9   :  { %v3780_v42 = vpop.f32.mrf.mxu0  ;;  %v3823_v41 = vpop.f32.mrf.mxu1  ;;  %v3721_v24 = vmul.f32 0.5, %v4877_v36 }
 0x8ca   :  { %4880 = vtanh.f32 %v7116_v56  ;;  %v3838_v25 = vmul.f32 0.5, %v3830_v33  ;;  %v3831_v49 = vadd.f32 %v3780_v42, %v8029_v10  ;;  %v3833_v33 = vadd.f32 %v3823_v41, %v8034_v29 }
 0x8cb   :  { %v3782_v15 = vpop.f32.mrf.mxu0  ;;  %v3825_v3 = vpop.f32.mrf.mxu1  ;;  %v3722_v10 = vadd.f32 0.5, %v3720_v11 }
 0x8cc   :  { %4882 = vtanh.f32 %v3838_v25  ;;  %v3839_v35 = vmul.f32 0.5, %v3831_v49  ;;  %v3834_v52 = vadd.f32 %v3782_v15, %v8032_v31  ;;  %v3836_v46 = vadd.f32 %v3825_v3, %v8033_v9 }
 0x8cd   :  { %v3784_v13 = vpop.f32.mrf.mxu0  ;;  %v3827_v25 = vpop.f32.mrf.mxu1  ;;  %v3723_v49 = vadd.f32 0.5, %v3721_v24 }
 0x8ce   :  { %4884 = vtanh.f32 %v3839_v35  ;;  %v3842_v8 = vmul.f32 0.5, %v3834_v52  ;;  %v3835_v63 = vadd.f32 %v3784_v13, %v503_v37  ;;  %v3841_v37 = vmul.f32 0.5, %v3833_v33  ;;  %v8035_v35 = vld [vmem:[#allocation119_spill] sm:$0xff] }
 0x8cf   :  { %4886 = vtanh.f32 %v3832_v50  ;;  %v3837_v50 = vadd.f32 %v3827_v25, %v8035_v35 }
 0x8d0   :  { %4888 = vtanh.f32 %v3842_v8  ;;  %v3843_v55 = vmul.f32 0.5, %v3835_v63 }
 0x8d1   :  { %v3845_v41 = vmul.f32 0.5, %v3837_v50 }
 0x8d2   :  { %4890 = vtanh.f32 %v3843_v55 }
 0x8d3   :  { %4892 = vtanh.f32 %v3836_v46  ;;  %v4879_v42 = vpop.eup %4878 }
 0x8d4   :  { %v3732_v15 = vmul.f32 %v4879_v42, %v3722_v10  ;;  %4894 = vtanh.f32 %v3841_v37 }
 0x8d5   :  { %4896 = vtanh.f32 %v3845_v41 }
 0x8d7   :  { %v4881_v61 = vpop.eup %4880 }
 0x8d8   :  { %v3733_v19 = vmul.f32 %v4881_v61, %v3723_v49 }
 0x8d9   :  { %v4883_v31 = vpop.eup %4882 }
 0x8da   :  { %v3734_v52 = vpack.c.bf16 %v3733_v19, %v3732_v15  ;;  %v3854_v3 = vmul.f32 0.5, %v4883_v31 }
 0x8db   :  { %v4885_v13 = vpop.eup %4884 }
 0x8dc   :  { %v4887_v62 = vpop.eup %4886  ;;  %v3856_v8 = vadd.f32 0.5, %v3854_v3  ;;  %v3858_v63 = vmul.f32 0.5, %v4885_v13  ;;  %3910 = vmatmul.mubr.bf16.vlgmr.msra.gmra.mxu0 %v3734_v52  ;;  %3953 = vmatmul.mubr.bf16.vlgmr.msra.gmra.mxu1 %v3734_v52 }
 0x8dd   :  { %v4889_v36 = vpop.eup %4888  ;;  %3964 = vmatpush1.bf16.msra.mxu0 %v6808_v47  ;;  %4007 = vmatpush1.bf16.msra.mxu1 %v6811_v27 }
 0x8de   :  { %v3860_v9 = vadd.f32 0.5, %v3858_v63  ;;  %v3868_v46 = vmul.f32 %v4887_v62, %v3856_v8  ;;  %v3855_v55 = vmul.f32 0.5, %v4889_v36  ;;  %3965 = vmatprep.subr.bf16.mxu0 %v6814_v58  ;;  %4008 = vmatprep.subr.bf16.mxu1 %v6817_v22 }
 0x8df   :  { %v4891_v11 = vpop.eup %4890  ;;  %3995 = vmatprep.mubr.bf16.mxu0 %v7605_v26  ;;  %4038 = vmatprep.mubr.bf16.mxu1 %v7605_v26 }
 0x8e0   :  { %v3866_v24 = vmul.f32 %v3860_v9, %v7012_v1  ;;  %v3857_v29 = vadd.f32 0.5, %v3855_v55  ;;  %v3859_v33 = vmul.f32 0.5, %v4891_v11  ;;  %v4893_v47 = vpop.eup %4892 }
 0x8e1   :  { %3966 = vmatpush1.bf16.msra.mxu0 %v6823_v14  ;;  %4009 = vmatpush1.bf16.msra.mxu1 %v6826_v16  ;;  %v4895_v14 = vpop.eup %4894 }
 0x8e2   :  { %v3870_v27 = vadd.f32 %v3868_v46, %v3866_v24  ;;  %v3861_v42 = vadd.f32 0.5, %v3859_v33  ;;  %v3869_v58 = vmul.f32 %v4893_v47, %v3857_v29  ;;  %3967 = vmatprep.subr.bf16.mxu0 %v6831_v6  ;;  %4010 = vmatprep.subr.bf16.mxu1 %v6834_v4  ;;  %v3862_v16 = vmul.f32 0.5, %v4895_v14  ;;  %v4897_v6 = vpop.eup %4896 }
 0x8e4   :  { %4898 = vtanh.f32 %v3870_v27  ;;  %v3867_v26 = vmul.f32 %v3861_v42, %v7020_v60  ;;  %v3864_v4 = vadd.f32 0.5, %v3862_v16 }
 0x8e5   :  { %3968 = vmatpush1.bf16.msra.mxu0 %v6838_v5  ;;  %4011 = vmatpush1.bf16.msra.mxu1 %v6841_v17  ;;  %v3863_v5 = vmul.f32 0.5, %v4897_v6 }
 0x8e6   :  { %v3871_v22 = vadd.f32 %v3869_v58, %v3867_v26  ;;  %3969 = vmatprep.subr.bf16.mxu0 %v6847_v34  ;;  %4012 = vmatprep.subr.bf16.mxu1 %v6850_v51 }
 0x8e7   :  { %v3865_v51 = vadd.f32 0.5, %v3863_v5 }
 0x8e8   :  { %4900 = vtanh.f32 %v3871_v22 }
 0x8e9   :  { %3970 = vmatpush1.bf16.msra.mxu0 %v7972_v39  ;;  %4013 = vmatpush1.bf16.msra.mxu1 %v7973_v40  ;;  %v8036_v40 = vld [vmem:[#allocation46_spill] sm:$0xff] }
 0x8ea   :  { %3971 = vmatprep.subr.bf16.mxu0 %v7974_v2  ;;  %4014 = vmatprep.subr.bf16.mxu1 %v7975_v21  ;;  %v5194_v2 = vmov 0.0   ;;  %v4599_v21 = vld [vmem:[%s7209_s7 + $0x10] sm:$0xff]  }
 0x8ed   :  { %3972 = vmatpush1.bf16.msra.mxu0 %v7976_v32  ;;  %4015 = vmatpush1.bf16.msra.mxu1 %v7977_v28  ;;  %v4600_v32 = vld [vmem:[%s7209_s7 + $0x8] sm:$0xff]   ;;  %v4601_v28 = vld [vmem:[%s7209_s7] sm:$0xff]  }
 0x8ee   :  { %3973 = vmatprep.subr.bf16.mxu0 %v7978_v18  ;;  %4016 = vmatprep.subr.bf16.mxu1 %v7979_v7 }
 0x8f1   :  { %v4899_v17 = vpop.eup %4898  ;;  %3974 = vmatpush1.bf16.msra.mxu0 %v7980_v53  ;;  %4017 = vmatpush1.bf16.msra.mxu1 %v7981_v45 }
 0x8f2   :  { %v3874_v34 = vmul.f32 %v4899_v17, %v3864_v4  ;;  %3975 = vmatprep.subr.bf16.mxu0 %v7982_v30  ;;  %4018 = vmatprep.subr.bf16.mxu1 %v6887_v57  ;;  %v4594_v57 = vld [vmem:[%s7209_s7 + $0x38] sm:$0xff]  }
 0x8f5   :  { %v4901_v1 = vpop.eup %4900  ;;  %3976 = vmatpush1.bf16.msra.mxu0 %v7983_v54  ;;  %4019 = vmatpush1.bf16.msra.mxu1 %v6893_v43  ;;  %v4597_v43 = vld [vmem:[%s7209_s7 + $0x20] sm:$0xff]  }
 0x8f6   :  { %v3875_v60 = vmul.f32 %v4901_v1, %v3865_v51  ;;  %3977 = vmatprep.subr.bf16.mxu0 %v6896_v20  ;;  %4020 = vmatprep.subr.bf16.mxu1 %v6899_v38  ;;  %v4595_v20 = vld [vmem:[%s7209_s7 + $0x30] sm:$0xff]   ;;  %v4596_v38 = vld [vmem:[%s7209_s7 + $0x28] sm:$0xff]  }
 0x8f8   :  { %v3876_v39 = vpack.c.bf16 %v3875_v60, %v3874_v34 }
 0x8f9   :  { %3978 = vmatpush1.bf16.msra.mxu0 %v6902_v48  ;;  %4021 = vmatpush1.bf16.msra.mxu1 %v8036_v40  ;;  %v4598_v48 = vld [vmem:[%s7209_s7 + $0x18] sm:$0xff]  }
 0x8fa   :  { %4391 = vst [vmem:[#allocation3] sm:$0xff] %v3876_v39   ;;  %4406 = vmatprep.subr.bf16.mxu0 %v5194_v2 }
 0x8fc   :  { %3996 = vmatmul.mubr.bf16.vlgmr.msra.gmra.mxu0 %v3876_v39  ;;  %4039 = vmatmul.mubr.bf16.vlgmr.msra.gmra.mxu1 %v3876_v39 }
 0x8fd   :  { %4407 = vmatpush3.bf16.msra.mxu0 %v4594_v57  ;;  %4422 = vmatprep.mubr.msk.bf16.mxu0 %vm5195_vm2, %v5194_v2 }
 0x8fe   :  { %4408 = vmatprep.subr.bf16.mxu0 %v5194_v2 }
 0x901   :  { %4409 = vmatpush3.bf16.msra.mxu0 %v4595_v20 }
 0x902   :  { %4410 = vmatprep.subr.bf16.mxu0 %v5194_v2 }
 0x905   :  { %4411 = vmatpush3.bf16.msra.mxu0 %v4596_v38 }
 0x906   :  { %4412 = vmatprep.subr.bf16.mxu0 %v5194_v2 }
 0x909   :  { %4413 = vmatpush3.bf16.msra.mxu0 %v4597_v43 }
 0x90a   :  { %4414 = vmatprep.subr.bf16.mxu0 %v5194_v2 }
 0x90d   :  { %4415 = vmatpush3.bf16.msra.mxu0 %v4598_v48 }
 0x90e   :  { %4416 = vmatprep.subr.bf16.mxu0 %v5194_v2 }
 0x911   :  { %4417 = vmatpush3.bf16.msra.mxu0 %v4599_v21 }
 0x912   :  { %4418 = vmatprep.subr.bf16.mxu0 %v5194_v2 }
 0x915   :  { %4419 = vmatpush3.bf16.msra.mxu0 %v4600_v32 }
 0x916   :  { %4420 = vmatprep.subr.bf16.mxu0 %v5194_v2 }
 0x919   :  { %4421 = vmatpush3.bf16.msra.mxu0 %v4601_v28 }
 0x99c   :  { %v3911_v18 = vpop.f32.mrf.mxu0  ;;  %v3954_v7 = vpop.f32.mrf.mxu1 }
 0x99e   :  { %v3913_v53 = vpop.f32.mrf.mxu0  ;;  %v3956_v45 = vpop.f32.mrf.mxu1 }
 0x9a0   :  { %v3915_v30 = vpop.f32.mrf.mxu0  ;;  %v3958_v54 = vpop.f32.mrf.mxu1 }
 0x9a2   :  { %v3917_v25 = vpop.f32.mrf.mxu0  ;;  %v3960_v10 = vpop.f32.mrf.mxu1 }
 0x9bc   :  { %v3997_v49 = vpop.f32.mrf.mxu0  ;;  %v4040_v61 = vpop.f32.mrf.mxu1 }
 0x9bd   :  { %v3998_v15 = vadd.f32 %v3997_v49, %v3911_v18  ;;  %v4041_v50 = vadd.f32 %v4040_v61, %v3954_v7 }
 0x9be   :  { %v3999_v19 = vpop.f32.mrf.mxu0  ;;  %v4042_v37 = vpop.f32.mrf.mxu1 }
 0x9bf   :  { %v4049_v35 = vadd.f32 %v3998_v15, %v5915_v0  ;;  %v4000_v31 = vadd.f32 %v3999_v19, %v3913_v53  ;;  %v4051_v41 = vadd.f32 %v4041_v50, %v5924_v23  ;;  %v4043_v27 = vadd.f32 %v4042_v37, %v3956_v45 }
 0x9c0   :  { %v4001_v52 = vpop.f32.mrf.mxu0  ;;  %v4044_v8 = vpop.f32.mrf.mxu1 }
 0x9c1   :  { %v4057_v3 = vmul.f32 0.5, %v4049_v35  ;;  %v4050_v13 = vadd.f32 %v4000_v31, %v5919_v12  ;;  %v4002_v62 = vadd.f32 %v4001_v52, %v3915_v30  ;;  %v4045_v55 = vadd.f32 %v4044_v8, %v3958_v54 }
 0x9c2   :  { %v4003_v63 = vpop.f32.mrf.mxu0  ;;  %v4046_v33 = vpop.f32.mrf.mxu1  ;;  %v4052_v58 = vadd.f32 %v4043_v27, %v5933_v44 }
 0x9c3   :  { %4902 = vtanh.f32 %v4057_v3  ;;  %v4058_v36 = vmul.f32 0.5, %v4050_v13  ;;  %v4004_v9 = vadd.f32 %v4003_v63, %v3917_v25  ;;  %v4053_v46 = vadd.f32 %v4002_v62, %v5915_v0  ;;  %v4374_v25 = vld [vmem:[#allocation7] ss:$0 sm:$0xff] }
 0x9c4   :  { %v4055_v47 = vadd.f32 %v4045_v55, %v5924_v23  ;;  %v4047_v42 = vadd.f32 %v4046_v33, %v3960_v10  ;;  %v4060_v16 = vmul.f32 0.5, %v4052_v58 }
 0x9c5   :  { %4904 = vtanh.f32 %v4058_v36  ;;  %v4054_v11 = vadd.f32 %v4004_v9, %v5919_v12  ;;  %v4061_v24 = vmul.f32 0.5, %v4053_v46 }
 0x9c6   :  { %4906 = vtanh.f32 %v4051_v41  ;;  %v4056_v26 = vadd.f32 %v4047_v42, %v5933_v44 }
 0x9c7   :  { %v4062_v29 = vmul.f32 0.5, %v4054_v11  ;;  %4908 = vtanh.f32 %v4061_v24 }
 0x9c8   :  { %v4064_v4 = vmul.f32 0.5, %v4056_v26 }
 0x9c9   :  { %4910 = vtanh.f32 %v4062_v29 }
 0x9ca   :  { %4912 = vtanh.f32 %v4055_v47 }
 0x9cb   :  { %4914 = vtanh.f32 %v4060_v16 }
 0x9cc   :  { %4916 = vtanh.f32 %v4064_v4 }
 0x9d0   :  { %v4903_v0 = vpop.eup %4902 }
 0x9d1   :  { %v4073_v22 = vmul.f32 0.5, %v4903_v0 }
 0x9d2   :  { %v4905_v14 = vpop.eup %4904 }
 0x9d3   :  { %v4075_v12 = vadd.f32 0.5, %v4073_v22  ;;  %v4077_v6 = vmul.f32 0.5, %v4905_v14  ;;  %v4907_v5 = vpop.eup %4906 }
 0x9d4   :  { %v4909_v17 = vpop.eup %4908 }
 0x9d5   :  { %v4079_v34 = vadd.f32 0.5, %v4077_v6  ;;  %v4074_v23 = vmul.f32 0.5, %v4909_v17  ;;  %v4087_v60 = vmul.f32 %v4907_v5, %v4075_v12 }
 0x9d6   :  { %v4911_v51 = vpop.eup %4910 }
 0x9d7   :  { %v4085_v1 = vmul.f32 %v4079_v34, %v7112_v59  ;;  %v4078_v39 = vmul.f32 0.5, %v4911_v51  ;;  %v4076_v40 = vadd.f32 0.5, %v4074_v23  ;;  %v4913_v2 = vpop.eup %4912 }
 0x9d8   :  { %v4915_v48 = vpop.eup %4914 }
 0x9d9   :  { %v4089_v44 = vadd.f32 %v4087_v60, %v4085_v1  ;;  %v4080_v57 = vadd.f32 0.5, %v4078_v39  ;;  %v4088_v38 = vmul.f32 %v4913_v2, %v4076_v40  ;;  %v4917_v21 = vpop.eup %4916  ;;  %v4081_v32 = vmul.f32 0.5, %v4915_v48 }
 0x9da   :  { %v4082_v28 = vmul.f32 0.5, %v4917_v21 }
 0x9db   :  { %v4086_v20 = vmul.f32 %v4080_v57, %v7116_v56  ;;  %4918 = vtanh.f32 %v4089_v44  ;;  %v4083_v7 = vadd.f32 0.5, %v4081_v32 }
 0x9dc   :  { %v4084_v59 = vadd.f32 0.5, %v4082_v28 }
 0x9dd   :  { %v4090_v43 = vadd.f32 %v4088_v38, %v4086_v20 }
 0x9df   :  { %4920 = vtanh.f32 %v4090_v43 }
 0x9e8   :  { %v4919_v18 = vpop.eup %4918 }
 0x9e9   :  { %v4093_v45 = vmul.f32 %v4919_v18, %v4083_v7 }
 0x9ec   :  { %v4921_v53 = vpop.eup %4920 }
 0x9ed   :  { %v4094_v30 = vmul.f32 %v4921_v53, %v4084_v59 }
 0x9ef   :  { %v4095_v54 = vpack.c.bf16 %v4094_v30, %v4093_v45 }
 0x9f1   :  { %4396 = vst [vmem:[#allocation5] sm:$0xff] %v4095_v54   ;;  %4423 = vmatmul.mubr.bf16.vlgmr.msra.gmra.mxu0 %v4095_v54 }
 0xab1   :  { %v4226_v10 = vpop.f32.mrf.mxu0 }
 0xab2   :  { %v4227_v56 = vadd.f32 %v4374_v25, %v4226_v10 }
 0xab3   :  { %v4424_v49 = vpop.f32.mrf.mxu0 }
 0xab4   :  { %4234 = vst.msk [vmem:[%s7211_s9] sm:$0xff] %vm4233_vm3, %v4227_v56 }
 0xab5   :  { %v4229_v61 = vpop.f32.mrf.mxu0 }
 0xab6   :  { %v4230_v15 = vadd.f32 %v4374_v25, %v4229_v61 }
 0xab7   :  { %v4425_v19 = vpop.f32.mrf.mxu0 }
 0xab8   :  { %4235 = vst.msk [vmem:[%s7211_s9 + $0x8] sm:$0xff] %vm4233_vm3, %v4230_v15 }
 0xab9   :  { %4240 = vsyncpa [#allocation9], 1 }
 0xaba   :  { %4241 = vsyncpa [#allocation11], 1 }

</bundles_post_ra>
